<compile_context>
chip_gen: v5e
topology: v5e:2x2
jax: 0.10.0
libtpu: 0.0.40
codegen_flags: <defaults>
</compile_context>

<pallas_src>
import functools

import jax
import jax.numpy as jnp
from jax.experimental import pallas as pl
from jax.experimental.pallas import tpu as pltpu


# ---------------------------------------------------------------------------
# Kernel body (shared by the W-conv and H-conv steps).
# ---------------------------------------------------------------------------
def _gru_kernel(h_ref, x_ref, wzr_ref, wq_ref, bzr_ref, bq_ref, out_ref,
                pad_ref, *, conv_axis):
    """Fused separable-conv GRU update on one (A, B, C) block.

    h_ref:   (A, B, Ch)      hidden-state block
    x_ref:   (A, B, Cx)      input block
    wzr_ref: (5, Cin, 2*Ch)  packed z|r gate taps (Cin = Ch + Cx, rows = [h|x])
    wq_ref:  (5, Cin, Ch)    q-conv taps, applied to [r*h | x]
    bzr_ref: (1, 2*Ch)       packed z|r bias
    bq_ref:  (1, Ch)         q bias
    out_ref: (A, B, Ch)      new hidden state
    pad_ref: VMEM scratch holding [h | x], conv axis padded by 2 on each side
    conv_axis: 0 -> 5-tap conv along A (H step), 1 -> along B (W step)
    """
    f32 = jnp.float32
    A, B, Ch = h_ref.shape
    Cx = x_ref.shape[-1]
    Cin = Ch + Cx
    M = A * B
    L = (A, B)[conv_axis]
    dt = pad_ref.dtype

    h_val = h_ref[...]

    # In-VMEM zero-halo padding of the combined [h | x] block.  Only the 2+2
    # halo rows/cols are re-zeroed each grid step; the interior is overwritten,
    # so stale scratch never leaks.
    if conv_axis == 0:
        pad_ref[0:2] = jnp.zeros((2, B, Cin), dt)
        pad_ref[L + 2:] = jnp.zeros((2, B, Cin), dt)
        pad_ref[2:L + 2, :, 0:Ch] = h_val.astype(dt)
        pad_ref[2:L + 2, :, Ch:Cin] = x_ref[...].astype(dt)

        def tap(k):
            return pad_ref[k:k + L].reshape(M, Cin)

        def put_rh(v):
            pad_ref[2:L + 2, :, 0:Ch] = v
    else:
        pad_ref[:, 0:2] = jnp.zeros((A, 2, Cin), dt)
        pad_ref[:, L + 2:] = jnp.zeros((A, 2, Cin), dt)
        pad_ref[:, 2:L + 2, 0:Ch] = h_val.astype(dt)
        pad_ref[:, 2:L + 2, Ch:Cin] = x_ref[...].astype(dt)

        def tap(k):
            return pad_ref[:, k:k + L].reshape(M, Cin)

        def put_rh(v):
            pad_ref[:, 2:L + 2, 0:Ch] = v

    # Fused z|r gate conv: 5 MXU dots of (M, Cin) x (Cin, 2*Ch).
    acc = jnp.dot(tap(0), wzr_ref[0], preferred_element_type=f32)
    for k in range(1, 5):
        acc = acc + jnp.dot(tap(k), wzr_ref[k], preferred_element_type=f32)
    zr = jax.nn.sigmoid(acc + bzr_ref[...].astype(f32))
    z = zr[:, 0:Ch]
    r = zr[:, Ch:2 * Ch]

    h_f32 = h_val.astype(f32).reshape(M, Ch)
    # Overwrite the h channels of the padded scratch with r*h; the x channels
    # and the zero halo stay valid for the q conv.
    put_rh((r * h_f32).astype(dt).reshape(A, B, Ch))

    # q conv over [r*h | x]: 5 MXU dots of (M, Cin) x (Cin, Ch).
    qacc = jnp.dot(tap(0), wq_ref[0], preferred_element_type=f32)
    for k in range(1, 5):
        qacc = qacc + jnp.dot(tap(k), wq_ref[k], preferred_element_type=f32)
    q = jnp.tanh(qacc + bq_ref[...].astype(f32))

    h_new = (1.0 - z) * h_f32 + z * q
    out_ref[...] = h_new.reshape(A, B, Ch).astype(out_ref.dtype)


# ---------------------------------------------------------------------------
# Chip-aware tiling helpers.
# ---------------------------------------------------------------------------
def _tile_config():
    """Pick block-size target, grid-evenness preference and VMEM cap per chip."""
    vmem = None
    try:
        vmem = int(pltpu.get_tpu_info().vmem_capacity_bytes)
    except Exception:
        vmem = None
    if vmem is not None and vmem > (64 << 20):
        # v5e / v6e class: 128 MiB VMEM, single TensorCore -> big tiles amortize
        # the ~0.35us/step pipeline overhead and keep HBM DMAs long.
        return {'target_m': 2048, 'want_even': False, 'vmem_cap': 96 << 20}
    # v7x class (64 MiB VMEM, 2 TensorCores) or unknown: smaller tiles, prefer
    # an even number of grid steps, and never request the full physical VMEM.
    return {'target_m': 512 if vmem is not None else 1024,
            'want_even': True, 'vmem_cap': 48 << 20}


def _choose_row_block(R, W, target_m, want_even):
    """Rows per block for the W-conv step (block M = rows * W ~ target_m)."""
    tr = max(1, min(R, target_m // max(W, 1)))
    divs = [d for d in range(1, R + 1) if R % d == 0 and d <= tr]
    best = max(divs)
    if want_even:
        even = [d for d in divs if (R // d) % 2 == 0]
        if even:
            best = max(even)
    if best * 2 >= tr or best == R:
        return best
    # No good divisor: non-divisor block + cdiv grid.  Clipped boundary rows
    # are independent of the valid rows, so this stays correct.
    return tr


def _choose_col_block(W, H, N, target_m, want_even):
    """W-columns per block for the H-conv step (sublane rule: %8 == 0 or == W)."""
    tw = max(1, min(W, target_m // max(H, 1)))
    valid = [d for d in range(1, W + 1)
             if W % d == 0 and (d % 8 == 0 or d == W)]
    cand = [d for d in valid if d <= tw]
    if cand:
        best = max(cand)
        if want_even:
            even = [d for d in cand if (N * (W // d)) % 2 == 0]
            if even:
                best = max(even)
        if best * 2 >= min(tw, W) or best == W:
            return best
    if W <= 8:
        return W
    # 8-aligned non-divisor fallback (grid = cdiv(W, TW); boundary columns are
    # clipped) instead of the full-W plane, so VMEM stays bounded.
    return min(W, max(8, (tw // 8) * 8))


def _vmem_limit_bytes(L, ncols, Ch, Cx, cap):
    """Scoped-VMEM budget from the actual tile arithmetic (+ headroom)."""
    Cin = Ch + Cx
    M = L * ncols
    pad = (L + 4) * ncols * Cin * 4                     # combined padded scratch
    io = 2 * 4 * M * (Cin + Ch)                         # double-buffered h/x/out
    w = 2 * 4 * (5 * Cin * 3 * Ch + 3 * Ch)             # packed weights + bias
    live = 8 * 4 * M * 3 * Ch                           # in-flight f32 temporaries
    need = pad + io + w + live + (8 << 20)
    return int(min(cap, max(32 << 20, need)))


# ---------------------------------------------------------------------------
# pallas_call wrappers for the two conv directions.
# ---------------------------------------------------------------------------
def _gru_step_w(h, x, w, *, mxu_dtype, cfg):
    """Step 1: 5-tap conv along W.  The N*H rows are independent."""
    N, H, W, Ch = h.shape
    Cx = x.shape[-1]
    Cin = Ch + Cx
    R = N * H
    TR = _choose_row_block(R, W, cfg['target_m'], cfg['want_even'])
    h2 = h.reshape(R, W, Ch)
    x2 = x.reshape(R, W, Cx)

    out = pl.pallas_call(
        functools.partial(_gru_kernel, conv_axis=1),
        out_shape=jax.ShapeDtypeStruct((R, W, Ch), h.dtype),
        grid_spec=pltpu.PrefetchScalarGridSpec(
            num_scalar_prefetch=0,
            grid=(pl.cdiv(R, TR),),
            in_specs=[
                pl.BlockSpec((TR, W, Ch), lambda i: (i, 0, 0)),
                pl.BlockSpec((TR, W, Cx), lambda i: (i, 0, 0)),
                # Constant-index weights/bias (resident across the grid).
                pl.BlockSpec((5, Cin, 2 * Ch), lambda i: (0, 0, 0)),
                pl.BlockSpec((5, Cin, Ch), lambda i: (0, 0, 0)),
                pl.BlockSpec((1, 2 * Ch), lambda i: (0, 0)),
                pl.BlockSpec((1, Ch), lambda i: (0, 0)),
            ],
            out_specs=pl.BlockSpec((TR, W, Ch), lambda i: (i, 0, 0)),
            scratch_shapes=[pltpu.VMEM((TR, W + 4, Cin), mxu_dtype)],
        ),
        compiler_params=pltpu.CompilerParams(
            dimension_semantics=("parallel",),
            vmem_limit_bytes=_vmem_limit_bytes(W, TR, Ch, Cx, cfg['vmem_cap'])),
    )(h2, x2, w['wzr'], w['wq'], w['bzr'], w['bq'])
    return out.reshape(N, H, W, Ch)


def _gru_step_h(h, x, w, *, mxu_dtype, cfg):
    """Step 2: 5-tap conv along H on (H, TW) column blocks (no HBM transpose)."""
    N, H, W, Ch = h.shape
    Cx = x.shape[-1]
    Cin = Ch + Cx
    TW = _choose_col_block(W, H, N, cfg['target_m'], cfg['want_even'])

    out = pl.pallas_call(
        functools.partial(_gru_kernel, conv_axis=0),
        out_shape=jax.ShapeDtypeStruct((N, H, W, Ch), h.dtype),
        grid_spec=pltpu.PrefetchScalarGridSpec(
            num_scalar_prefetch=0,
            grid=(N, pl.cdiv(W, TW)),
            in_specs=[
                pl.BlockSpec((None, H, TW, Ch), lambda n, j: (n, 0, j, 0)),
                pl.BlockSpec((None, H, TW, Cx), lambda n, j: (n, 0, j, 0)),
                pl.BlockSpec((5, Cin, 2 * Ch), lambda n, j: (0, 0, 0)),
                pl.BlockSpec((5, Cin, Ch), lambda n, j: (0, 0, 0)),
                pl.BlockSpec((1, 2 * Ch), lambda n, j: (0, 0)),
                pl.BlockSpec((1, Ch), lambda n, j: (0, 0)),
            ],
            out_specs=pl.BlockSpec((None, H, TW, Ch), lambda n, j: (n, 0, j, 0)),
            scratch_shapes=[pltpu.VMEM((H + 4, TW, Cin), mxu_dtype)],
        ),
        compiler_params=pltpu.CompilerParams(
            dimension_semantics=("parallel", "parallel"),
            vmem_limit_bytes=_vmem_limit_bytes(H, TW, Ch, Cx, cfg['vmem_cap'])),
    )(h, x, w['wzr'], w['wq'], w['bzr'], w['bq'])
    return out


# ---------------------------------------------------------------------------
# Weight packing + public forward.
# ---------------------------------------------------------------------------
def _taps(w):
    """(Co, Cin, 1, 5) or (Co, Cin, 5, 1) conv weight -> (5, Cin, Co) taps."""
    co, cin = w.shape[:2]
    return jnp.transpose(w.reshape(co, cin, 5), (2, 1, 0))


def pack_sepconvgru_params(params, *, mxu_dtype=jnp.float32):
    """Pack the six conv weights into fused-gate form.

    Call this once (outside any GRU-iteration loop) and reuse the result; RAFT
    calls the GRU many times with the same weights.
    """
    packed = {}
    for step in ('1', '2'):
        wz = _taps(params[f'convz{step}_w'])
        wr = _taps(params[f'convr{step}_w'])
        wq = _taps(params[f'convq{step}_w'])
        packed[step] = {
            # Input-channel rows are ordered [h | x], matching torch.cat([h, x], 1).
            'wzr': jnp.concatenate([wz, wr], axis=-1).astype(mxu_dtype),
            'wq': wq.astype(mxu_dtype),
            'bzr': jnp.concatenate([params[f'convz{step}_b'],
                                    params[f'convr{step}_b']])[None, :]
                   .astype(jnp.float32),
            'bq': params[f'convq{step}_b'][None, :].astype(jnp.float32),
        }
    return packed


def sep_conv_gru(h, x, packed, *, mxu_dtype=jnp.float32):
    """h: (N, H, W, Ch) NHWC, x: (N, H, W, Cx) NHWC -> new h (N, H, W, Ch).

    `packed` comes from pack_sepconvgru_params().  mxu_dtype=jnp.bfloat16 gives
    bf16 MXU operands (relax tolerances vs the f32 reference in that case).
    """
    cfg = _tile_config()
    h = _gru_step_w(h, x, packed['1'], mxu_dtype=mxu_dtype, cfg=cfg)
    h = _gru_step_h(h, x, packed['2'], mxu_dtype=mxu_dtype, cfg=cfg)
    return h


# ---------------------------------------------------------------------------
# Pure-JAX NCHW reference mirroring the PyTorch module exactly.
# ---------------------------------------------------------------------------
def ref_forward(h, x, p):
    def conv(v, w, b, pad):
        y = jax.lax.conv_general_dilated(
            v, w, window_strides=(1, 1), padding=pad,
            dimension_numbers=('NCHW', 'OIHW', 'NCHW'))
        return y + b[None, :, None, None]

    hx = jnp.concatenate([h, x], axis=1)
    z = jax.nn.sigmoid(conv(hx, p['convz1_w'], p['convz1_b'], ((0, 0), (2, 2))))
    r = jax.nn.sigmoid(conv(hx, p['convr1_w'], p['convr1_b'], ((0, 0), (2, 2))))
    q = jnp.tanh(conv(jnp.concatenate([r * h, x], axis=1),
                      p['convq1_w'], p['convq1_b'], ((0, 0), (2, 2))))
    h = (1 - z) * h + z * q

    hx = jnp.concatenate([h, x], axis=1)
    z = jax.nn.sigmoid(conv(hx, p['convz2_w'], p['convz2_b'], ((2, 2), (0, 0))))
    r = jax.nn.sigmoid(conv(hx, p['convr2_w'], p['convr2_b'], ((2, 2), (0, 0))))
    q = jnp.tanh(conv(jnp.concatenate([r * h, x], axis=1),
                      p['convq2_w'], p['convq2_b'], ((2, 2), (0, 0))))
    h = (1 - z) * h + z * q
    return h


if __name__ == "__main__":
    key = jax.random.PRNGKey(0)
    N, H, W = 2, 8, 8
    hidden_dim, input_dim = 32, 64
    Cin = hidden_dim + input_dim

    keys = jax.random.split(key, 14)

    def init(k, shape):
        return jax.random.normal(k, shape, jnp.float32) * 0.1

    params = {
        'convz1_w': init(keys[0], (hidden_dim, Cin, 1, 5)),
        'convz1_b': init(keys[1], (hidden_dim,)),
        'convr1_w': init(keys[2], (hidden_dim, Cin, 1, 5)),
        'convr1_b': init(keys[3], (hidden_dim,)),
        'convq1_w': init(keys[4], (hidden_dim, Cin, 1, 5)),
        'convq1_b': init(keys[5], (hidden_dim,)),
        'convz2_w': init(keys[6], (hidden_dim, Cin, 5, 1)),
        'convz2_b': init(keys[7], (hidden_dim,)),
        'convr2_w': init(keys[8], (hidden_dim, Cin, 5, 1)),
        'convr2_b': init(keys[9], (hidden_dim,)),
        'convq2_w': init(keys[10], (hidden_dim, Cin, 5, 1)),
        'convq2_b': init(keys[11], (hidden_dim,)),
    }

    h_nchw = jax.random.normal(keys[12], (N, hidden_dim, H, W), jnp.float32)
    x_nchw = jax.random.normal(keys[13], (N, input_dim, H, W), jnp.float32)

    # Kernel runs channels-last (NHWC).
    h_nhwc = jnp.transpose(h_nchw, (0, 2, 3, 1))
    x_nhwc = jnp.transpose(x_nchw, (0, 2, 3, 1))

    # Pack the conv weights once (hoisted out of any GRU-iteration loop).
    packed = pack_sepconvgru_params(params)

    fwd = jax.jit(sep_conv_gru)
    out_nhwc = jax.block_until_ready(fwd(h_nhwc, x_nhwc, packed))
    out_nchw = jnp.transpose(out_nhwc, (0, 3, 1, 2))

    ref = ref_forward(h_nchw, x_nchw, params)
    max_err = float(jnp.max(jnp.abs(out_nchw - ref)))
    assert jnp.allclose(out_nchw, ref, atol=2e-4, rtol=2e-4), max_err

    print("KERNEL_OK")
</pallas_src>

<mosaic_0001>
module attributes {stable_mosaic.version = 11 : i64} {
  func.func @_gru_kernel(%arg0: i32, %arg1: memref<8x8x32xf32, #tpu.memory_space<vmem>>, %arg2: memref<8x8x64xf32, #tpu.memory_space<vmem>>, %arg3: memref<5x96x64xf32, #tpu.memory_space<vmem>>, %arg4: memref<5x96x32xf32, #tpu.memory_space<vmem>>, %arg5: memref<1x64xf32, #tpu.memory_space<vmem>>, %arg6: memref<1x32xf32, #tpu.memory_space<vmem>>, %arg7: memref<8x8x32xf32, #tpu.memory_space<vmem>>, %arg8: memref<8x12x96xf32, #tpu.memory_space<vmem>>) attributes {dimension_semantics = [#tpu.dimension_semantics<parallel>], iteration_bounds = array<i64: 2>, scalar_prefetch = 0 : i64, scratch_operands = 1 : i64, tpu.core_type = #tpu.core_type<tc>, window_params = [{transform_indices = @transform_0, window_bounds = array<i64: 8, 8, 32>}, {transform_indices = @transform_1, window_bounds = array<i64: 8, 8, 64>}, {pipeline_mode = #tpu.pipeline_mode<synchronous>, transform_indices = @transform_2, window_bounds = array<i64: 5, 96, 64>}, {pipeline_mode = #tpu.pipeline_mode<synchronous>, transform_indices = @transform_3, window_bounds = array<i64: 5, 96, 32>}, {pipeline_mode = #tpu.pipeline_mode<synchronous>, transform_indices = @transform_4, window_bounds = array<i64: 1, 64>}, {pipeline_mode = #tpu.pipeline_mode<synchronous>, transform_indices = @transform_5, window_bounds = array<i64: 1, 32>}, {transform_indices = @transform_6, window_bounds = array<i64: 8, 8, 32>}]} {
    %c0 = arith.constant 0 : index
    %c0_0 = arith.constant 0 : index
    %c0_1 = arith.constant 0 : index
    %0 = vector.load %arg1[%c0, %c0_0, %c0_1] : memref<8x8x32xf32, #tpu.memory_space<vmem>>, vector<8x8x32xf32>
    %cst = arith.constant 0.000000e+00 : f32
    %1 = vector.broadcast %cst : f32 to vector<8x2x96xf32>
    %c0_2 = arith.constant 0 : index
    %c0_3 = arith.constant 0 : index
    %c0_4 = arith.constant 0 : index
    %2 = vector.load %arg8[%c0_2, %c0_3, %c0_4] : memref<8x12x96xf32, #tpu.memory_space<vmem>>, vector<8x2x96xf32>
    tpu.vector_store %arg8[%c0_2, %c0_3, %c0_4], %1 {strides = array<i32>} : memref<8x12x96xf32, #tpu.memory_space<vmem>>, vector<8x2x96xf32>,
    %cst_5 = arith.constant 0.000000e+00 : f32
    %3 = vector.broadcast %cst_5 : f32 to vector<8x2x96xf32>
    %c0_6 = arith.constant 0 : index
    %c10 = arith.constant 10 : index
    %c0_7 = arith.constant 0 : index
    %4 = vector.load %arg8[%c0_6, %c10, %c0_7] : memref<8x12x96xf32, #tpu.memory_space<vmem>>, vector<8x2x96xf32>
    tpu.vector_store %arg8[%c0_6, %c10, %c0_7], %3 {strides = array<i32>} : memref<8x12x96xf32, #tpu.memory_space<vmem>>, vector<8x2x96xf32>,
    %c0_8 = arith.constant 0 : index
    %c2 = arith.constant 2 : index
    %c0_9 = arith.constant 0 : index
    %5 = vector.load %arg8[%c0_8, %c2, %c0_9] : memref<8x12x96xf32, #tpu.memory_space<vmem>>, vector<8x8x32xf32>
    tpu.vector_store %arg8[%c0_8, %c2, %c0_9], %0 {strides = array<i32>} : memref<8x12x96xf32, #tpu.memory_space<vmem>>, vector<8x8x32xf32>,
    %c0_10 = arith.constant 0 : index
    %c0_11 = arith.constant 0 : index
    %c0_12 = arith.constant 0 : index
    %6 = vector.load %arg2[%c0_10, %c0_11, %c0_12] : memref<8x8x64xf32, #tpu.memory_space<vmem>>, vector<8x8x64xf32>
    %c0_13 = arith.constant 0 : index
    %c2_14 = arith.constant 2 : index
    %c32 = arith.constant 32 : index
    %7 = vector.load %arg8[%c0_13, %c2_14, %c32] : memref<8x12x96xf32, #tpu.memory_space<vmem>>, vector<8x8x64xf32>
    tpu.vector_store %arg8[%c0_13, %c2_14, %c32], %6 {strides = array<i32>} : memref<8x12x96xf32, #tpu.memory_space<vmem>>, vector<8x8x64xf32>,
    %c0_15 = arith.constant 0 : index
    %c0_16 = arith.constant 0 : index
    %c0_17 = arith.constant 0 : index
    %8 = vector.load %arg8[%c0_15, %c0_16, %c0_17] : memref<8x12x96xf32, #tpu.memory_space<vmem>>, vector<8x8x96xf32>
    %9 = vector.shape_cast %8 : vector<8x8x96xf32> to vector<64x96xf32>
    %c0_18 = arith.constant 0 : index
    %c0_19 = arith.constant 0 : index
    %c0_20 = arith.constant 0 : index
    %10 = vector.load %arg3[%c0_18, %c0_19, %c0_20] : memref<5x96x64xf32, #tpu.memory_space<vmem>>, vector<1x96x64xf32>
    %11 = vector.shape_cast %10 : vector<1x96x64xf32> to vector<96x64xf32>
    %cst_21 = arith.constant dense<0.000000e+00> : vector<64x64xf32>
    %12 = tpu.matmul %9, %11, %cst_21 {dimension_numbers = #tpu.dot_dimension_numbers<[1], [0], [0], [1], [0, 0, 1, 1], [], []>} : vector<64x96xf32>, vector<96x64xf32>, vector<64x64xf32> -> vector<64x64xf32>
    %c0_22 = arith.constant 0 : index
    %c1 = arith.constant 1 : index
    %c0_23 = arith.constant 0 : index
    %13 = vector.load %arg8[%c0_22, %c1, %c0_23] : memref<8x12x96xf32, #tpu.memory_space<vmem>>, vector<8x8x96xf32>
    %14 = vector.shape_cast %13 : vector<8x8x96xf32> to vector<64x96xf32>
    %c1_24 = arith.constant 1 : index
    %c0_25 = arith.constant 0 : index
    %c0_26 = arith.constant 0 : index
    %15 = vector.load %arg3[%c1_24, %c0_25, %c0_26] : memref<5x96x64xf32, #tpu.memory_space<vmem>>, vector<1x96x64xf32>
    %16 = vector.shape_cast %15 : vector<1x96x64xf32> to vector<96x64xf32>
    %cst_27 = arith.constant dense<0.000000e+00> : vector<64x64xf32>
    %17 = tpu.matmul %14, %16, %cst_27 {dimension_numbers = #tpu.dot_dimension_numbers<[1], [0], [0], [1], [0, 0, 1, 1], [], []>} : vector<64x96xf32>, vector<96x64xf32>, vector<64x64xf32> -> vector<64x64xf32>
    %18 = arith.addf %12, %17 : vector<64x64xf32>
    %c0_28 = arith.constant 0 : index
    %c2_29 = arith.constant 2 : index
    %c0_30 = arith.constant 0 : index
    %19 = vector.load %arg8[%c0_28, %c2_29, %c0_30] : memref<8x12x96xf32, #tpu.memory_space<vmem>>, vector<8x8x96xf32>
    %20 = vector.shape_cast %19 : vector<8x8x96xf32> to vector<64x96xf32>
    %c2_31 = arith.constant 2 : index
    %c0_32 = arith.constant 0 : index
    %c0_33 = arith.constant 0 : index
    %21 = vector.load %arg3[%c2_31, %c0_32, %c0_33] : memref<5x96x64xf32, #tpu.memory_space<vmem>>, vector<1x96x64xf32>
    %22 = vector.shape_cast %21 : vector<1x96x64xf32> to vector<96x64xf32>
    %cst_34 = arith.constant dense<0.000000e+00> : vector<64x64xf32>
    %23 = tpu.matmul %20, %22, %cst_34 {dimension_numbers = #tpu.dot_dimension_numbers<[1], [0], [0], [1], [0, 0, 1, 1], [], []>} : vector<64x96xf32>, vector<96x64xf32>, vector<64x64xf32> -> vector<64x64xf32>
    %24 = arith.addf %18, %23 : vector<64x64xf32>
    %c0_35 = arith.constant 0 : index
    %c3 = arith.constant 3 : index
    %c0_36 = arith.constant 0 : index
    %25 = vector.load %arg8[%c0_35, %c3, %c0_36] : memref<8x12x96xf32, #tpu.memory_space<vmem>>, vector<8x8x96xf32>
    %26 = vector.shape_cast %25 : vector<8x8x96xf32> to vector<64x96xf32>
    %c3_37 = arith.constant 3 : index
    %c0_38 = arith.constant 0 : index
    %c0_39 = arith.constant 0 : index
    %27 = vector.load %arg3[%c3_37, %c0_38, %c0_39] : memref<5x96x64xf32, #tpu.memory_space<vmem>>, vector<1x96x64xf32>
    %28 = vector.shape_cast %27 : vector<1x96x64xf32> to vector<96x64xf32>
    %cst_40 = arith.constant dense<0.000000e+00> : vector<64x64xf32>
    %29 = tpu.matmul %26, %28, %cst_40 {dimension_numbers = #tpu.dot_dimension_numbers<[1], [0], [0], [1], [0, 0, 1, 1], [], []>} : vector<64x96xf32>, vector<96x64xf32>, vector<64x64xf32> -> vector<64x64xf32>
    %30 = arith.addf %24, %29 : vector<64x64xf32>
    %c0_41 = arith.constant 0 : index
    %c4 = arith.constant 4 : index
    %c0_42 = arith.constant 0 : index
    %31 = vector.load %arg8[%c0_41, %c4, %c0_42] : memref<8x12x96xf32, #tpu.memory_space<vmem>>, vector<8x8x96xf32>
    %32 = vector.shape_cast %31 : vector<8x8x96xf32> to vector<64x96xf32>
    %c4_43 = arith.constant 4 : index
    %c0_44 = arith.constant 0 : index
    %c0_45 = arith.constant 0 : index
    %33 = vector.load %arg3[%c4_43, %c0_44, %c0_45] : memref<5x96x64xf32, #tpu.memory_space<vmem>>, vector<1x96x64xf32>
    %34 = vector.shape_cast %33 : vector<1x96x64xf32> to vector<96x64xf32>
    %cst_46 = arith.constant dense<0.000000e+00> : vector<64x64xf32>
    %35 = tpu.matmul %32, %34, %cst_46 {dimension_numbers = #tpu.dot_dimension_numbers<[1], [0], [0], [1], [0, 0, 1, 1], [], []>} : vector<64x96xf32>, vector<96x64xf32>, vector<64x64xf32> -> vector<64x64xf32>
    %36 = arith.addf %30, %35 : vector<64x64xf32>
    %c0_47 = arith.constant 0 : index
    %c0_48 = arith.constant 0 : index
    %37 = vector.load %arg5[%c0_47, %c0_48] : memref<1x64xf32, #tpu.memory_space<vmem>>, vector<1x64xf32>
    %38 = vector.broadcast %37 : vector<1x64xf32> to vector<64x64xf32>
    %39 = arith.addf %36, %38 : vector<64x64xf32>
    %40 = arith.negf %39 : vector<64x64xf32>
    %41 = math.exp %40 : vector<64x64xf32>
    %cst_49 = arith.constant 1.000000e+00 : f32
    %42 = vector.broadcast %cst_49 : f32 to vector<64x64xf32>
    %43 = arith.addf %42, %41 : vector<64x64xf32>
    %44 = arith.divf %42, %43 : vector<64x64xf32>
    %45 = vector.extract_strided_slice %44 {offsets = [0, 0], sizes = [64, 32], strides = [1, 1]} : vector<64x64xf32> to vector<64x32xf32>
    %46 = vector.extract_strided_slice %44 {offsets = [0, 32], sizes = [64, 32], strides = [1, 1]} : vector<64x64xf32> to vector<64x32xf32>
    %47 = vector.shape_cast %0 : vector<8x8x32xf32> to vector<64x32xf32>
    %48 = arith.mulf %46, %47 : vector<64x32xf32>
    %49 = vector.shape_cast %48 : vector<64x32xf32> to vector<8x8x32xf32>
    %c0_50 = arith.constant 0 : index
    %c2_51 = arith.constant 2 : index
    %c0_52 = arith.constant 0 : index
    %50 = vector.load %arg8[%c0_50, %c2_51, %c0_52] : memref<8x12x96xf32, #tpu.memory_space<vmem>>, vector<8x8x32xf32>
    tpu.vector_store %arg8[%c0_50, %c2_51, %c0_52], %49 {strides = array<i32>} : memref<8x12x96xf32, #tpu.memory_space<vmem>>, vector<8x8x32xf32>,
    %c0_53 = arith.constant 0 : index
    %c0_54 = arith.constant 0 : index
    %c0_55 = arith.constant 0 : index
    %51 = vector.load %arg8[%c0_53, %c0_54, %c0_55] : memref<8x12x96xf32, #tpu.memory_space<vmem>>, vector<8x8x96xf32>
    %52 = vector.shape_cast %51 : vector<8x8x96xf32> to vector<64x96xf32>
    %c0_56 = arith.constant 0 : index
    %c0_57 = arith.constant 0 : index
    %c0_58 = arith.constant 0 : index
    %53 = vector.load %arg4[%c0_56, %c0_57, %c0_58] : memref<5x96x32xf32, #tpu.memory_space<vmem>>, vector<1x96x32xf32>
    %54 = vector.shape_cast %53 : vector<1x96x32xf32> to vector<96x32xf32>
    %cst_59 = arith.constant dense<0.000000e+00> : vector<64x32xf32>
    %55 = tpu.matmul %52, %54, %cst_59 {dimension_numbers = #tpu.dot_dimension_numbers<[1], [0], [0], [1], [0, 0, 1, 1], [], []>} : vector<64x96xf32>, vector<96x32xf32>, vector<64x32xf32> -> vector<64x32xf32>
    %c0_60 = arith.constant 0 : index
    %c1_61 = arith.constant 1 : index
    %c0_62 = arith.constant 0 : index
    %56 = vector.load %arg8[%c0_60, %c1_61, %c0_62] : memref<8x12x96xf32, #tpu.memory_space<vmem>>, vector<8x8x96xf32>
    %57 = vector.shape_cast %56 : vector<8x8x96xf32> to vector<64x96xf32>
    %c1_63 = arith.constant 1 : index
    %c0_64 = arith.constant 0 : index
    %c0_65 = arith.constant 0 : index
    %58 = vector.load %arg4[%c1_63, %c0_64, %c0_65] : memref<5x96x32xf32, #tpu.memory_space<vmem>>, vector<1x96x32xf32>
    %59 = vector.shape_cast %58 : vector<1x96x32xf32> to vector<96x32xf32>
    %cst_66 = arith.constant dense<0.000000e+00> : vector<64x32xf32>
    %60 = tpu.matmul %57, %59, %cst_66 {dimension_numbers = #tpu.dot_dimension_numbers<[1], [0], [0], [1], [0, 0, 1, 1], [], []>} : vector<64x96xf32>, vector<96x32xf32>, vector<64x32xf32> -> vector<64x32xf32>
    %61 = arith.addf %55, %60 : vector<64x32xf32>
    %c0_67 = arith.constant 0 : index
    %c2_68 = arith.constant 2 : index
    %c0_69 = arith.constant 0 : index
    %62 = vector.load %arg8[%c0_67, %c2_68, %c0_69] : memref<8x12x96xf32, #tpu.memory_space<vmem>>, vector<8x8x96xf32>
    %63 = vector.shape_cast %62 : vector<8x8x96xf32> to vector<64x96xf32>
    %c2_70 = arith.constant 2 : index
    %c0_71 = arith.constant 0 : index
    %c0_72 = arith.constant 0 : index
    %64 = vector.load %arg4[%c2_70, %c0_71, %c0_72] : memref<5x96x32xf32, #tpu.memory_space<vmem>>, vector<1x96x32xf32>
    %65 = vector.shape_cast %64 : vector<1x96x32xf32> to vector<96x32xf32>
    %cst_73 = arith.constant dense<0.000000e+00> : vector<64x32xf32>
    %66 = tpu.matmul %63, %65, %cst_73 {dimension_numbers = #tpu.dot_dimension_numbers<[1], [0], [0], [1], [0, 0, 1, 1], [], []>} : vector<64x96xf32>, vector<96x32xf32>, vector<64x32xf32> -> vector<64x32xf32>
    %67 = arith.addf %61, %66 : vector<64x32xf32>
    %c0_74 = arith.constant 0 : index
    %c3_75 = arith.constant 3 : index
    %c0_76 = arith.constant 0 : index
    %68 = vector.load %arg8[%c0_74, %c3_75, %c0_76] : memref<8x12x96xf32, #tpu.memory_space<vmem>>, vector<8x8x96xf32>
    %69 = vector.shape_cast %68 : vector<8x8x96xf32> to vector<64x96xf32>
    %c3_77 = arith.constant 3 : index
    %c0_78 = arith.constant 0 : index
    %c0_79 = arith.constant 0 : index
    %70 = vector.load %arg4[%c3_77, %c0_78, %c0_79] : memref<5x96x32xf32, #tpu.memory_space<vmem>>, vector<1x96x32xf32>
    %71 = vector.shape_cast %70 : vector<1x96x32xf32> to vector<96x32xf32>
    %cst_80 = arith.constant dense<0.000000e+00> : vector<64x32xf32>
    %72 = tpu.matmul %69, %71, %cst_80 {dimension_numbers = #tpu.dot_dimension_numbers<[1], [0], [0], [1], [0, 0, 1, 1], [], []>} : vector<64x96xf32>, vector<96x32xf32>, vector<64x32xf32> -> vector<64x32xf32>
    %73 = arith.addf %67, %72 : vector<64x32xf32>
    %c0_81 = arith.constant 0 : index
    %c4_82 = arith.constant 4 : index
    %c0_83 = arith.constant 0 : index
    %74 = vector.load %arg8[%c0_81, %c4_82, %c0_83] : memref<8x12x96xf32, #tpu.memory_space<vmem>>, vector<8x8x96xf32>
    %75 = vector.shape_cast %74 : vector<8x8x96xf32> to vector<64x96xf32>
    %c4_84 = arith.constant 4 : index
    %c0_85 = arith.constant 0 : index
    %c0_86 = arith.constant 0 : index
    %76 = vector.load %arg4[%c4_84, %c0_85, %c0_86] : memref<5x96x32xf32, #tpu.memory_space<vmem>>, vector<1x96x32xf32>
    %77 = vector.shape_cast %76 : vector<1x96x32xf32> to vector<96x32xf32>
    %cst_87 = arith.constant dense<0.000000e+00> : vector<64x32xf32>
    %78 = tpu.matmul %75, %77, %cst_87 {dimension_numbers = #tpu.dot_dimension_numbers<[1], [0], [0], [1], [0, 0, 1, 1], [], []>} : vector<64x96xf32>, vector<96x32xf32>, vector<64x32xf32> -> vector<64x32xf32>
    %79 = arith.addf %73, %78 : vector<64x32xf32>
    %c0_88 = arith.constant 0 : index
    %c0_89 = arith.constant 0 : index
    %80 = vector.load %arg6[%c0_88, %c0_89] : memref<1x32xf32, #tpu.memory_space<vmem>>, vector<1x32xf32>
    %81 = vector.broadcast %80 : vector<1x32xf32> to vector<64x32xf32>
    %82 = arith.addf %79, %81 : vector<64x32xf32>
    %83 = math.tanh %82 : vector<64x32xf32>
    %cst_90 = arith.constant 1.000000e+00 : f32
    %84 = vector.broadcast %cst_90 : f32 to vector<64x32xf32>
    %85 = arith.subf %84, %45 : vector<64x32xf32>
    %86 = arith.mulf %85, %47 : vector<64x32xf32>
    %87 = arith.mulf %45, %83 : vector<64x32xf32>
    %88 = arith.addf %86, %87 : vector<64x32xf32>
    %89 = vector.shape_cast %88 : vector<64x32xf32> to vector<8x8x32xf32>
    %c0_91 = arith.constant 0 : index
    %c0_92 = arith.constant 0 : index
    %c0_93 = arith.constant 0 : index
    %90 = vector.load %arg7[%c0_91, %c0_92, %c0_93] : memref<8x8x32xf32, #tpu.memory_space<vmem>>, vector<8x8x32xf32>
    tpu.vector_store %arg7[%c0_91, %c0_92, %c0_93], %89 {strides = array<i32>} : memref<8x8x32xf32, #tpu.memory_space<vmem>>, vector<8x8x32xf32>,
    return
  }
  func.func @transform_0(%arg0: i32) -> (i32, i32, i32) {
    %c0_i32 = arith.constant 0 : i32
    %c0_i32_0 = arith.constant 0 : i32
    %c0_i32_1 = arith.constant 0 : i32
    return %arg0, %c0_i32, %c0_i32_0 : i32, i32, i32
  }
  func.func @transform_1(%arg0: i32) -> (i32, i32, i32) {
    %c0_i32 = arith.constant 0 : i32
    %c0_i32_0 = arith.constant 0 : i32
    %c0_i32_1 = arith.constant 0 : i32
    return %arg0, %c0_i32, %c0_i32_0 : i32, i32, i32
  }
  func.func @transform_2(%arg0: i32) -> (i32, i32, i32) {
    %c0_i32 = arith.constant 0 : i32
    %c0_i32_0 = arith.constant 0 : i32
    %c0_i32_1 = arith.constant 0 : i32
    %c0_i32_2 = arith.constant 0 : i32
    return %c0_i32, %c0_i32_0, %c0_i32_1 : i32, i32, i32
  }
  func.func @transform_3(%arg0: i32) -> (i32, i32, i32) {
    %c0_i32 = arith.constant 0 : i32
    %c0_i32_0 = arith.constant 0 : i32
    %c0_i32_1 = arith.constant 0 : i32
    %c0_i32_2 = arith.constant 0 : i32
    return %c0_i32, %c0_i32_0, %c0_i32_1 : i32, i32, i32
  }
  func.func @transform_4(%arg0: i32) -> (i32, i32) {
    %c0_i32 = arith.constant 0 : i32
    %c0_i32_0 = arith.constant 0 : i32
    %c0_i32_1 = arith.constant 0 : i32
    return %c0_i32, %c0_i32_0 : i32, i32
  }
  func.func @transform_5(%arg0: i32) -> (i32, i32) {
    %c0_i32 = arith.constant 0 : i32
    %c0_i32_0 = arith.constant 0 : i32
    %c0_i32_1 = arith.constant 0 : i32
    return %c0_i32, %c0_i32_0 : i32, i32
  }
  func.func @transform_6(%arg0: i32) -> (i32, i32, i32) {
    %c0_i32 = arith.constant 0 : i32
    %c0_i32_0 = arith.constant 0 : i32
    %c0_i32_1 = arith.constant 0 : i32
    return %arg0, %c0_i32, %c0_i32_0 : i32, i32, i32
  }
}

module attributes {stable_mosaic.version = 11 : i64} {
  func.func @_gru_kernel(%arg0: i32, %arg1: i32, %arg2: memref<1x8x8x32xf32, #tpu.memory_space<vmem>>, %arg3: memref<1x8x8x64xf32, #tpu.memory_space<vmem>>, %arg4: memref<5x96x64xf32, #tpu.memory_space<vmem>>, %arg5: memref<5x96x32xf32, #tpu.memory_space<vmem>>, %arg6: memref<1x64xf32, #tpu.memory_space<vmem>>, %arg7: memref<1x32xf32, #tpu.memory_space<vmem>>, %arg8: memref<1x8x8x32xf32, #tpu.memory_space<vmem>>, %arg9: memref<12x8x96xf32, #tpu.memory_space<vmem>>) attributes {dimension_semantics = [#tpu.dimension_semantics<parallel>, #tpu.dimension_semantics<parallel>], iteration_bounds = array<i64: 2, 1>, scalar_prefetch = 0 : i64, scratch_operands = 1 : i64, tpu.core_type = #tpu.core_type<tc>, window_params = [{transform_indices = @transform_0, window_bounds = array<i64: 1, 8, 8, 32>}, {transform_indices = @transform_1, window_bounds = array<i64: 1, 8, 8, 64>}, {pipeline_mode = #tpu.pipeline_mode<synchronous>, transform_indices = @transform_2, window_bounds = array<i64: 5, 96, 64>}, {pipeline_mode = #tpu.pipeline_mode<synchronous>, transform_indices = @transform_3, window_bounds = array<i64: 5, 96, 32>}, {pipeline_mode = #tpu.pipeline_mode<synchronous>, transform_indices = @transform_4, window_bounds = array<i64: 1, 64>}, {pipeline_mode = #tpu.pipeline_mode<synchronous>, transform_indices = @transform_5, window_bounds = array<i64: 1, 32>}, {transform_indices = @transform_6, window_bounds = array<i64: 1, 8, 8, 32>}]} {
    %c0 = arith.constant 0 : index
    %c0_0 = arith.constant 0 : index
    %c0_1 = arith.constant 0 : index
    %c0_2 = arith.constant 0 : index
    %0 = vector.load %arg2[%c0, %c0_0, %c0_1, %c0_2] : memref<1x8x8x32xf32, #tpu.memory_space<vmem>>, vector<1x8x8x32xf32>
    %1 = vector.shape_cast %0 : vector<1x8x8x32xf32> to vector<8x8x32xf32>
    %cst = arith.constant 0.000000e+00 : f32
    %2 = vector.broadcast %cst : f32 to vector<2x8x96xf32>
    %c0_3 = arith.constant 0 : index
    %c0_4 = arith.constant 0 : index
    %c0_5 = arith.constant 0 : index
    %3 = vector.load %arg9[%c0_3, %c0_4, %c0_5] : memref<12x8x96xf32, #tpu.memory_space<vmem>>, vector<2x8x96xf32>
    tpu.vector_store %arg9[%c0_3, %c0_4, %c0_5], %2 {strides = array<i32>} : memref<12x8x96xf32, #tpu.memory_space<vmem>>, vector<2x8x96xf32>,
    %cst_6 = arith.constant 0.000000e+00 : f32
    %4 = vector.broadcast %cst_6 : f32 to vector<2x8x96xf32>
    %c10 = arith.constant 10 : index
    %c0_7 = arith.constant 0 : index
    %c0_8 = arith.constant 0 : index
    %5 = vector.load %arg9[%c10, %c0_7, %c0_8] : memref<12x8x96xf32, #tpu.memory_space<vmem>>, vector<2x8x96xf32>
    tpu.vector_store %arg9[%c10, %c0_7, %c0_8], %4 {strides = array<i32>} : memref<12x8x96xf32, #tpu.memory_space<vmem>>, vector<2x8x96xf32>,
    %c2 = arith.constant 2 : index
    %c0_9 = arith.constant 0 : index
    %c0_10 = arith.constant 0 : index
    %6 = vector.load %arg9[%c2, %c0_9, %c0_10] : memref<12x8x96xf32, #tpu.memory_space<vmem>>, vector<8x8x32xf32>
    tpu.vector_store %arg9[%c2, %c0_9, %c0_10], %1 {strides = array<i32>} : memref<12x8x96xf32, #tpu.memory_space<vmem>>, vector<8x8x32xf32>,
    %c0_11 = arith.constant 0 : index
    %c0_12 = arith.constant 0 : index
    %c0_13 = arith.constant 0 : index
    %c0_14 = arith.constant 0 : index
    %7 = vector.load %arg3[%c0_11, %c0_12, %c0_13, %c0_14] : memref<1x8x8x64xf32, #tpu.memory_space<vmem>>, vector<1x8x8x64xf32>
    %8 = vector.shape_cast %7 : vector<1x8x8x64xf32> to vector<8x8x64xf32>
    %c2_15 = arith.constant 2 : index
    %c0_16 = arith.constant 0 : index
    %c32 = arith.constant 32 : index
    %9 = vector.load %arg9[%c2_15, %c0_16, %c32] : memref<12x8x96xf32, #tpu.memory_space<vmem>>, vector<8x8x64xf32>
    tpu.vector_store %arg9[%c2_15, %c0_16, %c32], %8 {strides = array<i32>} : memref<12x8x96xf32, #tpu.memory_space<vmem>>, vector<8x8x64xf32>,
    %c0_17 = arith.constant 0 : index
    %c0_18 = arith.constant 0 : index
    %c0_19 = arith.constant 0 : index
    %10 = vector.load %arg9[%c0_17, %c0_18, %c0_19] : memref<12x8x96xf32, #tpu.memory_space<vmem>>, vector<8x8x96xf32>
    %11 = vector.shape_cast %10 : vector<8x8x96xf32> to vector<64x96xf32>
    %c0_20 = arith.constant 0 : index
    %c0_21 = arith.constant 0 : index
    %c0_22 = arith.constant 0 : index
    %12 = vector.load %arg4[%c0_20, %c0_21, %c0_22] : memref<5x96x64xf32, #tpu.memory_space<vmem>>, vector<1x96x64xf32>
    %13 = vector.shape_cast %12 : vector<1x96x64xf32> to vector<96x64xf32>
    %cst_23 = arith.constant dense<0.000000e+00> : vector<64x64xf32>
    %14 = tpu.matmul %11, %13, %cst_23 {dimension_numbers = #tpu.dot_dimension_numbers<[1], [0], [0], [1], [0, 0, 1, 1], [], []>} : vector<64x96xf32>, vector<96x64xf32>, vector<64x64xf32> -> vector<64x64xf32>
    %c1 = arith.constant 1 : index
    %c0_24 = arith.constant 0 : index
    %c0_25 = arith.constant 0 : index
    %15 = vector.load %arg9[%c1, %c0_24, %c0_25] : memref<12x8x96xf32, #tpu.memory_space<vmem>>, vector<8x8x96xf32>
    %16 = vector.shape_cast %15 : vector<8x8x96xf32> to vector<64x96xf32>
    %c1_26 = arith.constant 1 : index
    %c0_27 = arith.constant 0 : index
    %c0_28 = arith.constant 0 : index
    %17 = vector.load %arg4[%c1_26, %c0_27, %c0_28] : memref<5x96x64xf32, #tpu.memory_space<vmem>>, vector<1x96x64xf32>
    %18 = vector.shape_cast %17 : vector<1x96x64xf32> to vector<96x64xf32>
    %cst_29 = arith.constant dense<0.000000e+00> : vector<64x64xf32>
    %19 = tpu.matmul %16, %18, %cst_29 {dimension_numbers = #tpu.dot_dimension_numbers<[1], [0], [0], [1], [0, 0, 1, 1], [], []>} : vector<64x96xf32>, vector<96x64xf32>, vector<64x64xf32> -> vector<64x64xf32>
    %20 = arith.addf %14, %19 : vector<64x64xf32>
    %c2_30 = arith.constant 2 : index
    %c0_31 = arith.constant 0 : index
    %c0_32 = arith.constant 0 : index
    %21 = vector.load %arg9[%c2_30, %c0_31, %c0_32] : memref<12x8x96xf32, #tpu.memory_space<vmem>>, vector<8x8x96xf32>
    %22 = vector.shape_cast %21 : vector<8x8x96xf32> to vector<64x96xf32>
    %c2_33 = arith.constant 2 : index
    %c0_34 = arith.constant 0 : index
    %c0_35 = arith.constant 0 : index
    %23 = vector.load %arg4[%c2_33, %c0_34, %c0_35] : memref<5x96x64xf32, #tpu.memory_space<vmem>>, vector<1x96x64xf32>
    %24 = vector.shape_cast %23 : vector<1x96x64xf32> to vector<96x64xf32>
    %cst_36 = arith.constant dense<0.000000e+00> : vector<64x64xf32>
    %25 = tpu.matmul %22, %24, %cst_36 {dimension_numbers = #tpu.dot_dimension_numbers<[1], [0], [0], [1], [0, 0, 1, 1], [], []>} : vector<64x96xf32>, vector<96x64xf32>, vector<64x64xf32> -> vector<64x64xf32>
    %26 = arith.addf %20, %25 : vector<64x64xf32>
    %c3 = arith.constant 3 : index
    %c0_37 = arith.constant 0 : index
    %c0_38 = arith.constant 0 : index
    %27 = vector.load %arg9[%c3, %c0_37, %c0_38] : memref<12x8x96xf32, #tpu.memory_space<vmem>>, vector<8x8x96xf32>
    %28 = vector.shape_cast %27 : vector<8x8x96xf32> to vector<64x96xf32>
    %c3_39 = arith.constant 3 : index
    %c0_40 = arith.constant 0 : index
    %c0_41 = arith.constant 0 : index
    %29 = vector.load %arg4[%c3_39, %c0_40, %c0_41] : memref<5x96x64xf32, #tpu.memory_space<vmem>>, vector<1x96x64xf32>
    %30 = vector.shape_cast %29 : vector<1x96x64xf32> to vector<96x64xf32>
    %cst_42 = arith.constant dense<0.000000e+00> : vector<64x64xf32>
    %31 = tpu.matmul %28, %30, %cst_42 {dimension_numbers = #tpu.dot_dimension_numbers<[1], [0], [0], [1], [0, 0, 1, 1], [], []>} : vector<64x96xf32>, vector<96x64xf32>, vector<64x64xf32> -> vector<64x64xf32>
    %32 = arith.addf %26, %31 : vector<64x64xf32>
    %c4 = arith.constant 4 : index
    %c0_43 = arith.constant 0 : index
    %c0_44 = arith.constant 0 : index
    %33 = vector.load %arg9[%c4, %c0_43, %c0_44] : memref<12x8x96xf32, #tpu.memory_space<vmem>>, vector<8x8x96xf32>
    %34 = vector.shape_cast %33 : vector<8x8x96xf32> to vector<64x96xf32>
    %c4_45 = arith.constant 4 : index
    %c0_46 = arith.constant 0 : index
    %c0_47 = arith.constant 0 : index
    %35 = vector.load %arg4[%c4_45, %c0_46, %c0_47] : memref<5x96x64xf32, #tpu.memory_space<vmem>>, vector<1x96x64xf32>
    %36 = vector.shape_cast %35 : vector<1x96x64xf32> to vector<96x64xf32>
    %cst_48 = arith.constant dense<0.000000e+00> : vector<64x64xf32>
    %37 = tpu.matmul %34, %36, %cst_48 {dimension_numbers = #tpu.dot_dimension_numbers<[1], [0], [0], [1], [0, 0, 1, 1], [], []>} : vector<64x96xf32>, vector<96x64xf32>, vector<64x64xf32> -> vector<64x64xf32>
    %38 = arith.addf %32, %37 : vector<64x64xf32>
    %c0_49 = arith.constant 0 : index
    %c0_50 = arith.constant 0 : index
    %39 = vector.load %arg6[%c0_49, %c0_50] : memref<1x64xf32, #tpu.memory_space<vmem>>, vector<1x64xf32>
    %40 = vector.broadcast %39 : vector<1x64xf32> to vector<64x64xf32>
    %41 = arith.addf %38, %40 : vector<64x64xf32>
    %42 = arith.negf %41 : vector<64x64xf32>
    %43 = math.exp %42 : vector<64x64xf32>
    %cst_51 = arith.constant 1.000000e+00 : f32
    %44 = vector.broadcast %cst_51 : f32 to vector<64x64xf32>
    %45 = arith.addf %44, %43 : vector<64x64xf32>
    %46 = arith.divf %44, %45 : vector<64x64xf32>
    %47 = vector.extract_strided_slice %46 {offsets = [0, 0], sizes = [64, 32], strides = [1, 1]} : vector<64x64xf32> to vector<64x32xf32>
    %48 = vector.extract_strided_slice %46 {offsets = [0, 32], sizes = [64, 32], strides = [1, 1]} : vector<64x64xf32> to vector<64x32xf32>
    %49 = vector.shape_cast %1 : vector<8x8x32xf32> to vector<64x32xf32>
    %50 = arith.mulf %48, %49 : vector<64x32xf32>
    %51 = vector.shape_cast %50 : vector<64x32xf32> to vector<8x8x32xf32>
    %c2_52 = arith.constant 2 : index
    %c0_53 = arith.constant 0 : index
    %c0_54 = arith.constant 0 : index
    %52 = vector.load %arg9[%c2_52, %c0_53, %c0_54] : memref<12x8x96xf32, #tpu.memory_space<vmem>>, vector<8x8x32xf32>
    tpu.vector_store %arg9[%c2_52, %c0_53, %c0_54], %51 {strides = array<i32>} : memref<12x8x96xf32, #tpu.memory_space<vmem>>, vector<8x8x32xf32>,
    %c0_55 = arith.constant 0 : index
    %c0_56 = arith.constant 0 : index
    %c0_57 = arith.constant 0 : index
    %53 = vector.load %arg9[%c0_55, %c0_56, %c0_57] : memref<12x8x96xf32, #tpu.memory_space<vmem>>, vector<8x8x96xf32>
    %54 = vector.shape_cast %53 : vector<8x8x96xf32> to vector<64x96xf32>
    %c0_58 = arith.constant 0 : index
    %c0_59 = arith.constant 0 : index
    %c0_60 = arith.constant 0 : index
    %55 = vector.load %arg5[%c0_58, %c0_59, %c0_60] : memref<5x96x32xf32, #tpu.memory_space<vmem>>, vector<1x96x32xf32>
    %56 = vector.shape_cast %55 : vector<1x96x32xf32> to vector<96x32xf32>
    %cst_61 = arith.constant dense<0.000000e+00> : vector<64x32xf32>
    %57 = tpu.matmul %54, %56, %cst_61 {dimension_numbers = #tpu.dot_dimension_numbers<[1], [0], [0], [1], [0, 0, 1, 1], [], []>} : vector<64x96xf32>, vector<96x32xf32>, vector<64x32xf32> -> vector<64x32xf32>
    %c1_62 = arith.constant 1 : index
    %c0_63 = arith.constant 0 : index
    %c0_64 = arith.constant 0 : index
    %58 = vector.load %arg9[%c1_62, %c0_63, %c0_64] : memref<12x8x96xf32, #tpu.memory_space<vmem>>, vector<8x8x96xf32>
    %59 = vector.shape_cast %58 : vector<8x8x96xf32> to vector<64x96xf32>
    %c1_65 = arith.constant 1 : index
    %c0_66 = arith.constant 0 : index
    %c0_67 = arith.constant 0 : index
    %60 = vector.load %arg5[%c1_65, %c0_66, %c0_67] : memref<5x96x32xf32, #tpu.memory_space<vmem>>, vector<1x96x32xf32>
    %61 = vector.shape_cast %60 : vector<1x96x32xf32> to vector<96x32xf32>
    %cst_68 = arith.constant dense<0.000000e+00> : vector<64x32xf32>
    %62 = tpu.matmul %59, %61, %cst_68 {dimension_numbers = #tpu.dot_dimension_numbers<[1], [0], [0], [1], [0, 0, 1, 1], [], []>} : vector<64x96xf32>, vector<96x32xf32>, vector<64x32xf32> -> vector<64x32xf32>
    %63 = arith.addf %57, %62 : vector<64x32xf32>
    %c2_69 = arith.constant 2 : index
    %c0_70 = arith.constant 0 : index
    %c0_71 = arith.constant 0 : index
    %64 = vector.load %arg9[%c2_69, %c0_70, %c0_71] : memref<12x8x96xf32, #tpu.memory_space<vmem>>, vector<8x8x96xf32>
    %65 = vector.shape_cast %64 : vector<8x8x96xf32> to vector<64x96xf32>
    %c2_72 = arith.constant 2 : index
    %c0_73 = arith.constant 0 : index
    %c0_74 = arith.constant 0 : index
    %66 = vector.load %arg5[%c2_72, %c0_73, %c0_74] : memref<5x96x32xf32, #tpu.memory_space<vmem>>, vector<1x96x32xf32>
    %67 = vector.shape_cast %66 : vector<1x96x32xf32> to vector<96x32xf32>
    %cst_75 = arith.constant dense<0.000000e+00> : vector<64x32xf32>
    %68 = tpu.matmul %65, %67, %cst_75 {dimension_numbers = #tpu.dot_dimension_numbers<[1], [0], [0], [1], [0, 0, 1, 1], [], []>} : vector<64x96xf32>, vector<96x32xf32>, vector<64x32xf32> -> vector<64x32xf32>
    %69 = arith.addf %63, %68 : vector<64x32xf32>
    %c3_76 = arith.constant 3 : index
    %c0_77 = arith.constant 0 : index
    %c0_78 = arith.constant 0 : index
    %70 = vector.load %arg9[%c3_76, %c0_77, %c0_78] : memref<12x8x96xf32, #tpu.memory_space<vmem>>, vector<8x8x96xf32>
    %71 = vector.shape_cast %70 : vector<8x8x96xf32> to vector<64x96xf32>
    %c3_79 = arith.constant 3 : index
    %c0_80 = arith.constant 0 : index
    %c0_81 = arith.constant 0 : index
    %72 = vector.load %arg5[%c3_79, %c0_80, %c0_81] : memref<5x96x32xf32, #tpu.memory_space<vmem>>, vector<1x96x32xf32>
    %73 = vector.shape_cast %72 : vector<1x96x32xf32> to vector<96x32xf32>
    %cst_82 = arith.constant dense<0.000000e+00> : vector<64x32xf32>
    %74 = tpu.matmul %71, %73, %cst_82 {dimension_numbers = #tpu.dot_dimension_numbers<[1], [0], [0], [1], [0, 0, 1, 1], [], []>} : vector<64x96xf32>, vector<96x32xf32>, vector<64x32xf32> -> vector<64x32xf32>
    %75 = arith.addf %69, %74 : vector<64x32xf32>
    %c4_83 = arith.constant 4 : index
    %c0_84 = arith.constant 0 : index
    %c0_85 = arith.constant 0 : index
    %76 = vector.load %arg9[%c4_83, %c0_84, %c0_85] : memref<12x8x96xf32, #tpu.memory_space<vmem>>, vector<8x8x96xf32>
    %77 = vector.shape_cast %76 : vector<8x8x96xf32> to vector<64x96xf32>
    %c4_86 = arith.constant 4 : index
    %c0_87 = arith.constant 0 : index
    %c0_88 = arith.constant 0 : index
    %78 = vector.load %arg5[%c4_86, %c0_87, %c0_88] : memref<5x96x32xf32, #tpu.memory_space<vmem>>, vector<1x96x32xf32>
    %79 = vector.shape_cast %78 : vector<1x96x32xf32> to vector<96x32xf32>
    %cst_89 = arith.constant dense<0.000000e+00> : vector<64x32xf32>
    %80 = tpu.matmul %77, %79, %cst_89 {dimension_numbers = #tpu.dot_dimension_numbers<[1], [0], [0], [1], [0, 0, 1, 1], [], []>} : vector<64x96xf32>, vector<96x32xf32>, vector<64x32xf32> -> vector<64x32xf32>
    %81 = arith.addf %75, %80 : vector<64x32xf32>
    %c0_90 = arith.constant 0 : index
    %c0_91 = arith.constant 0 : index
    %82 = vector.load %arg7[%c0_90, %c0_91] : memref<1x32xf32, #tpu.memory_space<vmem>>, vector<1x32xf32>
    %83 = vector.broadcast %82 : vector<1x32xf32> to vector<64x32xf32>
    %84 = arith.addf %81, %83 : vector<64x32xf32>
    %85 = math.tanh %84 : vector<64x32xf32>
    %cst_92 = arith.constant 1.000000e+00 : f32
    %86 = vector.broadcast %cst_92 : f32 to vector<64x32xf32>
    %87 = arith.subf %86, %47 : vector<64x32xf32>
    %88 = arith.mulf %87, %49 : vector<64x32xf32>
    %89 = arith.mulf %47, %85 : vector<64x32xf32>
    %90 = arith.addf %88, %89 : vector<64x32xf32>
    %91 = vector.shape_cast %90 : vector<64x32xf32> to vector<8x8x32xf32>
    %c0_93 = arith.constant 0 : index
    %c0_94 = arith.constant 0 : index
    %c0_95 = arith.constant 0 : index
    %c0_96 = arith.constant 0 : index
    %92 = vector.load %arg8[%c0_93, %c0_94, %c0_95, %c0_96] : memref<1x8x8x32xf32, #tpu.memory_space<vmem>>, vector<1x8x8x32xf32>
    %93 = vector.shape_cast %92 : vector<1x8x8x32xf32> to vector<8x8x32xf32>
    %94 = vector.shape_cast %91 : vector<8x8x32xf32> to vector<1x8x8x32xf32>
    tpu.vector_store %arg8[%c0_93, %c0_94, %c0_95, %c0_96], %94 {strides = array<i32>} : memref<1x8x8x32xf32, #tpu.memory_space<vmem>>, vector<1x8x8x32xf32>,
    return
  }
  func.func @transform_0(%arg0: i32, %arg1: i32) -> (i32, i32, i32, i32) {
    %c0_i32 = arith.constant 0 : i32
    %c0_i32_0 = arith.constant 0 : i32
    %c0_i32_1 = arith.constant 0 : i32
    return %arg0, %c0_i32, %arg1, %c0_i32_0 : i32, i32, i32, i32
  }
  func.func @transform_1(%arg0: i32, %arg1: i32) -> (i32, i32, i32, i32) {
    %c0_i32 = arith.constant 0 : i32
    %c0_i32_0 = arith.constant 0 : i32
    %c0_i32_1 = arith.constant 0 : i32
    return %arg0, %c0_i32, %arg1, %c0_i32_0 : i32, i32, i32, i32
  }
  func.func @transform_2(%arg0: i32, %arg1: i32) -> (i32, i32, i32) {
    %c0_i32 = arith.constant 0 : i32
    %c0_i32_0 = arith.constant 0 : i32
    %c0_i32_1 = arith.constant 0 : i32
    %c0_i32_2 = arith.constant 0 : i32
    return %c0_i32, %c0_i32_0, %c0_i32_1 : i32, i32, i32
  }
  func.func @transform_3(%arg0: i32, %arg1: i32) -> (i32, i32, i32) {
    %c0_i32 = arith.constant 0 : i32
    %c0_i32_0 = arith.constant 0 : i32
    %c0_i32_1 = arith.constant 0 : i32
    %c0_i32_2 = arith.constant 0 : i32
    return %c0_i32, %c0_i32_0, %c0_i32_1 : i32, i32, i32
  }
  func.func @transform_4(%arg0: i32, %arg1: i32) -> (i32, i32) {
    %c0_i32 = arith.constant 0 : i32
    %c0_i32_0 = arith.constant 0 : i32
    %c0_i32_1 = arith.constant 0 : i32
    return %c0_i32, %c0_i32_0 : i32, i32
  }
  func.func @transform_5(%arg0: i32, %arg1: i32) -> (i32, i32) {
    %c0_i32 = arith.constant 0 : i32
    %c0_i32_0 = arith.constant 0 : i32
    %c0_i32_1 = arith.constant 0 : i32
    return %c0_i32, %c0_i32_0 : i32, i32
  }
  func.func @transform_6(%arg0: i32, %arg1: i32) -> (i32, i32, i32, i32) {
    %c0_i32 = arith.constant 0 : i32
    %c0_i32_0 = arith.constant 0 : i32
    %c0_i32_1 = arith.constant 0 : i32
    return %arg0, %c0_i32, %arg1, %c0_i32_0 : i32, i32, i32, i32
  }
}

</mosaic_0001>

<bundles_post_ra>
// kernel: sep_conv_gru.3
= control target key start
LH: loop header
LB: loop body
LE: loop exit
PB: predicated region body
PF: predicated region fallthrough
CT: control target
= control target key end

     0   :  { %11 = vsyncpa [#allocation4], 0  ;;  %s3012_s0 = inlined_call_operand.vmem [shape: f32[2,8,8,32], index: 0, kind: input, shape index: {}]   ;;  %s3013_s1 = inlined_call_operand.vmem [shape: f32[2,8,8,64], index: 1, kind: input, shape index: {}]   ;;  %s3014_s2 = inlined_call_operand.vmem [shape: f32[5,96,64], index: 2, kind: input, shape index: {}]   ;;  %s3015_s3 = inlined_call_operand.vmem [shape: f32[5,96,32], index: 3, kind: input, shape index: {}]   ;;  %s3016_s4 = inlined_call_operand.vmem [shape: f32[1,64], index: 4, kind: input, shape index: {}]   ;;  %s3017_s5 = inlined_call_operand.vmem [shape: f32[1,32], index: 5, kind: input, shape index: {}]   ;;  %s3018_s6 = inlined_call_operand.hbm [shape: f32[2,8,8,32], index: 6, kind: output, shape index: {}]  }
   0x1   :  { %13 = vsyncpa [#allocation4 + $0x1], 0  ;;  %s2161_s21 = smov 0   ;;  %s2163_s22 = smov 0  }
   0x2   :  { %s2165_s23 = smov 0   ;;  %s2167_s24 = smov 0  }
   0x3   :  { %s2169_s25 = smov 0   ;;  %s2171_s26 = smov 0  }
   0x4 LB: > { %s1705_s27 = sadd.s32 4294967295, %s2119_s26   ;;  %s1706_s28 = sadd.s32 4294967294, %s2119_s26   ;;  %s2119_s26 = sphi %s2171_s26, %s19_s26   ;;  %s2115_s25 = sphi %s2169_s25, %s3025_s25   ;;  %s2111_s24 = sphi %s2167_s24, %s3024_s24   ;;  %s2107_s23 = sphi %s2165_s23, %s3023_s23   ;;  %s2103_s22 = sphi %s2163_s22, %s3022_s22   ;;  %s2099_s21 = sphi %s2161_s21, %s3021_s21  }
   0x5   : > { %s31_s29 = sadd.s32 1, %s2115_s25  ;;  %s180_s30 = sadd.s32 1, %s2107_s23 }
   0x6   : > { %p33_p0 = scmp.ge.s32.totalorder %s31_s29, 2  ;;  %p190_p1 = scmp.ne.s32.totalorder %s2107_s23, %s2103_s22 }
   0x7   : > { %p191_p2 = scmp.eq.s32.totalorder %s1705_s27, 1  ;;  %p196_p3 = scmp.ne.s32.totalorder %s2103_s22, %s2099_s21 }
   0x8   : > { %s3027_s29 = smov (%p33_p0, %s31_s29), 0  ;;  %p197_p5 = scmp.eq.s32.totalorder %s1706_s28, 1 }
   0x9   : > { %p2201_p4 = por %p191_p2, %p190_p1  ;;  %s175_s8 = ssub.s32 %s2115_s25, %s3027_s29 }
   0xa   : > { %p1709_p6 = scmp.ge.s32.totalorder %s2119_s26, 1  ;;  %p178_p7 = scmp.eq.s32.totalorder %s175_s8, 0 }
   0xb   : > { %p2208_p8 = por %p197_p5, %p196_p3  ;;  %p249_p9 = scmp.lt.s32.totalorder %s2119_s26, 3 }
   0xc   : > { %s2214_s10 = scalar_select %p178_p7, %s2107_s23, %s180_s30  }
   0xd   : > { %p250_p10 = pnand %p1709_p6, %p249_p9 }
   0xe   : > { %p290_p11 = scmp.lt.s32.totalorder (!%p250_p10), %s2111_s24, 1  ;;  %s2121_s18 = smov (!%p250_p10), 32  }
   0xf   : > { %253 = sbr.rel (%p250_p10) target bundleno = 777 (0x309), region = 44  ;;  %s287_s20 = sand.u32 (!%p250_p10), 1, %s2103_s22  }
  0x10   : > { %s1906_s27 = sshll.u32 (!%p250_p10), %s2111_s24, 6  ;;  %s2061_s17 = scalar_lea.hbm (!%p250_p10), %s3018_s6, 128 }
  0x11   : > { %s1605_s11 = scalar_lea.hbm (!%p250_p10), %s3018_s6, %s1906_s27 }
  0x14   : > { %v1726_v0 = vld [vmem:[%s3014_s2 + $0xb8] sm:$0xff]  ;;  %v1725_v2 = vld [vmem:[%s3014_s2 + $0xb0] sm:$0xff]  ;;  %s2230_s19 = scalar_select %p290_p11, %s2111_s24, 1  ;;  %v1724_v4 = vld [vmem:[%s3014_s2 + $0xa8] sm:$0xff]  ;;  %vm321_vm0 = vcmask 261120   ;;  %vm314_vm1 = vcmask 785408  }
  0x15   : > { %v398_v1 = vld [vmem:[%s3014_s2 + $0x58] sm:$0xff]  ;;  %449 = vmatpush.msra.mxu0 %v1726_v0  ;;  %1907 = vmatpush.msra.mxu2 %v1726_v0  ;;  %v397_v3 = vld [vmem:[%s3014_s2 + $0x50] sm:$0xff]  ;;  %v396_v5 = vld [vmem:[%s3014_s2 + $0x48] sm:$0xff]  ;;  %v2122_v28 = vmov 0.0   ;;  %vm370_vm2 = vcmask 785664   ;;  %s1593_s24 = scalar_lea.sflag [#allocation4], %s287_s20 }
  0x16   : > { %514 = vmatpush.msra.mxu1 %v398_v1  ;;  %1919 = vmatpush.msra.mxu3 %v398_v1  ;;  %s1904_s8 = sshll.u32 %s2230_s19, 6  ;;  %v1723_v6 = vld [vmem:[%s3014_s2 + $0xa0] sm:$0xff]  ;;  %v1722_v10 = vld [vmem:[%s3014_s2 + $0x98] sm:$0xff]  ;;  %v1721_v13 = vld [vmem:[%s3014_s2 + $0x90] sm:$0xff]  ;;  %316 = vst.msk [vmem:[#allocation2 + $0x8] sm:$0xff] %vm314_vm1, %v2122_v28  ;;  %s1710_s19 = sshll.u32 %s287_s20, 6 }
  0x17   : > { %450 = vmatpush.msra.mxu0 %v1725_v2  ;;  %1908 = vmatpush.msra.mxu2 %v1725_v2  ;;  %s2244_s13 = scalar_lea.vmem %s3013_s1, %s1904_s8  ;;  %v395_v9 = vld [vmem:[%s3014_s2 + $0x40] sm:$0xff]  ;;  %v394_v12 = vld [vmem:[%s3014_s2 + $0x38] sm:$0xff]  ;;  %v393_v14 = vld [vmem:[%s3014_s2 + $0x30] sm:$0xff]  ;;  %s2297_s16 = scalar_lea.vmem %s3012_s0, %s1904_s8  ;;  %315 = vst.msk [vmem:[#allocation2] sm:$0xff] %vm314_vm1, %v2122_v28 }
  0x18   : > { %515 = vmatpush.msra.mxu1 %v397_v3  ;;  %1920 = vmatpush.msra.mxu3 %v397_v3  ;;  %v333_v7 = vld [vmem:[%s2244_s13 + $0x18] sm:$0xff]  ;;  %v334_v8 = vld [vmem:[%s2244_s13 + $0x20] sm:$0xff]  ;;  %v1720_v15 = vld [vmem:[%s3014_s2 + $0x88] sm:$0xff]  ;;  %318 = vst.msk [vmem:[#allocation2 + $0x50] sm:$0xff] %vm314_vm1, %v2122_v28  ;;  %s2123_s8 = smov 96  }
  0x19   : > { %451 = vmatpush.msra.mxu0 %v1724_v4  ;;  %1909 = vmatpush.msra.mxu2 %v1724_v4  ;;  %v330_v11 = vld [vmem:[%s2244_s13] sm:$0xff]  ;;  %v332_v16 = vld [vmem:[%s2244_s13 + $0x10] sm:$0xff]  ;;  %v335_v17 = vld [vmem:[%s2244_s13 + $0x28] sm:$0xff]  ;;  %319 = vst.msk [vmem:[#allocation2 + $0x58] sm:$0xff] %vm314_vm1, %v2122_v28 }
  0x1a   : > { %516 = vmatpush.msra.mxu1 %v396_v5  ;;  %1921 = vmatpush.msra.mxu3 %v396_v5  ;;  %v392_v18 = vld [vmem:[%s3014_s2 + $0x28] sm:$0xff]  ;;  %v1719_v19 = vld [vmem:[%s3014_s2 + $0x80] sm:$0xff]  ;;  %v336_v20 = vld [vmem:[%s2244_s13 + $0x30] sm:$0xff] }
  0x1b   : > { %352 = vrot.lane.b32.xlu0 %v333_v7, %s2121_s18  ;;  %354 = vrot.lane.b32.xlu1 %v334_v8, %s2121_s18  ;;  %v391_v21 = vld [vmem:[%s3014_s2 + $0x20] sm:$0xff]  ;;  %v331_v22 = vld [vmem:[%s2244_s13 + $0x8] sm:$0xff] }
  0x1c   : > { %452 = vmatpush.msra.mxu0 %v1723_v6  ;;  %1910 = vmatpush.msra.mxu2 %v1723_v6  ;;  %v337_v23 = vld [vmem:[%s2244_s13 + $0x38] sm:$0xff]  ;;  %v1717_v27 = vld [vmem:[%s3014_s2 + $0x70] sm:$0xff]  ;;  %v1716_v30 = vld [vmem:[%s3014_s2 + $0x68] sm:$0xff] }
  0x1d   : > { %346 = vrot.lane.b32.xlu2 %v330_v11, %s2121_s18  ;;  %517 = vmatpush.msra.mxu1 %v395_v9  ;;  %v2300_v24 = vld [vmem:[%s2297_s16 + $0x18] sm:$0xff]  ;;  %v389_v29 = vld [vmem:[%s3014_s2 + $0x10] sm:$0xff]  ;;  %v2322_v31 = vld [vmem:[%s2297_s16 + $0x20] sm:$0xff] }
  0x1e   : > { %453 = vmatpush.msra.mxu0 %v1722_v10  ;;  %1911 = vmatpush.msra.mxu2 %v1722_v10  ;;  %325 = vst.msk [vmem:[#allocation2 + $0x28] sm:$0xff] %vm321_vm0, %v2300_v24  ;;  %v1718_v25 = vld [vmem:[%s3014_s2 + $0x78] sm:$0xff]  ;;  %v388_v32 = vld [vmem:[%s3014_s2 + $0x8] sm:$0xff]  ;;  %v1715_v33 = vld [vmem:[%s3014_s2 + $0x60] sm:$0xff] }
  0x1f   : > { %518 = vmatpush.msra.mxu1 %v394_v12  ;;  %1922 = vmatpush.msra.mxu3 %v395_v9  ;;  %v390_v26 = vld [vmem:[%s3014_s2 + $0x18] sm:$0xff]  ;;  %326 = vst.msk [vmem:[#allocation2 + $0x30] sm:$0xff] %vm321_vm0, %v2322_v31  ;;  %v387_v34 = vld [vmem:[%s3014_s2] sm:$0xff]  ;;  %v2338_v35 = vld [vmem:[%s2297_s16 + $0x10] sm:$0xff] }
  0x20   : > { %454 = vmatpush.msra.mxu0 %v1721_v13  ;;  %1912 = vmatpush.msra.mxu2 %v1721_v13  ;;  %v2341_v36 = vld [vmem:[%s2297_s16] sm:$0xff]  ;;  %324 = vst.msk [vmem:[#allocation2 + $0x20] sm:$0xff] %vm321_vm0, %v2338_v35  ;;  %v2345_v37 = vld [vmem:[#allocation2 + $0x8] sm:$0xff]  ;;  %v1754_v39 = vld [vmem:[%s3014_s2 + $0x118] sm:$0xff] }
  0x21   : > { %519 = vmatpush.msra.mxu1 %v393_v14  ;;  %1923 = vmatpush.msra.mxu3 %v394_v12  ;;  %322 = vst.msk [vmem:[#allocation2 + $0x10] sm:$0xff] %vm321_vm0, %v2341_v36  ;;  %v2351_v38 = vld [vmem:[#allocation2] sm:$0xff]  ;;  %v2357_v40 = vld [vmem:[%s2297_s16 + $0x28] sm:$0xff]  ;;  %v1774_v43 = vld [vmem:[%s3014_s2 + $0x178] sm:$0xff] }
  0x22   : > { %455 = vmatpush.msra.mxu0 %v1720_v15  ;;  %1913 = vmatpush.msra.mxu2 %v1720_v15  ;;  %327 = vst.msk [vmem:[#allocation2 + $0x38] sm:$0xff] %vm321_vm0, %v2357_v40  ;;  %v2369_v42 = vld [vmem:[%s2297_s16 + $0x8] sm:$0xff]  ;;  %v1753_v44 = vld [vmem:[%s3014_s2 + $0x110] sm:$0xff]  ;;  %v1794_v45 = vld [vmem:[%s3014_s2 + $0x1d8] sm:$0xff] }
  0x23   : > { %350 = vrot.lane.b32.xlu0 %v332_v16, %s2121_s18  ;;  %356 = vrot.lane.b32.xlu1 %v335_v17, %s2121_s18  ;;  %323 = vst.msk [vmem:[#allocation2 + $0x18] sm:$0xff] %vm321_vm0, %v2369_v42  ;;  %v1773_v47 = vld [vmem:[%s3014_s2 + $0x170] sm:$0xff]  ;;  %v1752_v49 = vld [vmem:[%s3014_s2 + $0x108] sm:$0xff] }
  0x24   : > { %520 = vmatpush.msra.mxu1 %v392_v18  ;;  %456 = vmatpush.msra.mxu0 %v1719_v19  ;;  %v1793_v48 = vld [vmem:[%s3014_s2 + $0x1d0] sm:$0xff]  ;;  %v1751_v51 = vld [vmem:[%s3014_s2 + $0x100] sm:$0xff]  ;;  %v1772_v52 = vld [vmem:[%s3014_s2 + $0x168] sm:$0xff] }
  0x25   : > { %358 = vrot.lane.b32.xlu2 %v336_v20, %s2121_s18  ;;  %1914 = vmatpush.msra.mxu2 %v1719_v19  ;;  %v2406_v53 = vld [vmem:[%s2297_s16 + $0x30] sm:$0xff]  ;;  %v1792_v54 = vld [vmem:[%s3014_s2 + $0x1c8] sm:$0xff]  ;;  %v1791_v55 = vld [vmem:[%s3014_s2 + $0x1c0] sm:$0xff] }
  0x26   : > { %521 = vmatpush.msra.mxu1 %v391_v21  ;;  %1924 = vmatpush.msra.mxu3 %v393_v14  ;;  %328 = vst.msk [vmem:[#allocation2 + $0x40] sm:$0xff] %vm321_vm0, %v2406_v53  ;;  %v1771_v56 = vld [vmem:[%s3014_s2 + $0x160] sm:$0xff]  ;;  %v1750_v57 = vld [vmem:[%s3014_s2 + $0xf8] sm:$0xff]  ;;  %v1749_v59 = vld [vmem:[%s3014_s2 + $0xf0] sm:$0xff] }
  0x27   : > { %457 = vmatpush.msra.mxu0 %v1718_v25  ;;  %1915 = vmatpush.msra.mxu2 %v1718_v25  ;;  %v1790_v58 = vld [vmem:[%s3014_s2 + $0x1b8] sm:$0xff]  ;;  %v1789_v61 = vld [vmem:[%s3014_s2 + $0x1b0] sm:$0xff]  ;;  %v1748_v62 = vld [vmem:[%s3014_s2 + $0xe8] sm:$0xff] }
  0x28   : > { %1925 = vmatpush.msra.mxu3 %v392_v18  ;;  %522 = vmatpush.msra.mxu1 %v390_v26  ;;  %v1770_v60 = vld [vmem:[%s3014_s2 + $0x158] sm:$0xff]  ;;  %v1769_v63 = vld [vmem:[%s3014_s2 + $0x150] sm:$0xff]  ;;  %v1788_v0 = vld [vmem:[%s3014_s2 + $0x1a8] sm:$0xff] }
  0x29   : > { %458 = vmatpush.msra.mxu0 %v1717_v27  ;;  %1916 = vmatpush.msra.mxu2 %v1717_v27  ;;  %v1747_v1 = vld [vmem:[%s3014_s2 + $0xe0] sm:$0xff]  ;;  %v1768_v5 = vld [vmem:[%s3014_s2 + $0x148] sm:$0xff]  ;;  %v1746_v6 = vld [vmem:[%s3014_s2 + $0xd8] sm:$0xff] }
  0x2a   : > { %1926 = vmatpush.msra.mxu3 %v391_v21  ;;  %523 = vmatpush.msra.mxu1 %v389_v29  ;;  %v1787_v2 = vld [vmem:[%s3014_s2 + $0x1a0] sm:$0xff]  ;;  %v1786_v7 = vld [vmem:[%s3014_s2 + $0x198] sm:$0xff]  ;;  %v1745_v8 = vld [vmem:[%s3014_s2 + $0xd0] sm:$0xff] }
  0x2b   : > { %348 = vrot.lane.b32.xlu0 %v331_v22, %s2121_s18  ;;  %360 = vrot.lane.b32.xlu1 %v337_v23, %s2121_s18  ;;  %v1767_v9 = vld [vmem:[%s3014_s2 + $0x140] sm:$0xff]  ;;  %v1785_v10 = vld [vmem:[%s3014_s2 + $0x190] sm:$0xff] }
  0x2c   : > { %1927 = vmatpush.msra.mxu3 %v390_v26  ;;  %459 = vmatpush.msra.mxu0 %v1716_v30  ;;  %v1744_v11 = vld [vmem:[%s3014_s2 + $0xc8] sm:$0xff]  ;;  %v1766_v12 = vld [vmem:[%s3014_s2 + $0x138] sm:$0xff]  ;;  %v1743_v14 = vld [vmem:[%s3014_s2 + $0xc0] sm:$0xff] }
  0x2d   : > { %1917 = vmatpush.msra.mxu2 %v1716_v30  ;;  %524 = vmatpush.msra.mxu1 %v388_v32  ;;  %v1784_v13 = vld [vmem:[%s3014_s2 + $0x188] sm:$0xff]  ;;  %v1783_v15 = vld [vmem:[%s3014_s2 + $0x180] sm:$0xff]  ;;  %v1765_v19 = vld [vmem:[%s3014_s2 + $0x130] sm:$0xff] }
  0x2e   : > { %1928 = vmatpush.msra.mxu3 %v389_v29  ;;  %460 = vmatpush.msra.mxu0 %v1715_v33  ;;  %v1764_v20 = vld [vmem:[%s3014_s2 + $0x128] sm:$0xff]  ;;  %v1763_v21 = vld [vmem:[%s3014_s2 + $0x120] sm:$0xff]  ;;  %v2525_v30 = vld [vmem:[%s2297_s16 + $0x38] sm:$0xff]  ;;  %s2926_s16 = scalar_lea.vmem [#allocation3], %s1710_s19 }
  0x2f   : > { %1918 = vmatpush.msra.mxu2 %v1715_v33  ;;  %525 = vmatpush.msra.mxu1 %v387_v34  ;;  %329 = vst.msk [vmem:[#allocation2 + $0x48] sm:$0xff] %vm321_vm0, %v2525_v30  ;;  %v2542_v33 = vld [vmem:[#allocation2 + $0x50] sm:$0xff]  ;;  %s1606_s12 = sshll.u32 %s2926_s16, 4  ;;  %s1607_s12 = int_to_ptr.vmem [resolvable:$true] %s1606_s12 }
  0x30   : > { %1929 = vmatpush.msra.mxu3 %v388_v32  ;;  %1727 = vmatmul.msk.f32.vlgmr.msra.gmra.mxu0 %vm314_vm1, %v2345_v37 }
  0x31   : > { %1735 = vmatmul.msk.f32.vlgmr.msra.gmra.mxu1 %vm314_vm1, %v2351_v38  ;;  %600 = vmatpush.msrb.mxu2 %v1754_v39 }
  0x32   : > { %1930 = vmatpush.msra.mxu3 %v387_v34  ;;  %1007 = vrot.lane.b32.xlu2 %v2341_v36, %s2121_s18  ;;  %v2548_v34 = vld [vmem:[#allocation2 + $0x58] sm:$0xff] }
  0x33   : > { %1011 = vrot.lane.b32.xlu1 %v2338_v35, %s2121_s18  ;;  %1009 = vrot.lane.b32.xlu0 %v2369_v42, %s2121_s18 }
  0x34   : > { %695 = vmatpush.msrb.mxu3 %v1774_v43  ;;  %601 = vmatpush.msrb.mxu2 %v1753_v44 }
  0x35   : > { %790 = vmatpush.msrb.mxu0 %v1794_v45 }
  0x36   : > { %696 = vmatpush.msrb.mxu3 %v1773_v47  ;;  %602 = vmatpush.msrb.mxu2 %v1752_v49 }
  0x37   : > { %791 = vmatpush.msrb.mxu0 %v1793_v48 }
  0x38   : > { %697 = vmatpush.msrb.mxu3 %v1772_v52  ;;  %603 = vmatpush.msrb.mxu2 %v1751_v51 }
  0x39   : > { %1736 = vmatmul.msk.f32.gmra.mxu1 %vm314_vm1, %v2345_v37  ;;  %792 = vmatpush.msrb.mxu0 %v1792_v54 }
  0x3a   : > { %1013 = vrot.lane.b32.xlu2 %v2300_v24, %s2121_s18  ;;  %698 = vmatpush.msrb.mxu3 %v1771_v56 }
  0x3b   : > { %1017 = vrot.lane.b32.xlu1 %v2357_v40, %s2121_s18  ;;  %1015 = vrot.lane.b32.xlu0 %v2322_v31, %s2121_s18 }
  0x3c   : > { %793 = vmatpush.msrb.mxu0 %v1791_v55  ;;  %604 = vmatpush.msrb.mxu2 %v1750_v57 }
  0x3d   : > { %699 = vmatpush.msrb.mxu3 %v1770_v60 }
  0x3e   : > { %794 = vmatpush.msrb.mxu0 %v1790_v58  ;;  %605 = vmatpush.msrb.mxu2 %v1749_v59 }
  0x3f   : > { %700 = vmatpush.msrb.mxu3 %v1769_v63 }
  0x40   : > { %795 = vmatpush.msrb.mxu0 %v1789_v61  ;;  %606 = vmatpush.msrb.mxu2 %v1748_v62 }
  0x41   : > { %701 = vmatpush.msrb.mxu3 %v1768_v5 }
  0x42   : > { %796 = vmatpush.msrb.mxu0 %v1788_v0  ;;  %607 = vmatpush.msrb.mxu2 %v1747_v1  ;;  %v2573_v1 = vld [vmem:[%s3016_s4] ss:$0 sm:$0xff] }
  0x43   : > { %1019 = vrot.lane.b32.xlu0 %v2406_v53, %s2121_s18  ;;  %702 = vmatpush.msrb.mxu3 %v1767_v9 }
  0x44   : > { %797 = vmatpush.msrb.mxu0 %v1787_v2  ;;  %608 = vmatpush.msrb.mxu2 %v1746_v6 }
  0x45   : > { %703 = vmatpush.msrb.mxu3 %v1766_v12 }
  0x46   : > { %798 = vmatpush.msrb.mxu0 %v1786_v7  ;;  %609 = vmatpush.msrb.mxu2 %v1745_v8 }
  0x47   : > { %704 = vmatpush.msrb.mxu3 %v1765_v19 }
  0x48   : > { %799 = vmatpush.msrb.mxu0 %v1785_v10  ;;  %610 = vmatpush.msrb.mxu2 %v1744_v11 }
  0x49   : > { %705 = vmatpush.msrb.mxu3 %v1764_v20 }
  0x4a   : > { %800 = vmatpush.msrb.mxu0 %v1784_v13  ;;  %611 = vmatpush.msrb.mxu2 %v1743_v14 }
  0x4b   : > { %706 = vmatpush.msrb.mxu3 %v1763_v21 }
  0x4c   : > { %801 = vmatpush.msrb.mxu0 %v1783_v15 }
  0x77   : > { %v347_v41 = vpop.permute.xlu2 %346 }
  0x78   : > { %371 = vst.msk [vmem:[#allocation2 + $0x10] sm:$0xff] %vm370_vm2, %v347_v41 }
  0x7f   : > { %v2384_v46 = vld [vmem:[#allocation2 + $0x10] sm:$0xff]  ;;  %v359_v50 = vpop.permute.xlu2 %358 }
  0x80   : > { %1728 = vmatmul.msk.f32.gmra.mxu0 %vm314_vm1, %v2384_v46  ;;  %377 = vst.msk [vmem:[#allocation2 + $0x40] sm:$0xff] %vm370_vm2, %v359_v50  ;;  %1737 = vmatmul.msk.f32.gmra.mxu1 %vm314_vm1, %v2384_v46 }
  0x87   : > { %v407_v28 = vld [vmem:[#allocation2 + $0x40] sm:$0xff] }
  0x8d   : > { %v353_v3 = vpop.permute.xlu0 %352  ;;  %v355_v4 = vpop.permute.xlu1 %354 }
  0x8e   : > { %374 = vst.msk [vmem:[#allocation2 + $0x28] sm:$0xff] %vm370_vm2, %v353_v3 }
  0x8f   : > { %375 = vst.msk [vmem:[#allocation2 + $0x30] sm:$0xff] %vm370_vm2, %v355_v4 }
  0x95   : > { %v351_v16 = vpop.permute.xlu0 %350  ;;  %v404_v17 = vld [vmem:[#allocation2 + $0x28] sm:$0xff]  ;;  %v357_v18 = vpop.permute.xlu1 %356 }
  0x96   : > { %373 = vst.msk [vmem:[#allocation2 + $0x20] sm:$0xff] %vm370_vm2, %v351_v16  ;;  %1731 = vmatmul.msk.f32.vlgmr.msra.gmra.mxu2 %vm314_vm1, %v404_v17  ;;  %v405_v22 = vld [vmem:[#allocation2 + $0x30] sm:$0xff] }
  0x97   : > { %376 = vst.msk [vmem:[#allocation2 + $0x38] sm:$0xff] %vm370_vm2, %v357_v18 }
  0x9d   : > { %v349_v23 = vpop.permute.xlu0 %348  ;;  %v383_v25 = vld [vmem:[#allocation2 + $0x20] sm:$0xff]  ;;  %v361_v29 = vpop.permute.xlu1 %360 }
  0x9e   : > { %372 = vst.msk [vmem:[#allocation2 + $0x18] sm:$0xff] %vm370_vm2, %v349_v23  ;;  %1732 = vmatmul.msk.f32.gmra.mxu2 %vm314_vm1, %v405_v22  ;;  %1739 = vmatmul.msk.f32.vlgmr.msra.gmra.mxu3 %vm314_vm1, %v383_v25  ;;  %v406_v26 = vld [vmem:[#allocation2 + $0x38] sm:$0xff] }
  0x9f   : > { %378 = vst.msk [vmem:[#allocation2 + $0x48] sm:$0xff] %vm370_vm2, %v361_v29 }
  0xa5   : > { %v402_v27 = vld [vmem:[#allocation2 + $0x18] sm:$0xff] }
  0xa6   : > { %1729 = vmatmul.msk.f32.gmra.mxu0 %vm314_vm1, %v402_v27  ;;  %1733 = vmatmul.msk.f32.gmra.mxu2 %vm314_vm1, %v406_v26  ;;  %v558_v32 = vld [vmem:[#allocation2 + $0x48] sm:$0xff] }
  0xa7   : > { %1740 = vmatmul.msk.f32.gmra.mxu3 %vm314_vm1, %v404_v17  ;;  %1738 = vmatmul.msk.f32.gmra.mxu1 %vm314_vm1, %v402_v27 }
  0xad   : > { %v462_v39 = vpop.f32.mrf.mxu0 }
  0xae   : > { %1730 = vmatmul.msk.f32.gmra.mxu0 %vm314_vm1, %v383_v25  ;;  %1734 = vmatmul.msk.f32.gmra.mxu2 %vm314_vm1, %v407_v28  ;;  %v527_v52 = vpop.f32.mrf.mxu1 }
  0xaf   : > { %1741 = vmatmul.msk.f32.gmra.mxu3 %vm314_vm1, %v405_v22  ;;  %v528_v58 = vadd.f32 %v527_v52, %v462_v39 }
  0xb6   : > { %1755 = vmatmul.msk.f32.vlgmr.msrb.gmra.mxu2 %vm314_vm1, %v2384_v46  ;;  %1795 = vmatmul.msk.f32.vlgmr.msrb.gmra.mxu0 %vm314_vm1, %v383_v25  ;;  %v530_v59 = vpop.f32.mrf.mxu1 }
  0xb7   : > { %1742 = vmatmul.msk.f32.gmra.mxu3 %vm314_vm1, %v406_v26 }
  0xbe   : > { %1756 = vmatmul.msk.f32.gmra.mxu2 %vm314_vm1, %v402_v27  ;;  %1796 = vmatmul.msk.f32.gmra.mxu0 %vm314_vm1, %v404_v17 }
  0xbf   : > { %1775 = vmatmul.msk.f32.vlgmr.msrb.gmra.mxu3 %vm314_vm1, %v402_v27 }
  0xc6   : > { %1757 = vmatmul.msk.f32.gmra.mxu2 %vm314_vm1, %v383_v25  ;;  %1797 = vmatmul.msk.f32.gmra.mxu0 %vm314_vm1, %v405_v22 }
  0xc7   : > { %1776 = vmatmul.msk.f32.gmra.mxu3 %vm314_vm1, %v383_v25 }
  0xce   : > { %1758 = vmatmul.msk.f32.gmra.mxu2 %vm314_vm1, %v404_v17  ;;  %1798 = vmatmul.msk.f32.gmra.mxu0 %vm314_vm1, %v406_v26 }
  0xcf   : > { %1777 = vmatmul.msk.f32.gmra.mxu3 %vm314_vm1, %v404_v17 }
  0xd6   : > { %1759 = vmatmul.msk.f32.gmra.mxu2 %vm314_vm1, %v405_v22  ;;  %1799 = vmatmul.msk.f32.gmra.mxu0 %vm314_vm1, %v407_v28 }
  0xd7   : > { %1778 = vmatmul.msk.f32.gmra.mxu3 %vm314_vm1, %v405_v22 }
  0xde   : > { %1760 = vmatmul.msk.f32.gmra.mxu2 %vm314_vm1, %v406_v26  ;;  %1800 = vmatmul.msk.f32.gmra.mxu0 %vm314_vm1, %v558_v32 }
  0xdf   : > { %1779 = vmatmul.msk.f32.gmra.mxu3 %vm314_vm1, %v406_v26 }
  0xe6   : > { %1761 = vmatmul.msk.f32.gmra.mxu2 %vm314_vm1, %v407_v28  ;;  %1801 = vmatmul.msk.f32.gmra.mxu0 %vm314_vm1, %v2542_v33 }
  0xe7   : > { %1780 = vmatmul.msk.f32.gmra.mxu3 %vm314_vm1, %v407_v28 }
  0xee   : > { %1762 = vmatmul.msk.f32.gmra.mxu2 %vm314_vm1, %v558_v32  ;;  %1802 = vmatmul.msk.f32.gmra.mxu0 %vm314_vm1, %v2548_v34 }
  0xef   : > { %1781 = vmatmul.msk.f32.gmra.mxu3 %vm314_vm1, %v558_v32 }
  0xf7   : > { %1782 = vmatmul.msk.f32.gmra.mxu3 %vm314_vm1, %v2542_v33 }
  0xfd   : > { %v465_v43 = vpop.f32.mrf.mxu0  ;;  %v533_v5 = vpop.f32.mrf.mxu1 }
  0xfe   : > { %v531_v3 = vadd.f32 %v530_v59, %v465_v43 }
 0x119   : > { %v2556_v41 = vpop.f32.mrf.mxu2 }
 0x121   : > { %v2558_v44 = vpop.f32.mrf.mxu2  ;;  %v2560_v45 = vpop.f32.mrf.mxu3 }
 0x123   : > { %v468_v46 = vpop.f32.mrf.mxu0 }
 0x124   : > { %v534_v13 = vadd.f32 %v533_v5, %v468_v46  ;;  %v536_v22 = vpop.f32.mrf.mxu1 }
 0x129   : > { %v2562_v47 = vpop.f32.mrf.mxu2 }
 0x12a   : > { %v2564_v48 = vpop.f32.mrf.mxu3 }
 0x12b   : > { %v471_v49 = vpop.f32.mrf.mxu0 }
 0x12c   : > { %v537_v26 = vadd.f32 %v536_v22, %v471_v49  ;;  %v540_v49 = vadd.f32 %v2560_v45, %v2556_v41 }
 0x131   : > { %v483_v50 = vpop.f32.mrf.mxu2 }
 0x132   : > { %v2566_v51 = vpop.f32.mrf.mxu3 }
 0x133   : > { %v803_v54 = vpop.f32.mrf.mxu0 }
 0x139   : > { %v613_v55 = vpop.f32.mrf.mxu2 }
 0x13a   : > { %v548_v56 = vpop.f32.mrf.mxu3  ;;  %v637_v61 = vadd.f32 %v613_v55, %v528_v58 }
 0x13b   : > { %v2568_v57 = vadd.f32 %v548_v56, %v483_v50  ;;  %v806_v60 = vpop.f32.mrf.mxu0 }
 0x141   : > { %v616_v62 = vpop.f32.mrf.mxu2 }
 0x142   : > { %v708_v63 = vpop.f32.mrf.mxu3  ;;  %v638_v6 = vadd.f32 %v616_v62, %v531_v3  ;;  %v1008_v3 = vpop.permute.xlu2 %1007 }
 0x143   : > { %v732_v0 = vadd.f32 %v708_v63, %v637_v61  ;;  %v809_v9 = vpop.f32.mrf.mxu0 }
 0x145   : > { %v827_v2 = vadd.f32 %v803_v54, %v732_v0 }
 0x147   : > { %v839_v4 = vadd.f32 %v2573_v1, %v827_v2 }
 0x149   : > { %v1803_v7 = vmul.f32 -1.442695, %v839_v4  ;;  %v619_v8 = vpop.f32.mrf.mxu2 }
 0x14a   : > { %v711_v10 = vpop.f32.mrf.mxu3  ;;  %v639_v16 = vadd.f32 %v619_v8, %v534_v13 }
 0x14b   : > { %1993 = vpow2.f32 %v1803_v7  ;;  %v733_v11 = vadd.f32 %v711_v10, %v638_v6  ;;  %v812_v23 = vpop.f32.mrf.mxu0 }
 0x14d   : > { %v828_v12 = vadd.f32 %v806_v60, %v733_v11 }
 0x14f   : > { %v840_v14 = vadd.f32 %v2573_v1, %v828_v12 }
 0x151   : > { %v1994_v15 = vpop.eup %1993  ;;  %v1804_v17 = vmul.f32 -1.442695, %v840_v14  ;;  %v622_v18 = vpop.f32.mrf.mxu2 }
 0x152   : > { %v871_v19 = vadd.f32 1.0, %v1994_v15  ;;  %v714_v20 = vpop.f32.mrf.mxu3  ;;  %v640_v29 = vadd.f32 %v622_v18, %v537_v26  ;;  %v543_v18 = vadd.f32 %v2564_v48, %v2558_v44 }
 0x153   : > { %1995 = vpow2.f32 %v1804_v17  ;;  %v734_v21 = vadd.f32 %v714_v20, %v639_v16  ;;  %v815_v58 = vpop.f32.mrf.mxu0 }
 0x154   : > { %1997 = vrcp.f32 %v871_v19  ;;  %v888_v59 = vand.u32 2147483647, %v871_v19  ;;  %v890_v60 = vand.u32 2147483648, %v871_v19  ;;  %vm884_vm4 = vweird.f32 %v871_v19 }
 0x155   : > { %v829_v25 = vadd.f32 %v809_v9, %v734_v21 }
 0x156   : > { %vm889_vm6 = vcmp.eq.f32.partialorder %v888_v59, 8.507059e+37  ;;  %v891_v9 = vor.u32 1.1754944e-38, %v890_v60 }
 0x157   : > { %v841_v27 = vadd.f32 %v2573_v1, %v829_v25 }
 0x159   : > { %v1996_v28 = vpop.eup %1995  ;;  %v1805_v32 = vmul.f32 -1.442695, %v841_v27  ;;  %v625_v39 = vpop.f32.mrf.mxu2 }
 0x15a   : > { %v1998_v43 = vpop.eup %1997  ;;  %v872_v46 = vadd.f32 1.0, %v1996_v28  ;;  %v717_v50 = vpop.f32.mrf.mxu3  ;;  %v641_v0 = vadd.f32 %v625_v39, %v540_v49 }
 0x15b   : > { %1999 = vpow2.f32 %v1805_v32  ;;  %v735_v52 = vadd.f32 %v717_v50, %v640_v29  ;;  %v880_v54 = vmul.f32 %v1998_v43, %v871_v19  ;;  %vm885_vm3 = vweird.f32 %v1998_v43  ;;  %v818_v17 = vpop.f32.mrf.mxu0  ;;  %v1010_v29 = vpop.permute.xlu0 %1009 }
 0x15c   : > { %2001 = vrcp.f32 %v872_v46  ;;  %vm886_vm5 = vmor %vm884_vm4, %vm885_vm3  ;;  %v903_v15 = vand.u32 2147483647, %v872_v46  ;;  %v905_v16 = vand.u32 2147483648, %v872_v46  ;;  %vm899_vm8 = vweird.f32 %v872_v46 }
 0x15d   : > { %v830_v55 = vadd.f32 %v812_v23, %v735_v52  ;;  %v881_v56 = vsub.f32 1.0, %v880_v54 }
 0x15e   : > { %vm904_vm10 = vcmp.eq.f32.partialorder %v903_v15, 8.507059e+37  ;;  %v906_v44 = vor.u32 1.1754944e-38, %v905_v16  ;;  %v1098_v16 = vld [vmem:[%s3015_s3 + $0x58] sm:$0xff] }
 0x15f   : > { %v842_v61 = vadd.f32 %v2573_v1, %v830_v55  ;;  %v882_v62 = vmul.f32 %v1998_v43, %v881_v56  ;;  %1213 = vmatpush.msra.mxu2 %v1098_v16  ;;  %v1845_v16 = vld [vmem:[%s3015_s3 + $0xf0] sm:$0xff] }
 0x161   : > { %v2000_v63 = vpop.eup %1999  ;;  %v1806_v2 = vmul.f32 -1.442695, %v842_v61  ;;  %v883_v4 = vadd.f32 %v1998_v43, %v882_v62  ;;  %v628_v7 = vpop.f32.mrf.mxu2 }
 0x162   : > { %v2002_v5 = vpop.eup %2001  ;;  %v2581_v6 = vadd.f32 1.0, %v2000_v63  ;;  %v720_v8 = vpop.f32.mrf.mxu3  ;;  %v642_v22 = vadd.f32 %v628_v7, %v543_v18  ;;  %v1822_v18 = vld [vmem:[%s3015_s3 + $0xb8] sm:$0xff] }
 0x163   : > { %2003 = vpow2.f32 %v1806_v2  ;;  %v736_v41 = vadd.f32 %v720_v8, %v641_v0  ;;  %v887_v45 = vsel %vm886_vm5, %v1998_v43, %v883_v4  ;;  %v895_v10 = vmul.f32 %v2002_v5, %v872_v46  ;;  %v821_v49 = vpop.f32.mrf.mxu0  ;;  %1148 = vmatpush.msrb.mxu1 %v1822_v18  ;;  %v1815_v18 = vld [vmem:[%s3015_s3 + $0x80] sm:$0xff] }
 0x164   : > { %2005 = vrcp.f32 %v2581_v6  ;;  %v2584_v11 = vsel %vm889_vm6, %v891_v9, %v887_v45  ;;  %vm900_vm7 = vweird.f32 %v2002_v5  ;;  %v918_v55 = vand.u32 2147483647, %v2581_v6 }
 0x165   : > { %v831_v12 = vadd.f32 %v815_v58, %v736_v41  ;;  %v1031_v13 = vmul.f32 %v1008_v3, %v2584_v11  ;;  %v896_v14 = vsub.f32 1.0, %v895_v10  ;;  %vm901_vm9 = vmor %vm899_vm8, %vm900_vm7  ;;  %v920_v56 = vand.u32 2147483648, %v2581_v6 }
 0x166   : > { %v546_v58 = vadd.f32 %v2566_v51, %v2562_v47  ;;  %vm914_vm12 = vweird.f32 %v2581_v6  ;;  %vm919_vm14 = vcmp.eq.f32.partialorder %v918_v55, 8.507059e+37  ;;  %v1819_v55 = vld [vmem:[%s3015_s3 + $0xa0] sm:$0xff] }
 0x167   : > { %v843_v19 = vadd.f32 %v2573_v1, %v831_v12  ;;  %1047 = vrot.lane.b32.xlu2 %v1031_v13, %s2123_s8  ;;  %v897_v20 = vmul.f32 %v2002_v5, %v896_v14  ;;  %v921_v47 = vor.u32 1.1754944e-38, %v920_v56  ;;  %v1849_v56 = vld [vmem:[%s3015_s3 + $0x110] sm:$0xff] }
 0x169   : > { %v2004_v21 = vpop.eup %2003  ;;  %v1807_v23 = vmul.f32 -1.442695, %v843_v19  ;;  %v898_v25 = vadd.f32 %v2002_v5, %v897_v20  ;;  %v631_v43 = vpop.f32.mrf.mxu2 }
 0x16a   : > { %v2006_v26 = vpop.eup %2005  ;;  %v2591_v27 = vadd.f32 1.0, %v2004_v21  ;;  %v723_v28 = vpop.f32.mrf.mxu3  ;;  %v643_v62 = vadd.f32 %v631_v43, %v546_v58 }
 0x16b   : > { %2007 = vpow2.f32 %v1807_v23  ;;  %v737_v48 = vadd.f32 %v723_v28, %v642_v22  ;;  %v902_v32 = vsel %vm901_vm9, %v2002_v5, %v898_v25  ;;  %v910_v39 = vmul.f32 %v2006_v26, %v2581_v6  ;;  %v1012_v5 = vpop.permute.xlu1 %1011  ;;  %v1014_v22 = vpop.permute.xlu2 %1013  ;;  %v1096_v25 = vld [vmem:[%s3015_s3 + $0x48] sm:$0xff] }
 0x16c   : > { %2009 = vrcp.f32 %v2591_v27  ;;  %v2595_v50 = vsel %vm904_vm10, %v906_v44, %v902_v32  ;;  %vm915_vm11 = vweird.f32 %v2006_v26  ;;  %v933_v12 = vand.u32 2147483647, %v2591_v27 }
 0x16d   : > { %v1032_v46 = vmul.f32 %v1010_v29, %v2595_v50  ;;  %v832_v52 = vadd.f32 %v818_v17, %v737_v48  ;;  %v911_v54 = vsub.f32 1.0, %v910_v39  ;;  %vm916_vm13 = vmor %vm914_vm12, %vm915_vm11  ;;  %v935_v13 = vand.u32 2147483648, %v2591_v27  ;;  %v1097_v17 = vld [vmem:[%s3015_s3 + $0x50] sm:$0xff]  ;;  %v824_v48 = vpop.f32.mrf.mxu0 }
 0x16e   : > { %vm929_vm2 = vweird.f32 %v2591_v27  ;;  %vm934_vm4 = vcmp.eq.f32.partialorder %v933_v12, 8.507059e+37  ;;  %1214 = vmatpush.msra.mxu2 %v1097_v17 }
 0x16f   : > { %v844_v59 = vadd.f32 %v2573_v1, %v832_v52  ;;  %1049 = vrot.lane.b32.xlu1 %v1032_v46, %s2123_s8  ;;  %v912_v60 = vmul.f32 %v2006_v26, %v911_v54  ;;  %v1095_v46 = vld [vmem:[%s3015_s3 + $0x40] sm:$0xff]  ;;  %v1850_v52 = vld [vmem:[%s3015_s3 + $0x118] sm:$0xff] }
 0x170   : > { %1215 = vmatpush.msra.mxu2 %v1096_v25  ;;  %1299 = vmatpush.msra.mxu3 %v1850_v52  ;;  %v1814_v25 = vld [vmem:[%s3015_s3 + $0x78] sm:$0xff]  ;;  %v1812_v52 = vld [vmem:[%s3015_s3 + $0x68] sm:$0xff] }
 0x171   : > { %v2008_v61 = vpop.eup %2007  ;;  %v1808_v63 = vmul.f32 -1.442695, %v844_v59  ;;  %v913_v0 = vadd.f32 %v2006_v26, %v912_v60  ;;  %v634_v10 = vpop.f32.mrf.mxu2 }
 0x172   : > { %v2010_v2 = vpop.eup %2009  ;;  %v2605_v3 = vadd.f32 1.0, %v2008_v61  ;;  %v726_v4 = vpop.f32.mrf.mxu3  ;;  %v644_v20 = vadd.f32 %v634_v10, %v2568_v57  ;;  %v936_v57 = vor.u32 1.1754944e-38, %v935_v13  ;;  %1216 = vmatpush.msra.mxu2 %v1095_v46  ;;  %1300 = vmatpush.msra.mxu3 %v1849_v56 }
 0x173   : > { %2011 = vpow2.f32 %v1808_v63  ;;  %v738_v51 = vadd.f32 %v726_v4, %v643_v62  ;;  %v917_v7 = vsel %vm916_vm13, %v2006_v26, %v913_v0  ;;  %v925_v8 = vmul.f32 %v2010_v2, %v2591_v27  ;;  %v1821_v26 = vld [vmem:[%s3015_s3 + $0xb0] sm:$0xff]  ;;  %v1820_v27 = vld [vmem:[%s3015_s3 + $0xa8] sm:$0xff]  ;;  %v1818_v62 = vld [vmem:[%s3015_s3 + $0x98] sm:$0xff]  ;;  %v1016_v10 = vpop.permute.xlu0 %1015 }
 0x174   : > { %2013 = vrcp.f32 %v2605_v3  ;;  %v2609_v9 = vsel %vm919_vm14, %v921_v47, %v917_v7  ;;  %vm930_vm15 = vweird.f32 %v2010_v2  ;;  %1149 = vmatpush.msrb.mxu1 %v1821_v26  ;;  %v950_v61 = vand.u32 2147483648, %v2605_v3  ;;  %v1848_v63 = vld [vmem:[%s3015_s3 + $0x108] sm:$0xff]  ;;  %v1847_v47 = vld [vmem:[%s3015_s3 + $0x100] sm:$0xff] }
 0x175   : > { %v1033_v41 = vmul.f32 %v1012_v5, %v2609_v9  ;;  %v833_v6 = vadd.f32 %v821_v49, %v738_v51  ;;  %v926_v45 = vsub.f32 1.0, %v925_v8  ;;  %vm931_vm3 = vmor %vm929_vm2, %vm930_vm15  ;;  %v1094_v49 = vld [vmem:[%s3015_s3 + $0x38] sm:$0xff]  ;;  %v948_v4 = vand.u32 2147483647, %v2605_v3  ;;  %v1093_v5 = vld [vmem:[%s3015_s3 + $0x30] sm:$0xff]  ;;  %1301 = vmatpush.msra.mxu3 %v1848_v63 }
 0x176   : > { %1150 = vmatpush.msrb.mxu1 %v1820_v27  ;;  %1217 = vmatpush.msra.mxu2 %v1094_v49  ;;  %vm944_vm6 = vweird.f32 %v2605_v3  ;;  %v1092_v8 = vld [vmem:[%s3015_s3 + $0x28] sm:$0xff]  ;;  %v951_v12 = vor.u32 1.1754944e-38, %v950_v61  ;;  %v1811_v49 = vld [vmem:[%s3015_s3 + $0x60] sm:$0xff] }
 0x177   : > { %v845_v14 = vadd.f32 %v2573_v1, %v833_v6  ;;  %1051 = vrot.lane.b32.xlu2 %v1033_v41, %s2123_s8  ;;  %v927_v15 = vmul.f32 %v2010_v2, %v926_v45  ;;  %v1846_v41 = vld [vmem:[%s3015_s3 + $0xf8] sm:$0xff]  ;;  %1302 = vmatpush.msra.mxu3 %v1847_v47  ;;  %vm949_vm8 = vcmp.eq.f32.partialorder %v948_v4, 8.507059e+37 }
 0x178   : > { %1151 = vmatpush.msrb.mxu1 %v1819_v55  ;;  %1218 = vmatpush.msra.mxu2 %v1093_v5 }
 0x179   : > { %v2012_v19 = vpop.eup %2011  ;;  %v1809_v21 = vmul.f32 -1.442695, %v845_v14  ;;  %v928_v23 = vadd.f32 %v2010_v2, %v927_v15  ;;  %v1091_v15 = vld [vmem:[%s3015_s3 + $0x20] sm:$0xff]  ;;  %1303 = vmatpush.msra.mxu3 %v1846_v41 }
 0x17a   : > { %v2633_v28 = vpop.eup %2013  ;;  %v2635_v29 = vadd.f32 1.0, %v2012_v19  ;;  %v729_v44 = vpop.f32.mrf.mxu3  ;;  %1152 = vmatpush.msrb.mxu1 %v1818_v62  ;;  %1219 = vmatpush.msra.mxu2 %v1092_v8  ;;  %v1840_v8 = vld [vmem:[%s3015_s3 + $0xc8] sm:$0xff]  ;;  %v1839_v41 = vld [vmem:[%s3015_s3 + $0xc0] sm:$0xff] }
 0x17b   : > { %2015 = vpow2.f32 %v1809_v21  ;;  %v739_v32 = vadd.f32 %v729_v44, %v644_v20  ;;  %v932_v39 = vsel %vm931_vm3, %v2010_v2, %v928_v23  ;;  %v940_v43 = vmul.f32 %v2633_v28, %v2605_v3  ;;  %v1816_v3 = vld [vmem:[%s3015_s3 + $0x88] sm:$0xff]  ;;  %v1090_v21 = vld [vmem:[%s3015_s3 + $0x18] sm:$0xff]  ;;  %1304 = vmatpush.msra.mxu3 %v1845_v16  ;;  %v1089_v44 = vld [vmem:[%s3015_s3 + $0x10] sm:$0xff]  ;;  %v1020_v4 = vpop.permute.xlu0 %1019 }
 0x17c   : > { %2017 = vrcp.f32 %v2635_v29  ;;  %v2650_v54 = vsel %vm934_vm4, %v936_v57, %v932_v39  ;;  %vm945_vm5 = vweird.f32 %v2633_v28  ;;  %v965_v23 = vand.u32 2147483648, %v2635_v29  ;;  %1220 = vmatpush.msra.mxu2 %v1091_v15  ;;  %v1843_v57 = vld [vmem:[%s3015_s3 + $0xe0] sm:$0xff]  ;;  %v1862_v16 = vld [vmem:[%s3015_s3 + $0x138] sm:$0xff] }
 0x17d   : > { %v1034_v58 = vmul.f32 %v1014_v22, %v2650_v54  ;;  %v834_v59 = vadd.f32 %v824_v48, %v739_v32  ;;  %v941_v60 = vsub.f32 1.0, %v940_v43  ;;  %vm946_vm7 = vmor %vm944_vm6, %vm945_vm5  ;;  %v1844_v22 = vld [vmem:[%s3015_s3 + $0xe8] sm:$0xff]  ;;  %v1813_v48 = vld [vmem:[%s3015_s3 + $0x70] sm:$0xff]  ;;  %vm959_vm10 = vweird.f32 %v2635_v29  ;;  %v1018_v43 = vpop.permute.xlu1 %1017 }
 0x17e   : > { %1221 = vmatpush.msra.mxu2 %v1090_v21  ;;  %1305 = vmatpush.msra.mxu3 %v1844_v22  ;;  %v1088_v32 = vld [vmem:[%s3015_s3 + $0x8] sm:$0xff]  ;;  %v966_v46 = vor.u32 1.1754944e-38, %v965_v23 }
 0x17f   : > { %v2670_v0 = vadd.f32 %v2573_v1, %v834_v59  ;;  %1053 = vrot.lane.b32.xlu0 %v1034_v58, %s2123_s8  ;;  %v942_v2 = vmul.f32 %v2633_v28, %v941_v60  ;;  %v1817_v1 = vld [vmem:[%s3015_s3 + $0x90] sm:$0xff] }
 0x180   : > { %1153 = vmatpush.msrb.mxu1 %v1817_v1  ;;  %1222 = vmatpush.msra.mxu2 %v1089_v44 }
 0x181   : > { %v2016_v51 = vpop.eup %2015  ;;  %v943_v7 = vadd.f32 %v2633_v28, %v942_v2  ;;  %1306 = vmatpush.msra.mxu3 %v1843_v57  ;;  %v1810_v23 = vmul.f32 -1.442695, %v2670_v0  ;;  %v1889_v57 = vld [vmem:[%s3015_s3 + $0x1d0] sm:$0xff]  ;;  %v1887_v0 = vld [vmem:[%s3015_s3 + $0x1c0] sm:$0xff] }
 0x182   : > { %v2018_v6 = vpop.eup %2017  ;;  %v2693_v45 = vadd.f32 1.0, %v2016_v51  ;;  %1154 = vmatpush.msrb.mxu1 %v1816_v3  ;;  %1223 = vmatpush.msra.mxu2 %v1088_v32  ;;  %v1865_v3 = vld [vmem:[%s3015_s3 + $0x150] sm:$0xff] }
 0x183   : > { %v947_v13 = vsel %vm946_vm7, %v2633_v28, %v943_v7  ;;  %v955_v14 = vmul.f32 %v2018_v6, %v2635_v29  ;;  %vm960_vm9 = vweird.f32 %v2018_v6  ;;  %v963_v28 = vand.u32 2147483647, %v2635_v29  ;;  %v1087_v29 = vld [vmem:[%s3015_s3] sm:$0xff]  ;;  %v1841_v7 = vld [vmem:[%s3015_s3 + $0xd0] sm:$0xff] }
 0x184   : > { %2019 = vrcp.f32 %v2693_v45  ;;  %v2709_v17 = vsel %vm949_vm8, %v951_v12, %v947_v13  ;;  %1155 = vmatpush.msrb.mxu1 %v1815_v18  ;;  %vm961_vm11 = vmor %vm959_vm10, %vm960_vm9  ;;  %v980_v61 = vand.u32 2147483648, %v2693_v45  ;;  %1224 = vmatpush.msra.mxu2 %v1087_v29  ;;  %v978_v63 = vand.u32 2147483647, %v2693_v45  ;;  %v1866_v12 = vld [vmem:[%s3015_s3 + $0x158] sm:$0xff]  ;;  %v1864_v13 = vld [vmem:[%s3015_s3 + $0x148] sm:$0xff] }
 0x185   : > { %v1035_v19 = vmul.f32 %v1016_v10, %v2709_v17  ;;  %v956_v20 = vsub.f32 1.0, %v955_v14  ;;  %vm964_vm12 = vcmp.eq.f32.partialorder %v963_v28, 8.507059e+37  ;;  %1831 = vmatmul.msk.f32.vlgmr.msra.gmra.mxu2 %vm314_vm1, %v2351_v38  ;;  %vm974_vm14 = vweird.f32 %v2693_v45  ;;  %v1842_v38 = vld [vmem:[%s3015_s3 + $0xd8] sm:$0xff]  ;;  %v1867_v10 = vld [vmem:[%s3015_s3 + $0x160] sm:$0xff]  ;;  %v1861_v18 = vld [vmem:[%s3015_s3 + $0x130] sm:$0xff] }
 0x186   : > { %1156 = vmatpush.msrb.mxu1 %v1814_v25  ;;  %v981_v5 = vor.u32 1.1754944e-38, %v980_v61  ;;  %vm979_vm2 = vcmp.eq.f32.partialorder %v978_v63, 8.507059e+37  ;;  %1307 = vmatpush.msra.mxu3 %v1842_v38  ;;  %v1863_v14 = vld [vmem:[%s3015_s3 + $0x140] sm:$0xff]  ;;  %2021 = vpow2.f32 %v1810_v23  ;;  %v1890_v25 = vld [vmem:[%s3015_s3 + $0x1d8] sm:$0xff]  ;;  %v1881_v61 = vld [vmem:[%s3015_s3 + $0x190] sm:$0xff] }
 0x187   : > { %1055 = vrot.lane.b32.xlu1 %v1035_v19, %s2123_s8  ;;  %v957_v26 = vmul.f32 %v2018_v6, %v956_v20  ;;  %v1860_v19 = vld [vmem:[%s3015_s3 + $0x128] sm:$0xff]  ;;  %v1859_v20 = vld [vmem:[%s3015_s3 + $0x120] sm:$0xff] }
 0x188   : > { %1157 = vmatpush.msrb.mxu1 %v1813_v48  ;;  %1308 = vmatpush.msra.mxu3 %v1841_v7  ;;  %v1888_v48 = vld [vmem:[%s3015_s3 + $0x1c8] sm:$0xff] }
 0x189   : > { %v958_v27 = vadd.f32 %v2018_v6, %v957_v26 }
 0x18a   : > { %v2020_v39 = vpop.eup %2019  ;;  %1158 = vmatpush.msrb.mxu1 %v1812_v52  ;;  %1309 = vmatpush.msra.mxu3 %v1840_v8  ;;  %v1884_v52 = vld [vmem:[%s3015_s3 + $0x1a8] sm:$0xff] }
 0x18b   : > { %v962_v55 = vsel %vm961_vm11, %v2018_v6, %v958_v27  ;;  %v970_v56 = vmul.f32 %v2020_v39, %v2693_v45  ;;  %vm975_vm13 = vweird.f32 %v2020_v39  ;;  %v1869_v6 = vld [vmem:[%s3015_s3 + $0x170] sm:$0xff]  ;;  %v1868_v45 = vld [vmem:[%s3015_s3 + $0x168] sm:$0xff] }
 0x18c   : > { %v2747_v58 = vsel %vm964_vm12, %v966_v46, %v962_v55  ;;  %1159 = vmatpush.msrb.mxu1 %v1811_v49  ;;  %vm976_vm15 = vmor %vm974_vm14, %vm975_vm13  ;;  %1310 = vmatpush.msra.mxu3 %v1839_v41  ;;  %v2022_v26 = vpop.eup %2021  ;;  %v1885_v46 = vld [vmem:[%s3015_s3 + $0x1b0] sm:$0xff]  ;;  %v1882_v49 = vld [vmem:[%s3015_s3 + $0x198] sm:$0xff] }
 0x18d   : > { %v1036_v59 = vmul.f32 %v1018_v43, %v2747_v58  ;;  %v971_v60 = vsub.f32 1.0, %v970_v56  ;;  %1823 = vmatmul.msk.f32.vlgmr.msrb.gmra.mxu1 %vm314_vm1, %v2345_v37  ;;  %1832 = vmatmul.msk.f32.gmra.mxu2 %vm314_vm1, %v2345_v37  ;;  %v1870_v37 = vld [vmem:[%s3015_s3 + $0x178] sm:$0xff]  ;;  %v878_v28 = vadd.f32 1.0, %v2022_v26 }
 0x18e   : > { %1393 = vmatpush.msra.mxu0 %v1870_v37  ;;  %1487 = vmatpush.msra.mxu1 %v1890_v25  ;;  %v1886_v43 = vld [vmem:[%s3015_s3 + $0x1b8] sm:$0xff] }
 0x18f   : > { %1021 = vrot.lane.b32.xlu1 %v2525_v30, %s2121_s18  ;;  %1057 = vrot.lane.b32.xlu2 %v1036_v59, %s2123_s8  ;;  %v972_v62 = vmul.f32 %v2020_v39, %v971_v60  ;;  %2023 = vrcp.f32 %v878_v28  ;;  %v1883_v59 = vld [vmem:[%s3015_s3 + $0x1a0] sm:$0xff]  ;;  %vm989_vm4 = vweird.f32 %v878_v28  ;;  %v993_v38 = vand.u32 2147483647, %v878_v28  ;;  %s1608_s18 = sshll.u32 %s1605_s11, 4  ;;  %s1609_s18 = int_to_ptr.hbm [resolvable:$true] %s1608_s18 }
 0x190   : > { %1394 = vmatpush.msra.mxu0 %v1869_v6  ;;  %1488 = vmatpush.msra.mxu1 %v1889_v57  ;;  %s2055_s14 = sshra.s32 %s1609_s18, 4  ;;  %s2056_s14 = int_to_ptr.hbm [resolvable:$true] %s2055_s14 }
 0x191   : > { %v973_v2 = vadd.f32 %v2020_v39, %v972_v62  ;;  %vm994_vm6 = vcmp.eq.f32.partialorder %v993_v38, 8.507059e+37  ;;  %s2057_s15 = scalar_lea.hbm %s2056_s14, 64  ;;  %p2062_p1 = scmp.lt.s32.totalorder %s2056_s14, %s3018_s6 }
 0x192   : > { %1395 = vmatpush.msra.mxu0 %v1868_v45  ;;  %1489 = vmatpush.msra.mxu1 %v1888_v48  ;;  %p2058_p12 = scmp.ne.s32.totalorder %s2056_s14, %s2057_s15  ;;  %p2063_p2 = scmp.lt.s32.totalorder %s2061_s17, %s2057_s15 }
 0x193   : > { %v977_v47 = vsel %vm976_vm15, %v2020_v39, %v973_v2 }
 0x194   : > { %v2763_v1 = vsel %vm979_vm2, %v981_v5, %v977_v47  ;;  %1396 = vmatpush.msra.mxu0 %v1867_v10  ;;  %1490 = vmatpush.msra.mxu1 %v1887_v0  ;;  %v995_v47 = vand.u32 2147483648, %v878_v28  ;;  %p2059_p13 = pnand %p2058_p12, %p2201_p4  ;;  %p2064_p3 = por %p2063_p2, %p2062_p1 }
 0x195   : > { %v1037_v51 = vmul.f32 %v1020_v4, %v2763_v1  ;;  %v2024_v39 = vpop.eup %2023  ;;  %v1880_v4 = vld [vmem:[%s3015_s3 + $0x188] sm:$0xff] }
 0x196   : > { %1397 = vmatpush.msra.mxu0 %v1866_v12  ;;  %1491 = vmatpush.msra.mxu1 %v1886_v43  ;;  %v985_v55 = vmul.f32 %v2024_v39, %v878_v28  ;;  %vm990_vm3 = vweird.f32 %v2024_v39  ;;  %v996_v8 = vor.u32 1.1754944e-38, %v995_v47  ;;  %p2060_p0 = pneg %p2059_p13 }
 0x197   : > { %1059 = vrot.lane.b32.xlu0 %v1037_v51, %s2123_s8  ;;  %v1879_v51 = vld [vmem:[%s3015_s3 + $0x180] sm:$0xff]  ;;  %vm991_vm5 = vmor %vm989_vm4, %vm990_vm3 }
 0x198   : > { %1398 = vmatpush.msra.mxu0 %v1865_v3  ;;  %1492 = vmatpush.msra.mxu1 %v1885_v46  ;;  %v986_v60 = vsub.f32 1.0, %v985_v55  ;;  %p2065_p5 = pnand %p2064_p3, %p2060_p0 }
 0x19a   : > { %1399 = vmatpush.msra.mxu0 %v1864_v13  ;;  %1493 = vmatpush.msra.mxu1 %v1884_v52  ;;  %v987_v62 = vmul.f32 %v2024_v39, %v986_v60 }
 0x19c   : > { %1400 = vmatpush.msra.mxu0 %v1863_v14  ;;  %1494 = vmatpush.msra.mxu1 %v1883_v59  ;;  %v988_v5 = vadd.f32 %v2024_v39, %v987_v62  ;;  %v1552_v59 = vsub.f32 1.0, %v2584_v11 }
 0x19e   : > { %1401 = vmatpush.msra.mxu0 %v1862_v16  ;;  %1495 = vmatpush.msra.mxu1 %v1882_v49  ;;  %v992_v7 = vsel %vm991_vm5, %v2024_v39, %v988_v5  ;;  %v1560_v5 = vmul.f32 %v1552_v59, %v2341_v36 }
 0x19f   : > { %v2875_v37 = vsel %vm994_vm6, %v996_v8, %v992_v7 }
 0x1a0   : > { %1402 = vmatpush.msra.mxu0 %v1861_v18  ;;  %1496 = vmatpush.msra.mxu1 %v1881_v61 }
 0x1a2   : > { %1403 = vmatpush.msra.mxu0 %v1860_v19  ;;  %1497 = vmatpush.msra.mxu1 %v1880_v4 }
 0x1a4   : > { %1404 = vmatpush.msra.mxu0 %v1859_v20  ;;  %1498 = vmatpush.msra.mxu1 %v1879_v51 }
 0x1c1   : > { %v1048_v15 = vpop.permute.xlu2 %1047 }
 0x1c2   : > { %1071 = vst.msk [vmem:[#allocation2 + $0x10] sm:$0xff] %vm321_vm0, %v1048_v15 }
 0x1c9   : > { %v1100_v21 = vld [vmem:[#allocation2 + $0x10] sm:$0xff] }
 0x1ca   : > { %1824 = vmatmul.msk.f32.gmra.mxu1 %vm314_vm1, %v1100_v21  ;;  %1833 = vmatmul.msk.f32.gmra.mxu2 %vm314_vm1, %v1100_v21 }
 0x1cb   : > { %1851 = vmatmul.msk.f32.vlgmr.msra.gmra.mxu3 %vm314_vm1, %v1100_v21 }
 0x1d1   : > { %v1052_v22 = vpop.permute.xlu2 %1051 }
 0x1d2   : > { %1073 = vst.msk [vmem:[#allocation2 + $0x20] sm:$0xff] %vm321_vm0, %v1052_v22 }
 0x1d9   : > { %v1102_v29 = vld [vmem:[#allocation2 + $0x20] sm:$0xff] }
 0x1e1   : > { %v1050_v44 = vpop.permute.xlu1 %1049 }
 0x1e2   : > { %1072 = vst.msk [vmem:[#allocation2 + $0x18] sm:$0xff] %vm321_vm0, %v1050_v44 }
 0x1e9   : > { %v1058_v27 = vpop.permute.xlu2 %1057  ;;  %v1101_v32 = vld [vmem:[#allocation2 + $0x18] sm:$0xff] }
 0x1ea   : > { %1076 = vst.msk [vmem:[#allocation2 + $0x38] sm:$0xff] %vm321_vm0, %v1058_v27  ;;  %1825 = vmatmul.msk.f32.gmra.mxu1 %vm314_vm1, %v1101_v32  ;;  %1834 = vmatmul.msk.f32.gmra.mxu2 %vm314_vm1, %v1101_v32 }
 0x1eb   : > { %1852 = vmatmul.msk.f32.gmra.mxu3 %vm314_vm1, %v1101_v32  ;;  %1871 = vmatmul.msk.f32.vlgmr.msra.gmra.mxu0 %vm314_vm1, %v1101_v32 }
 0x1f1   : > { %v1054_v56 = vpop.permute.xlu0 %1053  ;;  %v1105_v12 = vld [vmem:[#allocation2 + $0x38] sm:$0xff] }
 0x1f2   : > { %1074 = vst.msk [vmem:[#allocation2 + $0x28] sm:$0xff] %vm321_vm0, %v1054_v56  ;;  %1826 = vmatmul.msk.f32.gmra.mxu1 %vm314_vm1, %v1102_v29  ;;  %1835 = vmatmul.msk.f32.gmra.mxu2 %vm314_vm1, %v1102_v29 }
 0x1f3   : > { %1853 = vmatmul.msk.f32.gmra.mxu3 %vm314_vm1, %v1102_v29  ;;  %1872 = vmatmul.msk.f32.gmra.mxu0 %vm314_vm1, %v1102_v29 }
 0x1f9   : > { %v1056_v63 = vpop.permute.xlu1 %1055  ;;  %v1103_v2 = vld [vmem:[#allocation2 + $0x28] sm:$0xff] }
 0x1fa   : > { %1075 = vst.msk [vmem:[#allocation2 + $0x30] sm:$0xff] %vm321_vm0, %v1056_v63  ;;  %1827 = vmatmul.msk.f32.gmra.mxu1 %vm314_vm1, %v1103_v2  ;;  %1836 = vmatmul.msk.f32.gmra.mxu2 %vm314_vm1, %v1103_v2 }
 0x1fb   : > { %1854 = vmatmul.msk.f32.gmra.mxu3 %vm314_vm1, %v1103_v2  ;;  %1873 = vmatmul.msk.f32.gmra.mxu0 %vm314_vm1, %v1103_v2 }
 0x201   : > { %v1022_v41 = vpop.permute.xlu1 %1021  ;;  %v1104_v6 = vld [vmem:[#allocation2 + $0x30] sm:$0xff] }
 0x202   : > { %v1038_v45 = vmul.f32 %v1022_v41, %v2875_v37  ;;  %1828 = vmatmul.msk.f32.gmra.mxu1 %vm314_vm1, %v1104_v6  ;;  %1837 = vmatmul.msk.f32.gmra.mxu2 %vm314_vm1, %v1104_v6  ;;  %v1553_v41 = vsub.f32 1.0, %v2595_v50 }
 0x203   : > { %1855 = vmatmul.msk.f32.gmra.mxu3 %vm314_vm1, %v1104_v6  ;;  %1874 = vmatmul.msk.f32.gmra.mxu0 %vm314_vm1, %v1104_v6 }
 0x204   : > { %1061 = vrot.lane.b32.xlu2 %v1038_v45, %s2123_s8 }
 0x208   : > { %v1226_v23 = vpop.f32.mrf.mxu2 }
 0x209   : > { %v1060_v10 = vpop.permute.xlu0 %1059 }
 0x20a   : > { %1077 = vst.msk [vmem:[#allocation2 + $0x40] sm:$0xff] %vm321_vm0, %v1060_v10  ;;  %1829 = vmatmul.msk.f32.gmra.mxu1 %vm314_vm1, %v1105_v12  ;;  %1838 = vmatmul.msk.f32.gmra.mxu2 %vm314_vm1, %v1105_v12  ;;  %v1161_v13 = vpop.f32.mrf.mxu1 }
 0x20b   : > { %1856 = vmatmul.msk.f32.gmra.mxu3 %vm314_vm1, %v1105_v12  ;;  %1875 = vmatmul.msk.f32.gmra.mxu0 %vm314_vm1, %v1105_v12  ;;  %v1227_v44 = vadd.f32 %v1226_v23, %v1161_v13  ;;  %v1561_v13 = vmul.f32 %v1553_v41, %v2369_v42  ;;  %v1554_v23 = vsub.f32 1.0, %v2609_v9 }
 0x20d   : > { %v1562_v42 = vmul.f32 %v1554_v23, %v2338_v35 }
 0x210   : > { %v1229_v48 = vpop.f32.mrf.mxu2 }
 0x211   : > { %v1106_v3 = vld [vmem:[#allocation2 + $0x40] sm:$0xff] }
 0x212   : > { %1830 = vmatmul.msk.f32.gmra.mxu1 %vm314_vm1, %v1106_v3 }
 0x213   : > { %1857 = vmatmul.msk.f32.gmra.mxu3 %vm314_vm1, %v1106_v3  ;;  %1876 = vmatmul.msk.f32.gmra.mxu0 %vm314_vm1, %v1106_v3 }
 0x21a   : > { %1891 = vmatmul.msk.f32.vlgmr.msra.gmra.mxu1 %vm314_vm1, %v1102_v29 }
 0x222   : > { %1892 = vmatmul.msk.f32.gmra.mxu1 %vm314_vm1, %v1103_v2 }
 0x22a   : > { %1893 = vmatmul.msk.f32.gmra.mxu1 %vm314_vm1, %v1104_v6 }
 0x232   : > { %1894 = vmatmul.msk.f32.gmra.mxu1 %vm314_vm1, %v1105_v12 }
 0x23a   : > { %1895 = vmatmul.msk.f32.gmra.mxu1 %vm314_vm1, %v1106_v3 }
 0x247   : > { %v1164_v15 = vpop.f32.mrf.mxu1 }
 0x248   : > { %v1230_v39 = vadd.f32 %v1229_v48, %v1164_v15 }
 0x24d   : > { %v1232_v56 = vpop.f32.mrf.mxu2 }
 0x24e   : > { %v1312_v25 = vpop.f32.mrf.mxu3 }
 0x24f   : > { %v1336_v0 = vadd.f32 %v1312_v25, %v1227_v44 }
 0x25e   : > { %v1062_v14 = vpop.permute.xlu2 %1061 }
 0x25f   : > { %1078 = vst.msk [vmem:[#allocation2 + $0x48] sm:$0xff] %vm321_vm0, %v1062_v14 }
 0x266   : > { %v1257_v16 = vld [vmem:[#allocation2 + $0x48] sm:$0xff] }
 0x267   : > { %v1167_v18 = vpop.f32.mrf.mxu1  ;;  %1858 = vmatmul.msk.f32.gmra.mxu3 %vm314_vm1, %v1257_v16  ;;  %1877 = vmatmul.msk.f32.gmra.mxu0 %vm314_vm1, %v1257_v16 }
 0x268   : > { %1896 = vmatmul.msk.f32.gmra.mxu1 %vm314_vm1, %v1257_v16  ;;  %v1406_v26 = vpop.f32.mrf.mxu0  ;;  %v1233_v61 = vadd.f32 %v1232_v56, %v1167_v18 }
 0x26d   : > { %v1235_v51 = vpop.f32.mrf.mxu2 }
 0x26e   : > { %v1315_v57 = vpop.f32.mrf.mxu3 }
 0x26f   : > { %v1170_v19 = vpop.f32.mrf.mxu1  ;;  %1878 = vmatmul.msk.f32.gmra.mxu0 %vm314_vm1, %v2542_v33  ;;  %v1337_v46 = vadd.f32 %v1315_v57, %v1230_v39  ;;  %v1555_v39 = vsub.f32 1.0, %v2650_v54 }
 0x270   : > { %1897 = vmatmul.msk.f32.gmra.mxu1 %vm314_vm1, %v2542_v33  ;;  %v1409_v27 = vpop.f32.mrf.mxu0  ;;  %v1430_v33 = vadd.f32 %v1406_v26, %v1336_v0  ;;  %v1236_v45 = vadd.f32 %v1235_v51, %v1170_v19 }
 0x271   : > { %v1431_v29 = vadd.f32 %v1409_v27, %v1337_v46 }
 0x275   : > { %v1238_v16 = vpop.f32.mrf.mxu2 }
 0x276   : > { %v1318_v55 = vpop.f32.mrf.mxu3 }
 0x277   : > { %v1173_v20 = vpop.f32.mrf.mxu1  ;;  %v1338_v2 = vadd.f32 %v1318_v55, %v1233_v61  ;;  %v1563_v55 = vmul.f32 %v1555_v39, %v2300_v24 }
 0x278   : > { %1898 = vmatmul.msk.f32.gmra.mxu1 %vm314_vm1, %v2548_v34  ;;  %v2915_v34 = vld [vmem:[%s3017_s5] ss:$0 sm:$0xff]  ;;  %v1412_v60 = vpop.f32.mrf.mxu0  ;;  %v1239_v26 = vadd.f32 %v1238_v16, %v1173_v20 }
 0x279   : > { %v1432_v8 = vadd.f32 %v1412_v60, %v1338_v2 }
 0x27d   : > { %v1241_v61 = vpop.f32.mrf.mxu2 }
 0x27e   : > { %v1321_v38 = vpop.f32.mrf.mxu3 }
 0x27f   : > { %v2906_v21 = vpop.f32.mrf.mxu1  ;;  %v1339_v3 = vadd.f32 %v1321_v38, %v1236_v45 }
 0x280   : > { %v1415_v12 = vpop.f32.mrf.mxu0  ;;  %v1242_v24 = vadd.f32 %v1241_v61, %v2906_v21 }
 0x281   : > { %v1433_v18 = vadd.f32 %v1415_v12, %v1339_v3 }
 0x285   : > { %v1244_v2 = vpop.f32.mrf.mxu2 }
 0x286   : > { %v1324_v25 = vpop.f32.mrf.mxu3 }
 0x287   : > { %v2908_v22 = vpop.f32.mrf.mxu1  ;;  %v1340_v48 = vadd.f32 %v1324_v25, %v1239_v26 }
 0x28f   : > { %v2910_v28 = vpop.f32.mrf.mxu1 }
 0x297   : > { %v1500_v32 = vpop.f32.mrf.mxu1 }
 0x298   : > { %v1524_v43 = vadd.f32 %v1500_v32, %v1430_v33 }
 0x29a   : > { %v1536_v52 = vadd.f32 %v2915_v34, %v1524_v43 }
 0x29c   : > { %2025 = vtanh.f32 %v1536_v52 }
 0x29f   : > { %v1503_v49 = vpop.f32.mrf.mxu1 }
 0x2a0   : > { %v1525_v62 = vadd.f32 %v1503_v49, %v1431_v29 }
 0x2a2   : > { %v2026_v63 = vpop.eup %2025  ;;  %v1537_v4 = vadd.f32 %v2915_v34, %v1525_v62  ;;  %v1327_v62 = vpop.f32.mrf.mxu3 }
 0x2a3   : > { %v1568_v47 = vmul.f32 %v2026_v63, %v2584_v11 }
 0x2a4   : > { %2027 = vtanh.f32 %v1537_v4 }
 0x2a5   : > { %v1576_v7 = vadd.f32 %v1568_v47, %v1560_v5 }
 0x2a7   : > { %1584 = vst.msk [vmem:[%s2926_s16] sm:$0xff] %vm321_vm0, %v1576_v7  ;;  %v1506_v6 = vpop.f32.mrf.mxu1  ;;  %v1245_v7 = vadd.f32 %v1244_v2, %v2908_v22 }
 0x2a8   : > { %v1526_v10 = vadd.f32 %v1506_v6, %v1432_v8  ;;  %v1247_v8 = vpop.f32.mrf.mxu2  ;;  %v1557_v6 = vsub.f32 1.0, %v2747_v58 }
 0x2aa   : > { %v2028_v36 = vpop.eup %2027  ;;  %v1538_v11 = vadd.f32 %v2915_v34, %v1526_v10  ;;  %v1330_v5 = vpop.f32.mrf.mxu3  ;;  %v1248_v10 = vadd.f32 %v1247_v8, %v2910_v28  ;;  %v1565_v22 = vmul.f32 %v1557_v6, %v2357_v40 }
 0x2ab   : > { %v1569_v14 = vmul.f32 %v2028_v36, %v2595_v50  ;;  %v1418_v50 = vpop.f32.mrf.mxu0 }
 0x2ac   : > { %2029 = vtanh.f32 %v1538_v11  ;;  %v1434_v32 = vadd.f32 %v1418_v50, %v1340_v48 }
 0x2ad   : > { %v1577_v15 = vadd.f32 %v1569_v14, %v1561_v13 }
 0x2af   : > { %1585 = vst.msk [vmem:[%s2926_s16 + $0x8] sm:$0xff] %vm321_vm0, %v1577_v15  ;;  %v1509_v19 = vpop.f32.mrf.mxu1 }
 0x2b0   : > { %v1527_v44 = vadd.f32 %v1509_v19, %v1433_v18  ;;  %v1558_v18 = vsub.f32 1.0, %v2763_v1 }
 0x2b2   : > { %v2030_v57 = vpop.eup %2029  ;;  %v1539_v0 = vadd.f32 %v2915_v34, %v1527_v44  ;;  %v1566_v26 = vmul.f32 %v1558_v18, %v2406_v53  ;;  %v1559_v44 = vsub.f32 1.0, %v2875_v37 }
 0x2b3   : > { %v1570_v27 = vmul.f32 %v2030_v57, %v2609_v9  ;;  %v1556_v9 = vsub.f32 1.0, %v2709_v17  ;;  %v1421_v63 = vpop.f32.mrf.mxu0 }
 0x2b4   : > { %2031 = vtanh.f32 %v1539_v0  ;;  %v1567_v53 = vmul.f32 %v1559_v44, %v2525_v30 }
 0x2b5   : > { %v1578_v33 = vadd.f32 %v1570_v27, %v1562_v42  ;;  %v1564_v59 = vmul.f32 %v1556_v9, %v2322_v31 }
 0x2b7   : > { %1586 = vst.msk [vmem:[%s2926_s16 + $0x10] sm:$0xff] %vm321_vm0, %v1578_v33  ;;  %v1512_v20 = vpop.f32.mrf.mxu1 }
 0x2b8   : > { %v1528_v43 = vadd.f32 %v1512_v20, %v1434_v32 }
 0x2ba   : > { %v2032_v46 = vpop.eup %2031  ;;  %v1540_v52 = vadd.f32 %v2915_v34, %v1528_v43 }
 0x2bb   : > { %v1571_v35 = vmul.f32 %v2032_v46, %v2650_v54  ;;  %v1341_v54 = vadd.f32 %v1327_v62, %v1242_v24 }
 0x2bc   : > { %2033 = vtanh.f32 %v1540_v52 }
 0x2bd   : > { %v1579_v56 = vadd.f32 %v1571_v35, %v1563_v55  ;;  %v1435_v4 = vadd.f32 %v1421_v63, %v1341_v54 }
 0x2bf   : > { %1587 = vst.msk [vmem:[%s2926_s16 + $0x18] sm:$0xff] %vm321_vm0, %v1579_v56 }
 0x2c2   : > { %v2034_v29 = vpop.eup %2033 }
 0x2c3   : > { %v1572_v60 = vmul.f32 %v2034_v29, %v2709_v17  ;;  %v1342_v17 = vadd.f32 %v1330_v5, %v1245_v7 }
 0x2c5   : > { %v1580_v49 = vadd.f32 %v1572_v60, %v1564_v59 }
 0x2c7   : > { %1588 = vst.msk [vmem:[%s2926_s16 + $0x20] sm:$0xff] %vm321_vm0, %v1580_v49 }
 0x2e4   : > { %v1424_v38 = vpop.f32.mrf.mxu0 }
 0x2e5   : > { %v1515_v47 = vpop.f32.mrf.mxu1  ;;  %v1436_v41 = vadd.f32 %v1424_v38, %v1342_v17 }
 0x2e6   : > { %v1529_v51 = vadd.f32 %v1515_v47, %v1435_v4 }
 0x2e8   : > { %v1541_v31 = vadd.f32 %v2915_v34, %v1529_v51 }
 0x2ea   : > { %2035 = vtanh.f32 %v1541_v31  ;;  %v1333_v21 = vpop.f32.mrf.mxu3 }
 0x2eb   : > { %v1343_v3 = vadd.f32 %v1333_v21, %v1248_v10 }
 0x2ec   : > { %v1427_v14 = vpop.f32.mrf.mxu0 }
 0x2ed   : > { %v1518_v45 = vpop.f32.mrf.mxu1  ;;  %v1437_v16 = vadd.f32 %v1427_v14, %v1343_v3 }
 0x2ee   : > { %v1530_v12 = vadd.f32 %v1518_v45, %v1436_v41 }
 0x2f0   : > { %v2036_v36 = vpop.eup %2035  ;;  %v1542_v11 = vadd.f32 %v2915_v34, %v1530_v12 }
 0x2f1   : > { %v1573_v13 = vmul.f32 %v2036_v36, %v2747_v58 }
 0x2f2   : > { %2037 = vtanh.f32 %v1542_v11 }
 0x2f3   : > { %v1581_v15 = vadd.f32 %v1573_v13, %v1565_v22 }
 0x2f5   : > { %1589 = vst.msk [vmem:[%s2926_s16 + $0x28] sm:$0xff] %vm321_vm0, %v1581_v15  ;;  %v1521_v28 = vpop.f32.mrf.mxu1 }
 0x2f6   : > { %v1531_v23 = vadd.f32 %v1521_v28, %v1437_v16 }
 0x2f8   : > { %v2038_v25 = vpop.eup %2037  ;;  %v1543_v19 = vadd.f32 %v2915_v34, %v1531_v23 }
 0x2f9   : > { %v1574_v40 = vmul.f32 %v2038_v25, %v2763_v1 }
 0x2fa   : > { %2039 = vtanh.f32 %v1543_v19 }
 0x2fb   : > { %v1582_v58 = vadd.f32 %v1574_v40, %v1566_v26 }
 0x2fd   : > { %1590 = vst.msk [vmem:[%s2926_s16 + $0x30] sm:$0xff] %vm321_vm0, %v1582_v58 }
 0x300   : > { %v2040_v34 = vpop.eup %2039 }
 0x301   : > { %v1575_v1 = vmul.f32 %v2040_v34, %v2875_v37 }
 0x303   : > { %v1583_v57 = vadd.f32 %v1575_v1, %v1567_v53 }
 0x305   : > { %1591 = vst.msk [vmem:[%s2926_s16 + $0x38] sm:$0xff] %vm321_vm0, %v1583_v57 }
 0x306   : > { %2068 = shalt.err (!%p2065_p5)
}
 0x307   : > { %s2124_s20 = smov 128   ;;  %s2125_s16 = smov 8  }
 0x308   : > { %1931 = dma.vmem_to_hbm [thread:$0]  (%p2201_p4), %s1607_s12, 1024, %s1609_s18, %s1593_s24, %s2124_s20, %s2124_s20, %s2125_s16  }
 0x309 PF: > { %p1937_p6 = scmp.ge.s32.totalorder %s2119_s26, 2  ;;  %s1623_s28 = sand.u32 1, %s2099_s21  }
 0x30a   : > { %s1624_s30 = scalar_lea.sflag [#allocation4], %s1623_s28 }
 0x30b   : > { %p1934_p7 = pnand %p1937_p6, %p2208_p8 }
 0x30d   : > { %p1935_p9 = pneg %p1934_p7 }
 0x30f   : > { %2094 = dma.done.wait (%p1935_p9), %s1624_s30, 1024  }
 0x310   : > { %2096 = vsyncadd (%p1935_p9), %s1624_s30, 4294966272  ;;  %s19_s26 = sadd.s32 1, %s2119_s26   ;;  %s3021_s21 = smov %s2103_s22 }
 0x311   : > { %p16_p10 = scmp.ge.s32.totalorder %s19_s26, 4   ;;  %s3022_s22 = smov %s2107_s23 }
 0x312   : > { %s3023_s23 = smov %s2214_s10  ;;  %s3024_s24 = smov %s2115_s25 }
 0x313   : > { %s3025_s25 = smov %s3027_s29  ;;  %18 = sbr.rel (!%p16_p10) target bundleno = 4 (0x4), region = 95 }
 0x318   :  { %1630 = vsyncpa [#allocation4], 1 }
 0x319   :  { %1632 = vsyncpa [#allocation4 + $0x1], 1 }

// kernel: sep_conv_gru.2
= control target key start
LH: loop header
LB: loop body
LE: loop exit
PB: predicated region body
PF: predicated region fallthrough
CT: control target
= control target key end

     0   :  { %s1967_s21 = smov 0   ;;  %s2745_s0 = inlined_call_operand.vmem [shape: f32[16,8,32], index: 0, kind: input, shape index: {}]   ;;  %s2746_s1 = inlined_call_operand.vmem [shape: f32[16,8,64], index: 1, kind: input, shape index: {}]   ;;  %s2747_s2 = inlined_call_operand.vmem [shape: f32[5,96,64], index: 2, kind: input, shape index: {}]   ;;  %s2748_s3 = inlined_call_operand.vmem [shape: f32[5,96,32], index: 3, kind: input, shape index: {}]   ;;  %s2749_s4 = inlined_call_operand.vmem [shape: f32[1,64], index: 4, kind: input, shape index: {}]   ;;  %s2750_s5 = inlined_call_operand.vmem [shape: f32[1,32], index: 5, kind: input, shape index: {}]   ;;  %s2751_s6 = inlined_call_operand.vmem [shape: f32[16,8,32], index: 6, kind: output, shape index: {}]  }
   0x1 LB: > { %s1639_s22 = sadd.s32 4294967295, %s1927_s21   ;;  %p1643_p0 = scmp.ge.s32.totalorder %s1927_s21, 1  ;;  %s1927_s21 = sphi %s1967_s21, %s16_s21  }
   0x2   : > { %p224_p1 = scmp.lt.s32.totalorder %s1927_s21, 3 }
   0x4   : > { %p225_p2 = pnand %p1643_p0, %p224_p1 }
   0x5   : > { %s1644_s23 = sshll.u32 (!%p225_p2), %s1639_s22, 3  ;;  %s1931_s27 = smov (!%p225_p2), 96  }
   0x6   : > { %228 = sbr.rel (%p225_p2) target bundleno = 750 (0x2ee), region = 44  ;;  %p260_p3 = scmp.lt.s32.totalorder (!%p225_p2), %s1644_s23, 15 }
   0xb   : > { %v1661_v0 = vld [vmem:[%s2747_s2 + $0xb8] sm:$0xff]  ;;  %v1660_v2 = vld [vmem:[%s2747_s2 + $0xb0] sm:$0xff]  ;;  %v1659_v4 = vld [vmem:[%s2747_s2 + $0xa8] sm:$0xff]  ;;  %s2757_s23 = smov (!%p260_p3, %s1644_s23), 15  ;;  %vm302_vm0 = vcmask 261120   ;;  %vm285_vm1 = vcmask 779264  }
   0xc   : > { %v379_v1 = vld [vmem:[%s2747_s2 + $0x58] sm:$0xff]  ;;  %430 = vmatpush.msra.mxu0 %v1661_v0  ;;  %1836 = vmatpush.msra.mxu2 %v1661_v0  ;;  %v378_v3 = vld [vmem:[%s2747_s2 + $0x50] sm:$0xff]  ;;  %v377_v5 = vld [vmem:[%s2747_s2 + $0x48] sm:$0xff]  ;;  %s1996_s14 = sshll.u32 %s2757_s23, 3  ;;  %s1929_s23 = smov 32   ;;  %v1930_v29 = vmov 0.0  }
   0xd   : > { %1848 = vmatpush.msra.mxu3 %v379_v1  ;;  %495 = vmatpush.msra.mxu1 %v379_v1  ;;  %v1658_v6 = vld [vmem:[%s2747_s2 + $0xa0] sm:$0xff]  ;;  %s2002_s17 = scalar_lea.vmem %s2746_s1, %s1996_s14  ;;  %v1657_v8 = vld [vmem:[%s2747_s2 + $0x98] sm:$0xff]  ;;  %v1656_v12 = vld [vmem:[%s2747_s2 + $0x90] sm:$0xff]  ;;  %s2051_s18 = scalar_lea.vmem %s2745_s0, %s1996_s14  ;;  %286 = vst.msk [vmem:[#allocation2] sm:$0x3] %vm285_vm1, %v1930_v29  ;;  %vm351_vm2 = vcmask 785664  }
   0xe   : > { %431 = vmatpush.msra.mxu0 %v1660_v2  ;;  %1837 = vmatpush.msra.mxu2 %v1660_v2  ;;  %v376_v7 = vld [vmem:[%s2747_s2 + $0x40] sm:$0xff]  ;;  %v375_v11 = vld [vmem:[%s2747_s2 + $0x38] sm:$0xff]  ;;  %v312_v13 = vld [vmem:[%s2002_s17 + $0x8] sm:$0xff]  ;;  %287 = vst.msk [vmem:[#allocation2 + $0x10] sm:$0x3] %vm285_vm1, %v1930_v29  ;;  %vm401_vm3 = vcmask 785408  }
   0xf   : > { %1849 = vmatpush.msra.mxu3 %v378_v3  ;;  %496 = vmatpush.msra.mxu1 %v378_v3  ;;  %v315_v9 = vld [vmem:[%s2002_s17 + $0x20] sm:$0xff]  ;;  %v374_v14 = vld [vmem:[%s2747_s2 + $0x30] sm:$0xff]  ;;  %v1655_v15 = vld [vmem:[%s2747_s2 + $0x88] sm:$0xff]  ;;  %288 = vst.msk [vmem:[#allocation2 + $0x20] sm:$0x3] %vm285_vm1, %v1930_v29 }
  0x10   : > { %432 = vmatpush.msra.mxu0 %v1659_v4  ;;  %1838 = vmatpush.msra.mxu2 %v1659_v4  ;;  %v311_v10 = vld [vmem:[%s2002_s17] sm:$0xff]  ;;  %v373_v16 = vld [vmem:[%s2747_s2 + $0x28] sm:$0xff]  ;;  %v317_v19 = vld [vmem:[%s2002_s17 + $0x30] sm:$0xff]  ;;  %289 = vst.msk [vmem:[#allocation2 + $0x30] sm:$0x3] %vm285_vm1, %v1930_v29 }
  0x11   : > { %1850 = vmatpush.msra.mxu3 %v377_v5  ;;  %497 = vmatpush.msra.mxu1 %v377_v5  ;;  %v1654_v17 = vld [vmem:[%s2747_s2 + $0x80] sm:$0xff]  ;;  %v316_v18 = vld [vmem:[%s2002_s17 + $0x28] sm:$0xff]  ;;  %v318_v21 = vld [vmem:[%s2002_s17 + $0x38] sm:$0xff]  ;;  %290 = vst.msk [vmem:[#allocation2 + $0x40] sm:$0x3] %vm285_vm1, %v1930_v29 }
  0x12   : > { %433 = vmatpush.msra.mxu0 %v1658_v6  ;;  %1839 = vmatpush.msra.mxu2 %v1658_v6  ;;  %v372_v20 = vld [vmem:[%s2747_s2 + $0x20] sm:$0xff]  ;;  %v313_v22 = vld [vmem:[%s2002_s17 + $0x10] sm:$0xff]  ;;  %v314_v23 = vld [vmem:[%s2002_s17 + $0x18] sm:$0xff]  ;;  %291 = vst.msk [vmem:[#allocation2 + $0x50] sm:$0x3] %vm285_vm1, %v1930_v29 }
  0x13   : > { %335 = vrot.lane.b32.xlu0 %v315_v9, %s1929_s23  ;;  %327 = vrot.lane.b32.xlu1 %v311_v10, %s1929_s23  ;;  %v2054_v24 = vld [vmem:[%s2051_s18 + $0x20] sm:$0xff]  ;;  %v1653_v26 = vld [vmem:[%s2747_s2 + $0x78] sm:$0xff]  ;;  %292 = vst.msk [vmem:[#allocation2 + $0x60] sm:$0x3] %vm285_vm1, %v1930_v29 }
  0x14   : > { %1851 = vmatpush.msra.mxu3 %v376_v7  ;;  %434 = vmatpush.msra.mxu0 %v1657_v8  ;;  %v2057_v25 = vld [vmem:[%s2051_s18] sm:$0xff]  ;;  %307 = vst.msk [vmem:[#allocation2 + $0x42] sm:$0xff] %vm302_vm0, %v2054_v24  ;;  %v371_v27 = vld [vmem:[%s2747_s2 + $0x18] sm:$0xff]  ;;  %v1652_v28 = vld [vmem:[%s2747_s2 + $0x70] sm:$0xff] }
  0x15   : > { %329 = vrot.lane.b32.xlu2 %v312_v13, %s1929_s23  ;;  %1840 = vmatpush.msra.mxu2 %v1657_v8  ;;  %303 = vst.msk [vmem:[#allocation2 + $0x2] sm:$0xff] %vm302_vm0, %v2057_v25  ;;  %v370_v30 = vld [vmem:[%s2747_s2 + $0x10] sm:$0xff]  ;;  %v1651_v31 = vld [vmem:[%s2747_s2 + $0x68] sm:$0xff]  ;;  %v1650_v33 = vld [vmem:[%s2747_s2 + $0x60] sm:$0xff] }
  0x16   : > { %1852 = vmatpush.msra.mxu3 %v375_v11  ;;  %435 = vmatpush.msra.mxu0 %v1656_v12  ;;  %v369_v32 = vld [vmem:[%s2747_s2 + $0x8] sm:$0xff]  ;;  %v368_v34 = vld [vmem:[%s2747_s2] sm:$0xff]  ;;  %v1689_v38 = vld [vmem:[%s2747_s2 + $0x118] sm:$0xff]  ;;  %293 = vst.msk [vmem:[#allocation2 + $0x70] sm:$0x3] %vm285_vm1, %v1930_v29 }
  0x17   : > { %1841 = vmatpush.msra.mxu2 %v1656_v12  ;;  %498 = vmatpush.msra.mxu1 %v376_v7  ;;  %v2102_v35 = vld [vmem:[%s2051_s18 + $0x28] sm:$0xff]  ;;  %v1709_v39 = vld [vmem:[%s2747_s2 + $0x178] sm:$0xff]  ;;  %v1688_v40 = vld [vmem:[%s2747_s2 + $0x110] sm:$0xff]  ;;  %294 = vst.msk [vmem:[#allocation2 + $0xa] sm:$0x3] %vm285_vm1, %v1930_v29 }
  0x18   : > { %1853 = vmatpush.msra.mxu3 %v374_v14  ;;  %436 = vmatpush.msra.mxu0 %v1655_v15  ;;  %v2105_v36 = vld [vmem:[%s2051_s18 + $0x8] sm:$0xff]  ;;  %308 = vst.msk [vmem:[#allocation2 + $0x52] sm:$0xff] %vm302_vm0, %v2102_v35  ;;  %v1708_v41 = vld [vmem:[%s2747_s2 + $0x170] sm:$0xff]  ;;  %v1686_v45 = vld [vmem:[%s2747_s2 + $0x100] sm:$0xff] }
  0x19   : > { %1842 = vmatpush.msra.mxu2 %v1655_v15  ;;  %499 = vmatpush.msra.mxu1 %v375_v11  ;;  %304 = vst.msk [vmem:[#allocation2 + $0x12] sm:$0xff] %vm302_vm0, %v2105_v36  ;;  %v1687_v42 = vld [vmem:[%s2747_s2 + $0x108] sm:$0xff]  ;;  %v2142_v43 = vld [vmem:[%s2051_s18 + $0x10] sm:$0xff]  ;;  %v1729_v47 = vld [vmem:[%s2747_s2 + $0x1d8] sm:$0xff] }
  0x1a   : > { %1854 = vmatpush.msra.mxu3 %v373_v16  ;;  %437 = vmatpush.msra.mxu0 %v1654_v17  ;;  %295 = vst.msk [vmem:[#allocation2 + $0x1a] sm:$0x3] %vm285_vm1, %v1930_v29  ;;  %v2151_v44 = vld [vmem:[%s2051_s18 + $0x30] sm:$0xff]  ;;  %v1707_v46 = vld [vmem:[%s2747_s2 + $0x168] sm:$0xff]  ;;  %v1706_v48 = vld [vmem:[%s2747_s2 + $0x160] sm:$0xff] }
  0x1b   : > { %337 = vrot.lane.b32.xlu0 %v316_v18, %s1929_s23  ;;  %339 = vrot.lane.b32.xlu1 %v317_v19, %s1929_s23  ;;  %296 = vst.msk [vmem:[#allocation2 + $0x2a] sm:$0x3] %vm285_vm1, %v1930_v29  ;;  %v1685_v49 = vld [vmem:[%s2747_s2 + $0xf8] sm:$0xff]  ;;  %v1728_v50 = vld [vmem:[%s2747_s2 + $0x1d0] sm:$0xff] }
  0x1c   : > { %1843 = vmatpush.msra.mxu2 %v1654_v17  ;;  %1855 = vmatpush.msra.mxu3 %v372_v20  ;;  %297 = vst.msk [vmem:[#allocation2 + $0x3a] sm:$0x3] %vm285_vm1, %v1930_v29  ;;  %v1705_v51 = vld [vmem:[%s2747_s2 + $0x158] sm:$0xff]  ;;  %v1727_v52 = vld [vmem:[%s2747_s2 + $0x1c8] sm:$0xff]  ;;  %v1684_v53 = vld [vmem:[%s2747_s2 + $0xf0] sm:$0xff] }
  0x1d   : > { %341 = vrot.lane.b32.xlu2 %v318_v21, %s1929_s23  ;;  %500 = vmatpush.msra.mxu1 %v374_v14  ;;  %298 = vst.msk [vmem:[#allocation2 + $0x4a] sm:$0x3] %vm285_vm1, %v1930_v29  ;;  %v2189_v55 = vld [vmem:[%s2051_s18 + $0x38] sm:$0xff]  ;;  %v1726_v57 = vld [vmem:[%s2747_s2 + $0x1c0] sm:$0xff]  ;;  %v1683_v58 = vld [vmem:[%s2747_s2 + $0xe8] sm:$0xff] }
  0x1e   : > { %438 = vmatpush.msra.mxu0 %v1653_v26  ;;  %1844 = vmatpush.msra.mxu2 %v1653_v26  ;;  %299 = vst.msk [vmem:[#allocation2 + $0x5a] sm:$0x3] %vm285_vm1, %v1930_v29  ;;  %v2194_v56 = vld [vmem:[%s2051_s18 + $0x18] sm:$0xff]  ;;  %v1704_v59 = vld [vmem:[%s2747_s2 + $0x150] sm:$0xff]  ;;  %v1703_v61 = vld [vmem:[%s2747_s2 + $0x148] sm:$0xff] }
  0x1f   : > { %501 = vmatpush.msra.mxu1 %v373_v16  ;;  %1856 = vmatpush.msra.mxu3 %v371_v27  ;;  %300 = vst.msk [vmem:[#allocation2 + $0x6a] sm:$0x3] %vm285_vm1, %v1930_v29  ;;  %v1725_v60 = vld [vmem:[%s2747_s2 + $0x1b8] sm:$0xff]  ;;  %v1682_v62 = vld [vmem:[%s2747_s2 + $0xe0] sm:$0xff]  ;;  %v1724_v63 = vld [vmem:[%s2747_s2 + $0x1b0] sm:$0xff] }
  0x20   : > { %439 = vmatpush.msra.mxu0 %v1652_v28  ;;  %1845 = vmatpush.msra.mxu2 %v1652_v28  ;;  %301 = vst.msk [vmem:[#allocation2 + $0x7a] sm:$0x3] %vm285_vm1, %v1930_v29  ;;  %v1702_v0 = vld [vmem:[%s2747_s2 + $0x140] sm:$0xff]  ;;  %v1681_v1 = vld [vmem:[%s2747_s2 + $0xd8] sm:$0xff]  ;;  %v1723_v2 = vld [vmem:[%s2747_s2 + $0x1a8] sm:$0xff] }
  0x21   : > { %502 = vmatpush.msra.mxu1 %v372_v20  ;;  %1857 = vmatpush.msra.mxu3 %v370_v30  ;;  %305 = vst.msk [vmem:[#allocation2 + $0x22] sm:$0xff] %vm302_vm0, %v2142_v43  ;;  %v1722_v3 = vld [vmem:[%s2747_s2 + $0x1a0] sm:$0xff]  ;;  %v1680_v6 = vld [vmem:[%s2747_s2 + $0xd0] sm:$0xff]  ;;  %v1701_v7 = vld [vmem:[%s2747_s2 + $0x138] sm:$0xff] }
  0x22   : > { %440 = vmatpush.msra.mxu0 %v1651_v31  ;;  %1846 = vmatpush.msra.mxu2 %v1651_v31  ;;  %309 = vst.msk [vmem:[#allocation2 + $0x62] sm:$0xff] %vm302_vm0, %v2151_v44  ;;  %v1721_v8 = vld [vmem:[%s2747_s2 + $0x198] sm:$0xff]  ;;  %v1700_v9 = vld [vmem:[%s2747_s2 + $0x130] sm:$0xff]  ;;  %v1679_v10 = vld [vmem:[%s2747_s2 + $0xc8] sm:$0xff] }
  0x23   : > { %331 = vrot.lane.b32.xlu0 %v313_v22, %s1929_s23  ;;  %333 = vrot.lane.b32.xlu1 %v314_v23, %s1929_s23  ;;  %310 = vst.msk [vmem:[#allocation2 + $0x72] sm:$0xff] %vm302_vm0, %v2189_v55  ;;  %v1720_v11 = vld [vmem:[%s2747_s2 + $0x190] sm:$0xff]  ;;  %v1699_v12 = vld [vmem:[%s2747_s2 + $0x128] sm:$0xff] }
  0x24   : > { %503 = vmatpush.msra.mxu1 %v371_v27  ;;  %1858 = vmatpush.msra.mxu3 %v369_v32  ;;  %306 = vst.msk [vmem:[#allocation2 + $0x32] sm:$0xff] %vm302_vm0, %v2194_v56  ;;  %v1678_v13 = vld [vmem:[%s2747_s2 + $0xc0] sm:$0xff]  ;;  %v1719_v14 = vld [vmem:[%s2747_s2 + $0x188] sm:$0xff] }
  0x25   : > { %986 = vrot.lane.b32.xlu2 %v2057_v25, %s1929_s23  ;;  %441 = vmatpush.msra.mxu0 %v1650_v33  ;;  %v1698_v15 = vld [vmem:[%s2747_s2 + $0x120] sm:$0xff] }
  0x26   : > { %504 = vmatpush.msra.mxu1 %v370_v30  ;;  %1847 = vmatpush.msra.mxu2 %v1650_v33  ;;  %v1718_v20 = vld [vmem:[%s2747_s2 + $0x180] sm:$0xff] }
  0x27   : > { %1859 = vmatpush.msra.mxu3 %v368_v34  ;;  %769 = vmatpush.msrb.mxu0 %v1729_v47 }
  0x28   : > { %505 = vmatpush.msra.mxu1 %v369_v32  ;;  %581 = vmatpush.msrb.mxu2 %v1689_v38 }
  0x29   : > { %675 = vmatpush.msrb.mxu3 %v1709_v39  ;;  %770 = vmatpush.msrb.mxu0 %v1728_v50 }
  0x2a   : > { %506 = vmatpush.msra.mxu1 %v368_v34  ;;  %582 = vmatpush.msrb.mxu2 %v1688_v40 }
  0x2b   : > { %988 = vrot.lane.b32.xlu0 %v2105_v36, %s1929_s23  ;;  %676 = vmatpush.msrb.mxu3 %v1708_v41 }
  0x2c   : > { %583 = vmatpush.msrb.mxu2 %v1687_v42  ;;  %990 = vrot.lane.b32.xlu1 %v2142_v43, %s1929_s23 }
  0x2d   : > { %677 = vmatpush.msrb.mxu3 %v1707_v46  ;;  %771 = vmatpush.msrb.mxu0 %v1727_v52 }
  0x2e   : > { %584 = vmatpush.msrb.mxu2 %v1686_v45  ;;  %992 = vrot.lane.b32.xlu2 %v2194_v56, %s1929_s23 }
  0x2f   : > { %678 = vmatpush.msrb.mxu3 %v1706_v48  ;;  %772 = vmatpush.msrb.mxu0 %v1726_v57 }
  0x30   : > { %585 = vmatpush.msrb.mxu2 %v1685_v49 }
  0x31   : > { %679 = vmatpush.msrb.mxu3 %v1705_v51  ;;  %773 = vmatpush.msrb.mxu0 %v1725_v60 }
  0x32   : > { %586 = vmatpush.msrb.mxu2 %v1684_v53 }
  0x33   : > { %994 = vrot.lane.b32.xlu0 %v2054_v24, %s1929_s23  ;;  %680 = vmatpush.msrb.mxu3 %v1704_v59 }
  0x34   : > { %996 = vrot.lane.b32.xlu1 %v2102_v35, %s1929_s23  ;;  %587 = vmatpush.msrb.mxu2 %v1683_v58 }
  0x35   : > { %681 = vmatpush.msrb.mxu3 %v1703_v61  ;;  %774 = vmatpush.msrb.mxu0 %v1724_v63 }
  0x36   : > { %588 = vmatpush.msrb.mxu2 %v1682_v62 }
  0x37   : > { %682 = vmatpush.msrb.mxu3 %v1702_v0  ;;  %775 = vmatpush.msrb.mxu0 %v1723_v2 }
  0x38   : > { %589 = vmatpush.msrb.mxu2 %v1681_v1 }
  0x39   : > { %776 = vmatpush.msrb.mxu0 %v1722_v3  ;;  %683 = vmatpush.msrb.mxu3 %v1701_v7 }
  0x3a   : > { %590 = vmatpush.msrb.mxu2 %v1680_v6 }
  0x3b   : > { %998 = vrot.lane.b32.xlu0 %v2151_v44, %s1929_s23  ;;  %777 = vmatpush.msrb.mxu0 %v1721_v8 }
  0x3c   : > { %684 = vmatpush.msrb.mxu3 %v1700_v9  ;;  %591 = vmatpush.msrb.mxu2 %v1679_v10 }
  0x3d   : > { %778 = vmatpush.msrb.mxu0 %v1720_v11 }
  0x3e   : > { %685 = vmatpush.msrb.mxu3 %v1699_v12  ;;  %592 = vmatpush.msrb.mxu2 %v1678_v13 }
  0x3f   : > { %779 = vmatpush.msrb.mxu0 %v1719_v14 }
  0x40   : > { %686 = vmatpush.msrb.mxu3 %v1698_v15 }
  0x41   : > { %780 = vmatpush.msrb.mxu0 %v1718_v20 }
  0x6f   : > { %v330_v37 = vpop.permute.xlu2 %329 }
  0x70   : > { %353 = vst.msk [vmem:[#allocation2 + $0x12] sm:$0xff] %vm351_vm2, %v330_v37 }
  0x77   : > { %v342_v54 = vpop.permute.xlu2 %341  ;;  %v381_v23 = vld [vmem:[#allocation2 + $0x11] sm:$0xff] }
  0x78   : > { %359 = vst.msk [vmem:[#allocation2 + $0x72] sm:$0xff] %vm351_vm2, %v342_v54  ;;  %v361_v26 = vld [vmem:[#allocation2 + $0x10] sm:$0xff] }
  0x79   : > { %v533_v46 = vld [vmem:[#allocation2 + $0x12] sm:$0xff] }
  0x7a   : > { %v627_v47 = vld [vmem:[#allocation2 + $0x13] sm:$0xff] }
  0x7b   : > { %v721_v48 = vld [vmem:[#allocation2 + $0x14] sm:$0xff] }
  0x7f   : > { %v387_v37 = vld [vmem:[#allocation2 + $0x71] sm:$0xff] }
  0x80   : > { %v367_v38 = vld [vmem:[#allocation2 + $0x70] sm:$0xff] }
  0x81   : > { %v539_v2 = vld [vmem:[#allocation2 + $0x72] sm:$0xff] }
  0x82   : > { %v633_v3 = vld [vmem:[#allocation2 + $0x73] sm:$0xff] }
  0x85   : > { %v336_v4 = vpop.permute.xlu0 %335  ;;  %v328_v5 = vpop.permute.xlu1 %327 }
  0x86   : > { %356 = vst.msk [vmem:[#allocation2 + $0x42] sm:$0xff] %vm351_vm2, %v336_v4  ;;  %v727_v4 = vld [vmem:[#allocation2 + $0x74] sm:$0xff] }
  0x87   : > { %352 = vst.msk [vmem:[#allocation2 + $0x2] sm:$0xff] %vm351_vm2, %v328_v5 }
  0x8d   : > { %v338_v16 = vpop.permute.xlu0 %337  ;;  %v384_v17 = vld [vmem:[#allocation2 + $0x41] sm:$0xff]  ;;  %v340_v19 = vpop.permute.xlu1 %339 }
  0x8e   : > { %v364_v18 = vld [vmem:[#allocation2 + $0x40] sm:$0xff]  ;;  %357 = vst.msk [vmem:[#allocation2 + $0x52] sm:$0xff] %vm351_vm2, %v338_v16  ;;  %1666 = vmatmul.msk.f32.vlgmr.msra.gmra.mxu2 %vm401_vm3, %v384_v17 }
  0x8f   : > { %v380_v21 = vld [vmem:[#allocation2 + $0x1] sm:$0xff]  ;;  %1674 = vmatmul.msk.f32.vlgmr.msra.gmra.mxu3 %vm401_vm3, %v364_v18  ;;  %358 = vst.msk [vmem:[#allocation2 + $0x62] sm:$0xff] %vm351_vm2, %v340_v19 }
  0x90   : > { %v360_v22 = vld [vmem:[#allocation2] sm:$0xff]  ;;  %1662 = vmatmul.msk.f32.vlgmr.msra.gmra.mxu0 %vm401_vm3, %v380_v21 }
  0x91   : > { %1670 = vmatmul.msk.f32.vlgmr.msra.gmra.mxu1 %vm401_vm3, %v360_v22  ;;  %v532_v41 = vld [vmem:[#allocation2 + $0x2] sm:$0xff] }
  0x92   : > { %v626_v42 = vld [vmem:[#allocation2 + $0x3] sm:$0xff] }
  0x93   : > { %v720_v45 = vld [vmem:[#allocation2 + $0x4] sm:$0xff] }
  0x94   : > { %v536_v57 = vld [vmem:[#allocation2 + $0x42] sm:$0xff] }
  0x95   : > { %v332_v27 = vpop.permute.xlu0 %331  ;;  %v385_v28 = vld [vmem:[#allocation2 + $0x51] sm:$0xff]  ;;  %v334_v30 = vpop.permute.xlu1 %333  ;;  %v630_v58 = vld [vmem:[#allocation2 + $0x43] sm:$0xff] }
  0x96   : > { %v365_v29 = vld [vmem:[#allocation2 + $0x50] sm:$0xff]  ;;  %354 = vst.msk [vmem:[#allocation2 + $0x22] sm:$0xff] %vm351_vm2, %v332_v27  ;;  %1667 = vmatmul.msk.f32.gmra.mxu2 %vm401_vm3, %v385_v28  ;;  %v386_v31 = vld [vmem:[#allocation2 + $0x61] sm:$0xff]  ;;  %v2336_v28 = vld [vmem:[%s2749_s4] ss:$0 sm:$0xff] }
  0x97   : > { %1675 = vmatmul.msk.f32.gmra.mxu3 %vm401_vm3, %v365_v29  ;;  %355 = vst.msk [vmem:[#allocation2 + $0x32] sm:$0xff] %vm351_vm2, %v334_v30  ;;  %v366_v32 = vld [vmem:[#allocation2 + $0x60] sm:$0xff]  ;;  %v537_v60 = vld [vmem:[#allocation2 + $0x52] sm:$0xff] }
  0x98   : > { %1663 = vmatmul.msk.f32.gmra.mxu0 %vm401_vm3, %v381_v23  ;;  %v724_v59 = vld [vmem:[#allocation2 + $0x44] sm:$0xff]  ;;  %v631_v61 = vld [vmem:[#allocation2 + $0x53] sm:$0xff] }
  0x99   : > { %1671 = vmatmul.msk.f32.gmra.mxu1 %vm401_vm3, %v361_v26  ;;  %v725_v62 = vld [vmem:[#allocation2 + $0x54] sm:$0xff]  ;;  %v538_v63 = vld [vmem:[#allocation2 + $0x62] sm:$0xff] }
  0x9a   : > { %v632_v0 = vld [vmem:[#allocation2 + $0x63] sm:$0xff] }
  0x9b   : > { %v726_v1 = vld [vmem:[#allocation2 + $0x64] sm:$0xff] }
  0x9d   : > { %v382_v33 = vld [vmem:[#allocation2 + $0x21] sm:$0xff] }
  0x9e   : > { %v362_v34 = vld [vmem:[#allocation2 + $0x20] sm:$0xff]  ;;  %1668 = vmatmul.msk.f32.gmra.mxu2 %vm401_vm3, %v386_v31  ;;  %v383_v39 = vld [vmem:[#allocation2 + $0x31] sm:$0xff] }
  0x9f   : > { %1676 = vmatmul.msk.f32.gmra.mxu3 %vm401_vm3, %v366_v32  ;;  %v363_v40 = vld [vmem:[#allocation2 + $0x30] sm:$0xff]  ;;  %v534_v49 = vld [vmem:[#allocation2 + $0x22] sm:$0xff] }
  0xa0   : > { %1664 = vmatmul.msk.f32.gmra.mxu0 %vm401_vm3, %v382_v33  ;;  %v628_v50 = vld [vmem:[#allocation2 + $0x23] sm:$0xff]  ;;  %v535_v52 = vld [vmem:[#allocation2 + $0x32] sm:$0xff] }
  0xa1   : > { %1672 = vmatmul.msk.f32.gmra.mxu1 %vm401_vm3, %v362_v34  ;;  %v722_v51 = vld [vmem:[#allocation2 + $0x24] sm:$0xff]  ;;  %v629_v53 = vld [vmem:[#allocation2 + $0x33] sm:$0xff] }
  0xa2   : > { %v723_v54 = vld [vmem:[#allocation2 + $0x34] sm:$0xff] }
  0xa6   : > { %1669 = vmatmul.msk.f32.gmra.mxu2 %vm401_vm3, %v387_v37 }
  0xa7   : > { %1677 = vmatmul.msk.f32.gmra.mxu3 %vm401_vm3, %v367_v38 }
  0xa8   : > { %1665 = vmatmul.msk.f32.gmra.mxu0 %vm401_vm3, %v383_v39 }
  0xa9   : > { %1673 = vmatmul.msk.f32.gmra.mxu1 %vm401_vm3, %v363_v40 }
  0xae   : > { %1690 = vmatmul.msk.f32.vlgmr.msrb.gmra.mxu2 %vm401_vm3, %v532_v41 }
  0xaf   : > { %1710 = vmatmul.msk.f32.vlgmr.msrb.gmra.mxu3 %vm401_vm3, %v626_v42 }
  0xb0   : > { %1730 = vmatmul.msk.f32.vlgmr.msrb.gmra.mxu0 %vm401_vm3, %v720_v45 }
  0xb6   : > { %1691 = vmatmul.msk.f32.gmra.mxu2 %vm401_vm3, %v533_v46 }
  0xb7   : > { %1711 = vmatmul.msk.f32.gmra.mxu3 %vm401_vm3, %v627_v47 }
  0xb8   : > { %1731 = vmatmul.msk.f32.gmra.mxu0 %vm401_vm3, %v721_v48 }
  0xbe   : > { %1692 = vmatmul.msk.f32.gmra.mxu2 %vm401_vm3, %v534_v49 }
  0xbf   : > { %1712 = vmatmul.msk.f32.gmra.mxu3 %vm401_vm3, %v628_v50 }
  0xc0   : > { %1732 = vmatmul.msk.f32.gmra.mxu0 %vm401_vm3, %v722_v51 }
  0xc6   : > { %1693 = vmatmul.msk.f32.gmra.mxu2 %vm401_vm3, %v535_v52 }
  0xc7   : > { %1713 = vmatmul.msk.f32.gmra.mxu3 %vm401_vm3, %v629_v53 }
  0xc8   : > { %1733 = vmatmul.msk.f32.gmra.mxu0 %vm401_vm3, %v723_v54 }
  0xce   : > { %1694 = vmatmul.msk.f32.gmra.mxu2 %vm401_vm3, %v536_v57 }
  0xcf   : > { %1714 = vmatmul.msk.f32.gmra.mxu3 %vm401_vm3, %v630_v58 }
  0xd0   : > { %1734 = vmatmul.msk.f32.gmra.mxu0 %vm401_vm3, %v724_v59 }
  0xd6   : > { %1695 = vmatmul.msk.f32.gmra.mxu2 %vm401_vm3, %v537_v60 }
  0xd7   : > { %1715 = vmatmul.msk.f32.gmra.mxu3 %vm401_vm3, %v631_v61 }
  0xd8   : > { %1735 = vmatmul.msk.f32.gmra.mxu0 %vm401_vm3, %v725_v62 }
  0xde   : > { %1696 = vmatmul.msk.f32.gmra.mxu2 %vm401_vm3, %v538_v63 }
  0xdf   : > { %1716 = vmatmul.msk.f32.gmra.mxu3 %vm401_vm3, %v632_v0 }
  0xe0   : > { %1736 = vmatmul.msk.f32.gmra.mxu0 %vm401_vm3, %v726_v1 }
  0xe6   : > { %1697 = vmatmul.msk.f32.gmra.mxu2 %vm401_vm3, %v539_v2 }
  0xe7   : > { %1717 = vmatmul.msk.f32.gmra.mxu3 %vm401_vm3, %v633_v3 }
  0xe8   : > { %1737 = vmatmul.msk.f32.gmra.mxu0 %vm401_vm3, %v727_v4 }
 0x10d   : > { %v443_v5 = vpop.f32.mrf.mxu0 }
 0x10e   : > { %v508_v15 = vpop.f32.mrf.mxu1 }
 0x10f   : > { %v509_v20 = vadd.f32 %v508_v15, %v443_v5 }
 0x111   : > { %v2319_v6 = vpop.f32.mrf.mxu2 }
 0x112   : > { %v2321_v7 = vpop.f32.mrf.mxu3 }
 0x115   : > { %v446_v8 = vpop.f32.mrf.mxu0 }
 0x116   : > { %v511_v26 = vpop.f32.mrf.mxu1 }
 0x117   : > { %v512_v31 = vadd.f32 %v511_v26, %v446_v8 }
 0x119   : > { %v2323_v9 = vpop.f32.mrf.mxu2 }
 0x11a   : > { %v2325_v10 = vpop.f32.mrf.mxu3 }
 0x11d   : > { %v449_v11 = vpop.f32.mrf.mxu0 }
 0x11e   : > { %v514_v39 = vpop.f32.mrf.mxu1 }
 0x11f   : > { %v515_v45 = vadd.f32 %v514_v39, %v449_v11 }
 0x121   : > { %v2327_v12 = vpop.f32.mrf.mxu2 }
 0x122   : > { %v2329_v13 = vpop.f32.mrf.mxu3 }
 0x125   : > { %v452_v14 = vpop.f32.mrf.mxu0 }
 0x126   : > { %v517_v57 = vpop.f32.mrf.mxu1 }
 0x127   : > { %v518_v59 = vadd.f32 %v517_v57, %v452_v14  ;;  %v521_v14 = vadd.f32 %v2321_v7, %v2319_v6 }
 0x129   : > { %v464_v16 = vpop.f32.mrf.mxu2 }
 0x12a   : > { %v529_v17 = vpop.f32.mrf.mxu3 }
 0x12b   : > { %v2331_v18 = vadd.f32 %v529_v17, %v464_v16 }
 0x12d   : > { %v782_v19 = vpop.f32.mrf.mxu0 }
 0x131   : > { %v594_v21 = vpop.f32.mrf.mxu2 }
 0x132   : > { %v688_v22 = vpop.f32.mrf.mxu3  ;;  %v618_v23 = vadd.f32 %v594_v21, %v509_v20 }
 0x134   : > { %v712_v27 = vadd.f32 %v688_v22, %v618_v23 }
 0x135   : > { %v785_v29 = vpop.f32.mrf.mxu0 }
 0x136   : > { %v806_v30 = vadd.f32 %v782_v19, %v712_v27 }
 0x138   : > { %v818_v32 = vadd.f32 %v2336_v28, %v806_v30 }
 0x139   : > { %v597_v33 = vpop.f32.mrf.mxu2 }
 0x13a   : > { %v691_v34 = vpop.f32.mrf.mxu3  ;;  %v1738_v37 = vmul.f32 -1.442695, %v818_v32  ;;  %v619_v38 = vadd.f32 %v597_v33, %v512_v31  ;;  %v987_v32 = vpop.permute.xlu2 %986 }
 0x13c   : > { %1873 = vpow2.f32 %v1738_v37  ;;  %v713_v40 = vadd.f32 %v691_v34, %v619_v38 }
 0x13d   : > { %v788_v41 = vpop.f32.mrf.mxu0 }
 0x13e   : > { %v807_v42 = vadd.f32 %v785_v29, %v713_v40 }
 0x140   : > { %v819_v46 = vadd.f32 %v2336_v28, %v807_v42 }
 0x141   : > { %v600_v47 = vpop.f32.mrf.mxu2 }
 0x142   : > { %v694_v48 = vpop.f32.mrf.mxu3  ;;  %v1874_v49 = vpop.eup %1873  ;;  %v1739_v50 = vmul.f32 -1.442695, %v819_v46  ;;  %v620_v51 = vadd.f32 %v600_v47, %v515_v45  ;;  %v524_v45 = vadd.f32 %v2325_v10, %v2323_v9 }
 0x143   : > { %v850_v52 = vadd.f32 1.0, %v1874_v49 }
 0x144   : > { %1875 = vpow2.f32 %v1739_v50  ;;  %v714_v53 = vadd.f32 %v694_v48, %v620_v51 }
 0x145   : > { %v791_v54 = vpop.f32.mrf.mxu0  ;;  %1877 = vrcp.f32 %v850_v52  ;;  %v867_v16 = vand.u32 2147483647, %v850_v52  ;;  %v869_v17 = vand.u32 2147483648, %v850_v52  ;;  %vm863_vm5 = vweird.f32 %v850_v52 }
 0x146   : > { %v808_v58 = vadd.f32 %v788_v41, %v714_v53 }
 0x147   : > { %vm868_vm7 = vcmp.eq.f32.partialorder %v867_v16, 8.507059e+37  ;;  %v870_v33 = vor.u32 1.1754944e-38, %v869_v17 }
 0x148   : > { %v820_v60 = vadd.f32 %v2336_v28, %v808_v58 }
 0x149   : > { %v603_v61 = vpop.f32.mrf.mxu2 }
 0x14a   : > { %v697_v62 = vpop.f32.mrf.mxu3  ;;  %v1876_v63 = vpop.eup %1875  ;;  %v1740_v0 = vmul.f32 -1.442695, %v820_v60  ;;  %v621_v1 = vadd.f32 %v603_v61, %v518_v59 }
 0x14b   : > { %v1878_v2 = vpop.eup %1877  ;;  %v851_v3 = vadd.f32 1.0, %v1876_v63  ;;  %v989_v59 = vpop.permute.xlu0 %988 }
 0x14c   : > { %1879 = vpow2.f32 %v1740_v0  ;;  %v715_v4 = vadd.f32 %v697_v62, %v621_v1  ;;  %v859_v5 = vmul.f32 %v1878_v2, %v850_v52  ;;  %vm864_vm4 = vweird.f32 %v1878_v2 }
 0x14d   : > { %1881 = vrcp.f32 %v851_v3  ;;  %v794_v11 = vpop.f32.mrf.mxu0  ;;  %vm865_vm6 = vmor %vm863_vm5, %vm864_vm4  ;;  %v882_v41 = vand.u32 2147483647, %v851_v3  ;;  %v884_v42 = vand.u32 2147483648, %v851_v3  ;;  %vm878_vm9 = vweird.f32 %v851_v3 }
 0x14e   : > { %v809_v8 = vadd.f32 %v791_v54, %v715_v4  ;;  %v860_v15 = vsub.f32 1.0, %v859_v5  ;;  %v527_v4 = vadd.f32 %v2329_v13, %v2327_v12 }
 0x14f   : > { %vm883_vm11 = vcmp.eq.f32.partialorder %v882_v41, 8.507059e+37  ;;  %v885_v9 = vor.u32 1.1754944e-38, %v884_v42  ;;  %v1785_v41 = vld [vmem:[%s2748_s3 + $0x118] sm:$0xff] }
 0x150   : > { %v821_v19 = vadd.f32 %v2336_v28, %v809_v8  ;;  %v861_v20 = vmul.f32 %v1878_v2, %v860_v15  ;;  %1278 = vmatpush.msra.mxu3 %v1785_v41  ;;  %v1779_v41 = vld [vmem:[%s2748_s3 + $0xe8] sm:$0xff] }
 0x151   : > { %v606_v21 = vpop.f32.mrf.mxu2 }
 0x152   : > { %v700_v22 = vpop.f32.mrf.mxu3  ;;  %v1880_v23 = vpop.eup %1879  ;;  %v1741_v26 = vmul.f32 -1.442695, %v821_v19  ;;  %v622_v27 = vadd.f32 %v606_v21, %v521_v14  ;;  %v862_v29 = vadd.f32 %v1878_v2, %v861_v20 }
 0x153   : > { %v1882_v30 = vpop.eup %1881  ;;  %v2344_v31 = vadd.f32 1.0, %v1880_v23  ;;  %v991_v21 = vpop.permute.xlu1 %990 }
 0x154   : > { %1883 = vpow2.f32 %v1741_v26  ;;  %v716_v6 = vadd.f32 %v700_v22, %v622_v27  ;;  %v866_v7 = vsel %vm865_vm6, %v1878_v2, %v862_v29  ;;  %v874_v34 = vmul.f32 %v1882_v30, %v851_v3 }
 0x155   : > { %1885 = vrcp.f32 %v2344_v31  ;;  %v2347_v37 = vsel %vm868_vm7, %v870_v33, %v866_v7  ;;  %v797_v47 = vpop.f32.mrf.mxu0  ;;  %vm879_vm8 = vweird.f32 %v1882_v30  ;;  %v897_v2 = vand.u32 2147483647, %v2344_v31 }
 0x156   : > { %v810_v38 = vadd.f32 %v794_v11, %v716_v6  ;;  %v1010_v39 = vmul.f32 %v987_v32, %v2347_v37  ;;  %v875_v40 = vsub.f32 1.0, %v874_v34  ;;  %vm880_vm10 = vmor %vm878_vm9, %vm879_vm8  ;;  %v899_v3 = vand.u32 2147483648, %v2344_v31 }
 0x157   : > { %vm893_vm13 = vweird.f32 %v2344_v31  ;;  %vm898_vm15 = vcmp.eq.f32.partialorder %v897_v2, 8.507059e+37 }
 0x158   : > { %v822_v46 = vadd.f32 %v2336_v28, %v810_v38  ;;  %1026 = vrot.lane.b32.xlu2 %v1010_v39, %s1931_s27  ;;  %v876_v48 = vmul.f32 %v1882_v30, %v875_v40  ;;  %v900_v22 = vor.u32 1.1754944e-38, %v899_v3  ;;  %v1757_v39 = vld [vmem:[%s2748_s3 + $0xb8] sm:$0xff]  ;;  %v1754_v3 = vld [vmem:[%s2748_s3 + $0xa0] sm:$0xff] }
 0x159   : > { %v609_v49 = vpop.f32.mrf.mxu2  ;;  %v1077_v40 = vld [vmem:[%s2748_s3 + $0x58] sm:$0xff]  ;;  %1127 = vmatpush.msrb.mxu1 %v1757_v39  ;;  %v995_v39 = vpop.permute.xlu0 %994 }
 0x15a   : > { %v703_v50 = vpop.f32.mrf.mxu3  ;;  %v1884_v51 = vpop.eup %1883  ;;  %v1742_v52 = vmul.f32 -1.442695, %v822_v46  ;;  %v623_v53 = vadd.f32 %v609_v49, %v524_v45  ;;  %v877_v54 = vadd.f32 %v1882_v30, %v876_v48  ;;  %1192 = vmatpush.msra.mxu2 %v1077_v40  ;;  %v1805_v45 = vld [vmem:[%s2748_s3 + $0x178] sm:$0xff]  ;;  %v1756_v46 = vld [vmem:[%s2748_s3 + $0xb0] sm:$0xff] }
 0x15b   : > { %v1886_v57 = vpop.eup %1885  ;;  %v2354_v58 = vadd.f32 1.0, %v1884_v51  ;;  %1372 = vmatpush.msra.mxu0 %v1805_v45  ;;  %1128 = vmatpush.msrb.mxu1 %v1756_v46  ;;  %v1799_v46 = vld [vmem:[%s2748_s3 + $0x148] sm:$0xff] }
 0x15c   : > { %1887 = vpow2.f32 %v1742_v52  ;;  %v717_v10 = vadd.f32 %v703_v50, %v623_v53  ;;  %v881_v60 = vsel %vm880_vm10, %v1882_v30, %v877_v54  ;;  %v889_v61 = vmul.f32 %v1886_v57, %v2344_v31  ;;  %v1784_v52 = vld [vmem:[%s2748_s3 + $0x110] sm:$0xff]  ;;  %v1755_v54 = vld [vmem:[%s2748_s3 + $0xa8] sm:$0xff] }
 0x15d   : > { %1889 = vrcp.f32 %v2354_v58  ;;  %v2358_v62 = vsel %vm883_vm11, %v885_v9, %v881_v60  ;;  %vm894_vm12 = vweird.f32 %v1886_v57  ;;  %v800_v13 = vpop.f32.mrf.mxu0  ;;  %vm908_vm2 = vweird.f32 %v2354_v58  ;;  %v1804_v53 = vld [vmem:[%s2748_s3 + $0x170] sm:$0xff]  ;;  %v1075_v60 = vld [vmem:[%s2748_s3 + $0x48] sm:$0xff]  ;;  %1279 = vmatpush.msra.mxu3 %v1784_v52  ;;  %1129 = vmatpush.msrb.mxu1 %v1755_v54  ;;  %v1778_v52 = vld [vmem:[%s2748_s3 + $0xe0] sm:$0xff] }
 0x15e   : > { %v811_v63 = vadd.f32 %v797_v47, %v717_v10  ;;  %v1011_v0 = vmul.f32 %v989_v59, %v2358_v62  ;;  %v890_v1 = vsub.f32 1.0, %v889_v61  ;;  %vm895_vm14 = vmor %vm893_vm13, %vm894_vm12  ;;  %v912_v6 = vand.u32 2147483647, %v2354_v58  ;;  %v1076_v47 = vld [vmem:[%s2748_s3 + $0x50] sm:$0xff]  ;;  %v993_v59 = vpop.permute.xlu2 %992  ;;  %v1783_v61 = vld [vmem:[%s2748_s3 + $0x108] sm:$0xff]  ;;  %1373 = vmatpush.msra.mxu0 %v1804_v53 }
 0x15f   : > { %v914_v7 = vand.u32 2147483648, %v2354_v58  ;;  %1193 = vmatpush.msra.mxu2 %v1076_v47  ;;  %1280 = vmatpush.msra.mxu3 %v1783_v61  ;;  %v1750_v47 = vld [vmem:[%s2748_s3 + $0x80] sm:$0xff] }
 0x160   : > { %v823_v5 = vadd.f32 %v2336_v28, %v811_v63  ;;  %1028 = vrot.lane.b32.xlu1 %v1011_v0, %s1931_s27  ;;  %1000 = vrot.lane.b32.xlu2 %v2189_v55, %s1929_s23  ;;  %v891_v8 = vmul.f32 %v1886_v57, %v890_v1  ;;  %vm2424_vm5 = vcmp.eq.f32.partialorder %v912_v6, 8.507059e+37  ;;  %v1803_v63 = vld [vmem:[%s2748_s3 + $0x168] sm:$0xff]  ;;  %v1800_v6 = vld [vmem:[%s2748_s3 + $0x150] sm:$0xff] }
 0x161   : > { %v612_v11 = vpop.f32.mrf.mxu2  ;;  %v915_v10 = vor.u32 1.1754944e-38, %v914_v7  ;;  %1194 = vmatpush.msra.mxu2 %v1075_v60  ;;  %1374 = vmatpush.msra.mxu0 %v1803_v63  ;;  %v1751_v7 = vld [vmem:[%s2748_s3 + $0x88] sm:$0xff]  ;;  %v1798_v53 = vld [vmem:[%s2748_s3 + $0x140] sm:$0xff] }
 0x162   : > { %v706_v15 = vpop.f32.mrf.mxu3  ;;  %v1888_v16 = vpop.eup %1887  ;;  %v1743_v17 = vmul.f32 -1.442695, %v823_v5  ;;  %v624_v14 = vadd.f32 %v612_v11, %v527_v4  ;;  %v892_v19 = vadd.f32 %v1886_v57, %v891_v8  ;;  %v1074_v4 = vld [vmem:[%s2748_s3 + $0x40] sm:$0xff]  ;;  %1130 = vmatpush.msrb.mxu1 %v1754_v3 }
 0x163   : > { %v2370_v20 = vpop.eup %1889  ;;  %v2372_v12 = vadd.f32 1.0, %v1888_v16  ;;  %v1782_v11 = vld [vmem:[%s2748_s3 + $0x100] sm:$0xff]  ;;  %1195 = vmatpush.msra.mxu2 %v1074_v4 }
 0x164   : > { %1891 = vpow2.f32 %v1743_v17  ;;  %v718_v23 = vadd.f32 %v706_v15, %v624_v14  ;;  %v896_v26 = vsel %vm895_vm14, %v1886_v57, %v892_v19  ;;  %v904_v27 = vmul.f32 %v2370_v20, %v2354_v58  ;;  %v1802_v14 = vld [vmem:[%s2748_s3 + $0x160] sm:$0xff]  ;;  %v1753_v19 = vld [vmem:[%s2748_s3 + $0x98] sm:$0xff]  ;;  %1281 = vmatpush.msra.mxu3 %v1782_v11 }
 0x165   : > { %1893 = vrcp.f32 %v2372_v12  ;;  %v2377_v29 = vsel %vm898_vm15, %v900_v22, %v896_v26  ;;  %vm909_vm1 = vweird.f32 %v2370_v20  ;;  %v803_v5 = vpop.f32.mrf.mxu0  ;;  %v927_v26 = vand.u32 2147483647, %v2372_v12  ;;  %1375 = vmatpush.msra.mxu0 %v1802_v14  ;;  %1131 = vmatpush.msrb.mxu1 %v1753_v19 }
 0x166   : > { %v812_v30 = vadd.f32 %v800_v13, %v718_v23  ;;  %v1012_v31 = vmul.f32 %v991_v21, %v2377_v29  ;;  %v905_v32 = vsub.f32 1.0, %v904_v27  ;;  %vm2382_vm4 = vmor %vm908_vm2, %vm909_vm1  ;;  %v1073_v13 = vld [vmem:[%s2748_s3 + $0x38] sm:$0xff]  ;;  %vm923_vm7 = vweird.f32 %v2372_v12 }
 0x167   : > { %v1781_v21 = vld [vmem:[%s2748_s3 + $0xf8] sm:$0xff]  ;;  %1196 = vmatpush.msra.mxu2 %v1073_v13  ;;  %vm928_vm9 = vcmp.eq.f32.partialorder %v927_v26, 8.507059e+37  ;;  %v1068_v26 = vld [vmem:[%s2748_s3 + $0x10] sm:$0xff] }
 0x168   : > { %v824_v34 = vadd.f32 %v2336_v28, %v812_v30  ;;  %1030 = vrot.lane.b32.xlu0 %v1012_v31, %s1931_s27  ;;  %v906_v38 = vmul.f32 %v2370_v20, %v905_v32  ;;  %v1801_v27 = vld [vmem:[%s2748_s3 + $0x158] sm:$0xff]  ;;  %v1752_v30 = vld [vmem:[%s2748_s3 + $0x90] sm:$0xff]  ;;  %1282 = vmatpush.msra.mxu3 %v1781_v21 }
 0x169   : > { %v615_v42 = vpop.f32.mrf.mxu2  ;;  %v1780_v31 = vld [vmem:[%s2748_s3 + $0xf0] sm:$0xff]  ;;  %1376 = vmatpush.msra.mxu0 %v1801_v27  ;;  %1132 = vmatpush.msrb.mxu1 %v1752_v30  ;;  %v1069_v13 = vld [vmem:[%s2748_s3 + $0x18] sm:$0xff] }
 0x16a   : > { %v1892_v48 = vpop.eup %1891  ;;  %v1744_v49 = vmul.f32 -1.442695, %v824_v34  ;;  %v625_v50 = vadd.f32 %v615_v42, %v2331_v18  ;;  %v907_v51 = vadd.f32 %v2370_v20, %v906_v38  ;;  %v709_v18 = vpop.f32.mrf.mxu3  ;;  %1283 = vmatpush.msra.mxu3 %v1780_v31  ;;  %v1777_v21 = vld [vmem:[%s2748_s3 + $0xd8] sm:$0xff]  ;;  %v1776_v27 = vld [vmem:[%s2748_s3 + $0xd0] sm:$0xff]  ;;  %v1067_v31 = vld [vmem:[%s2748_s3 + $0x8] sm:$0xff] }
 0x16b   : > { %v2420_v57 = vpop.eup %1893  ;;  %v2422_v58 = vadd.f32 1.0, %v1892_v48  ;;  %1377 = vmatpush.msra.mxu0 %v1800_v6  ;;  %1133 = vmatpush.msrb.mxu1 %v1751_v7  ;;  %v1796_v30 = vld [vmem:[%s2748_s3 + $0x130] sm:$0xff]  ;;  %v1746_v7 = vld [vmem:[%s2748_s3 + $0x60] sm:$0xff] }
 0x16c   : > { %1895 = vpow2.f32 %v1744_v49  ;;  %v719_v0 = vadd.f32 %v709_v18, %v625_v50  ;;  %v911_v1 = vsel %vm2382_vm4, %v2370_v20, %v907_v51  ;;  %v919_v2 = vmul.f32 %v2420_v57, %v2372_v12  ;;  %v1070_v49 = vld [vmem:[%s2748_s3 + $0x20] sm:$0xff]  ;;  %1284 = vmatpush.msra.mxu3 %v1779_v41 }
 0x16d   : > { %1897 = vrcp.f32 %v2422_v58  ;;  %v2451_v8 = vsel %vm2424_vm5, %v915_v10, %v911_v1  ;;  %v929_v20 = vand.u32 2147483648, %v2372_v12  ;;  %vm924_vm6 = vweird.f32 %v2420_v57  ;;  %v1071_v12 = vld [vmem:[%s2748_s3 + $0x28] sm:$0xff]  ;;  %1378 = vmatpush.msra.mxu0 %v1799_v46  ;;  %1134 = vmatpush.msrb.mxu1 %v1750_v47  ;;  %v997_v10 = vpop.permute.xlu1 %996 }
 0x16e   : > { %v813_v15 = vadd.f32 %v803_v5, %v719_v0  ;;  %v1013_v16 = vmul.f32 %v993_v59, %v2451_v8  ;;  %v920_v17 = vsub.f32 1.0, %v919_v2  ;;  %vm925_vm8 = vmor %vm923_vm7, %vm924_vm6  ;;  %v944_v54 = vand.u32 2147483648, %v2422_v58  ;;  %1285 = vmatpush.msra.mxu3 %v1778_v52 }
 0x16f   : > { %v930_v40 = vor.u32 1.1754944e-38, %v929_v20  ;;  %v942_v18 = vand.u32 2147483647, %v2422_v58  ;;  %1379 = vmatpush.msra.mxu0 %v1798_v53  ;;  %vm938_vm11 = vweird.f32 %v2422_v58  ;;  %v1749_v20 = vld [vmem:[%s2748_s3 + $0x78] sm:$0xff] }
 0x170   : > { %v2471_v22 = vadd.f32 %v2336_v28, %v813_v15  ;;  %1032 = vrot.lane.b32.xlu1 %v1013_v16, %s1931_s27  ;;  %v921_v23 = vmul.f32 %v2420_v57, %v920_v17  ;;  %v1072_v28 = vld [vmem:[%s2748_s3 + $0x30] sm:$0xff]  ;;  %v945_v60 = vor.u32 1.1754944e-38, %v944_v54  ;;  %1135 = vmatpush.msrb.mxu1 %v1749_v20 }
 0x171   : > { %1197 = vmatpush.msra.mxu2 %v1072_v28  ;;  %vm943_vm13 = vcmp.eq.f32.partialorder %v942_v18, 8.507059e+37  ;;  %1286 = vmatpush.msra.mxu3 %v1777_v21  ;;  %v1747_v28 = vld [vmem:[%s2748_s3 + $0x68] sm:$0xff] }
 0x172   : > { %v1896_v32 = vpop.eup %1895  ;;  %v922_v33 = vadd.f32 %v2420_v57, %v921_v23  ;;  %v1745_v19 = vmul.f32 -1.442695, %v2471_v22  ;;  %v1797_v23 = vld [vmem:[%s2748_s3 + $0x138] sm:$0xff]  ;;  %v1748_v22 = vld [vmem:[%s2748_s3 + $0x70] sm:$0xff] }
 0x173   : > { %v1898_v34 = vpop.eup %1897  ;;  %v856_v38 = vadd.f32 1.0, %v1896_v32  ;;  %1198 = vmatpush.msra.mxu2 %v1071_v12  ;;  %1380 = vmatpush.msra.mxu0 %v1797_v23  ;;  %v1775_v32 = vld [vmem:[%s2748_s3 + $0xc8] sm:$0xff]  ;;  %v1820_v23 = vld [vmem:[%s2748_s3 + $0x1b0] sm:$0xff] }
 0x174   : > { %v926_v42 = vsel %vm925_vm8, %v2420_v57, %v922_v33  ;;  %v934_v45 = vmul.f32 %v1898_v34, %v2422_v58  ;;  %vm939_vm10 = vweird.f32 %v1898_v34  ;;  %v999_v58 = vpop.permute.xlu0 %998  ;;  %1136 = vmatpush.msrb.mxu1 %v1748_v22  ;;  %v1795_v33 = vld [vmem:[%s2748_s3 + $0x128] sm:$0xff]  ;;  %1287 = vmatpush.msra.mxu3 %v1776_v27  ;;  %v1817_v27 = vld [vmem:[%s2748_s3 + $0x198] sm:$0xff] }
 0x175   : > { %1899 = vrcp.f32 %v856_v38  ;;  %v2513_v48 = vsel %vm928_vm9, %v930_v40, %v926_v42  ;;  %1199 = vmatpush.msra.mxu2 %v1070_v49  ;;  %vm940_vm12 = vmor %vm938_vm11, %vm939_vm10  ;;  %v959_v3 = vand.u32 2147483648, %v856_v38  ;;  %v957_v5 = vand.u32 2147483647, %v856_v38  ;;  %1381 = vmatpush.msra.mxu0 %v1796_v30  ;;  %v1819_v22 = vld [vmem:[%s2748_s3 + $0x1a8] sm:$0xff] }
 0x176   : > { %v1014_v50 = vmul.f32 %v995_v39, %v2513_v48  ;;  %v935_v51 = vsub.f32 1.0, %v934_v45  ;;  %vm953_vm15 = vweird.f32 %v856_v38  ;;  %1901 = vpow2.f32 %v1745_v19  ;;  %1137 = vmatpush.msrb.mxu1 %v1747_v28  ;;  %v1794_v39 = vld [vmem:[%s2748_s3 + $0x120] sm:$0xff]  ;;  %1288 = vmatpush.msra.mxu3 %v1775_v32 }
 0x177   : > { %v960_v15 = vor.u32 1.1754944e-38, %v959_v3  ;;  %vm958_vm2 = vcmp.eq.f32.partialorder %v957_v5, 8.507059e+37  ;;  %1200 = vmatpush.msra.mxu2 %v1069_v13  ;;  %1382 = vmatpush.msra.mxu0 %v1795_v33  ;;  %v1822_v3 = vld [vmem:[%s2748_s3 + $0x1c0] sm:$0xff] }
 0x178   : > { %1034 = vrot.lane.b32.xlu2 %v1014_v50, %s1931_s27  ;;  %v936_v57 = vmul.f32 %v1898_v34, %v935_v51  ;;  %1138 = vmatpush.msrb.mxu1 %v1746_v7 }
 0x179   : > { %1201 = vmatpush.msra.mxu2 %v1068_v26  ;;  %1383 = vmatpush.msra.mxu0 %v1794_v39  ;;  %v1818_v26 = vld [vmem:[%s2748_s3 + $0x1a0] sm:$0xff]  ;;  %v1816_v39 = vld [vmem:[%s2748_s3 + $0x190] sm:$0xff] }
 0x17a   : > { %v937_v59 = vadd.f32 %v1898_v34, %v936_v57 }
 0x17b   : > { %v1900_v9 = vpop.eup %1899  ;;  %1202 = vmatpush.msra.mxu2 %v1067_v31 }
 0x17c   : > { %v941_v61 = vsel %vm940_vm12, %v1898_v34, %v937_v59  ;;  %v949_v63 = vmul.f32 %v1900_v9, %v856_v38  ;;  %vm954_vm14 = vweird.f32 %v1900_v9  ;;  %v1902_v6 = vpop.eup %1901  ;;  %v1066_v34 = vld [vmem:[%s2748_s3] sm:$0xff] }
 0x17d   : > { %v2529_v0 = vsel %vm943_vm13, %v945_v60, %v941_v61  ;;  %vm955_vm1 = vmor %vm953_vm15, %vm954_vm14  ;;  %v1774_v38 = vld [vmem:[%s2748_s3 + $0xc0] sm:$0xff]  ;;  %v857_v40 = vadd.f32 1.0, %v1902_v6  ;;  %1203 = vmatpush.msra.mxu2 %v1066_v34  ;;  %v1825_v60 = vld [vmem:[%s2748_s3 + $0x1d8] sm:$0xff] }
 0x17e   : > { %v1015_v1 = vmul.f32 %v997_v10, %v2529_v0  ;;  %v950_v2 = vsub.f32 1.0, %v949_v63  ;;  %1289 = vmatpush.msra.mxu3 %v1774_v38  ;;  %1466 = vmatpush.msra.mxu1 %v1825_v60  ;;  %v1824_v61 = vld [vmem:[%s2748_s3 + $0x1d0] sm:$0xff] }
 0x17f   : > { %1903 = vrcp.f32 %v857_v40  ;;  %v974_v49 = vand.u32 2147483648, %v857_v40  ;;  %vm968_vm5 = vweird.f32 %v857_v40  ;;  %v972_v50 = vand.u32 2147483647, %v857_v40 }
 0x180   : > { %1036 = vrot.lane.b32.xlu0 %v1015_v1, %s1931_s27  ;;  %v951_v4 = vmul.f32 %v1900_v9, %v950_v2  ;;  %1467 = vmatpush.msra.mxu1 %v1824_v61  ;;  %v1823_v2 = vld [vmem:[%s2748_s3 + $0x1c8] sm:$0xff] }
 0x181   : > { %v975_v52 = vor.u32 1.1754944e-38, %v974_v49  ;;  %vm973_vm7 = vcmp.eq.f32.partialorder %v972_v50, 8.507059e+37 }
 0x182   : > { %v952_v11 = vadd.f32 %v1900_v9, %v951_v4  ;;  %1468 = vmatpush.msra.mxu1 %v1823_v2 }
 0x184   : > { %v956_v16 = vsel %vm955_vm1, %v1900_v9, %v952_v11  ;;  %1469 = vmatpush.msra.mxu1 %v1822_v3 }
 0x185   : > { %v2533_v17 = vsel %vm958_vm2, %v960_v15, %v956_v16  ;;  %v1904_v12 = vpop.eup %1903  ;;  %v1821_v16 = vld [vmem:[%s2748_s3 + $0x1b8] sm:$0xff] }
 0x186   : > { %v1016_v14 = vmul.f32 %v999_v58, %v2533_v17  ;;  %v964_v41 = vmul.f32 %v1904_v12, %v857_v40  ;;  %vm969_vm4 = vweird.f32 %v1904_v12  ;;  %1470 = vmatpush.msra.mxu1 %v1821_v16  ;;  %v1815_v40 = vld [vmem:[%s2748_s3 + $0x188] sm:$0xff] }
 0x187   : > { %vm970_vm6 = vmor %vm968_vm5, %vm969_vm4 }
 0x188   : > { %1038 = vrot.lane.b32.xlu1 %v1016_v14, %s1931_s27  ;;  %v965_v42 = vsub.f32 1.0, %v964_v41  ;;  %1471 = vmatpush.msra.mxu1 %v1820_v23 }
 0x18a   : > { %v966_v45 = vmul.f32 %v1904_v12, %v965_v42  ;;  %1472 = vmatpush.msra.mxu1 %v1819_v22 }
 0x18c   : > { %v967_v47 = vadd.f32 %v1904_v12, %v966_v45  ;;  %1473 = vmatpush.msra.mxu1 %v1818_v26 }
 0x18e   : > { %v971_v51 = vsel %vm970_vm6, %v1904_v12, %v967_v47  ;;  %1474 = vmatpush.msra.mxu1 %v1817_v27  ;;  %v1814_v47 = vld [vmem:[%s2748_s3 + $0x180] sm:$0xff] }
 0x18f   : > { %v2587_v53 = vsel %vm973_vm7, %v975_v52, %v971_v51 }
 0x190   : > { %1475 = vmatpush.msra.mxu1 %v1816_v39 }
 0x192   : > { %1476 = vmatpush.msra.mxu1 %v1815_v40 }
 0x194   : > { %1477 = vmatpush.msra.mxu1 %v1814_v47 }
 0x1b2   : > { %v1027_v46 = vpop.permute.xlu2 %1026 }
 0x1b3   : > { %1050 = vst.msk [vmem:[#allocation2 + $0x2] sm:$0xff] %vm302_vm0, %v1027_v46 }
 0x1ba   : > { %v1001_v54 = vpop.permute.xlu2 %1000  ;;  %v1078_v57 = vld [vmem:[#allocation2 + $0x1] sm:$0xff] }
 0x1bb   : > { %v1058_v18 = vld [vmem:[#allocation2] sm:$0xff]  ;;  %v1017_v9 = vmul.f32 %v1001_v54, %v2587_v53  ;;  %1758 = vmatmul.msk.f32.vlgmr.msrb.gmra.mxu1 %vm401_vm3, %v1078_v57 }
 0x1bc   : > { %v1229_v59 = vld [vmem:[#allocation2 + $0x2] sm:$0xff]  ;;  %1766 = vmatmul.msk.f32.vlgmr.msra.gmra.mxu2 %vm401_vm3, %v1058_v18 }
 0x1bd   : > { %v1323_v10 = vld [vmem:[#allocation2 + $0x3] sm:$0xff]  ;;  %1786 = vmatmul.msk.f32.vlgmr.msra.gmra.mxu3 %vm401_vm3, %v1229_v59  ;;  %1040 = vrot.lane.b32.xlu2 %v1017_v9, %s1931_s27  ;;  %s2694_s27 = scalar_lea.vmem %s2751_s6, %s1996_s14 }
 0x1be   : > { %1806 = vmatmul.msk.f32.vlgmr.msra.gmra.mxu0 %vm401_vm3, %v1323_v10  ;;  %v1417_v10 = vld [vmem:[#allocation2 + $0x4] sm:$0xff] }
 0x1d2   : > { %v1029_v63 = vpop.permute.xlu1 %1028  ;;  %v1035_v1 = vpop.permute.xlu2 %1034 }
 0x1d3   : > { %1051 = vst.msk [vmem:[#allocation2 + $0x12] sm:$0xff] %vm302_vm0, %v1029_v63 }
 0x1d4   : > { %1054 = vst.msk [vmem:[#allocation2 + $0x42] sm:$0xff] %vm302_vm0, %v1035_v1 }
 0x1da   : > { %v1031_v4 = vpop.permute.xlu0 %1030  ;;  %v1079_v5 = vld [vmem:[#allocation2 + $0x11] sm:$0xff] }
 0x1db   : > { %v1059_v11 = vld [vmem:[#allocation2 + $0x10] sm:$0xff]  ;;  %1052 = vst.msk [vmem:[#allocation2 + $0x22] sm:$0xff] %vm302_vm0, %v1031_v4  ;;  %1759 = vmatmul.msk.f32.gmra.mxu1 %vm401_vm3, %v1079_v5  ;;  %v1082_v6 = vld [vmem:[#allocation2 + $0x41] sm:$0xff] }
 0x1dc   : > { %v1230_v58 = vld [vmem:[#allocation2 + $0x12] sm:$0xff]  ;;  %1767 = vmatmul.msk.f32.gmra.mxu2 %vm401_vm3, %v1059_v11  ;;  %v1062_v7 = vld [vmem:[#allocation2 + $0x40] sm:$0xff] }
 0x1dd   : > { %v1324_v15 = vld [vmem:[#allocation2 + $0x13] sm:$0xff]  ;;  %1787 = vmatmul.msk.f32.gmra.mxu3 %vm401_vm3, %v1230_v58  ;;  %v1233_v34 = vld [vmem:[#allocation2 + $0x42] sm:$0xff] }
 0x1de   : > { %1807 = vmatmul.msk.f32.gmra.mxu0 %vm401_vm3, %v1324_v15  ;;  %v1327_v38 = vld [vmem:[#allocation2 + $0x43] sm:$0xff]  ;;  %v1418_v60 = vld [vmem:[#allocation2 + $0x14] sm:$0xff] }
 0x1df   : > { %v1421_v1 = vld [vmem:[#allocation2 + $0x44] sm:$0xff] }
 0x1e2   : > { %v1033_v14 = vpop.permute.xlu1 %1032  ;;  %v1080_v19 = vld [vmem:[#allocation2 + $0x21] sm:$0xff] }
 0x1e3   : > { %v1060_v20 = vld [vmem:[#allocation2 + $0x20] sm:$0xff]  ;;  %1053 = vst.msk [vmem:[#allocation2 + $0x32] sm:$0xff] %vm302_vm0, %v1033_v14  ;;  %1760 = vmatmul.msk.f32.gmra.mxu1 %vm401_vm3, %v1080_v19 }
 0x1e4   : > { %v1231_v13 = vld [vmem:[#allocation2 + $0x22] sm:$0xff]  ;;  %1768 = vmatmul.msk.f32.gmra.mxu2 %vm401_vm3, %v1060_v20 }
 0x1e5   : > { %v1325_v21 = vld [vmem:[#allocation2 + $0x23] sm:$0xff]  ;;  %1788 = vmatmul.msk.f32.gmra.mxu3 %vm401_vm3, %v1231_v13 }
 0x1e6   : > { %1808 = vmatmul.msk.f32.gmra.mxu0 %vm401_vm3, %v1325_v21  ;;  %v1419_v61 = vld [vmem:[#allocation2 + $0x24] sm:$0xff] }
 0x1ea   : > { %v1081_v30 = vld [vmem:[#allocation2 + $0x31] sm:$0xff] }
 0x1eb   : > { %v1061_v28 = vld [vmem:[#allocation2 + $0x30] sm:$0xff]  ;;  %1761 = vmatmul.msk.f32.gmra.mxu1 %vm401_vm3, %v1081_v30 }
 0x1ec   : > { %v1232_v31 = vld [vmem:[#allocation2 + $0x32] sm:$0xff]  ;;  %1769 = vmatmul.msk.f32.gmra.mxu2 %vm401_vm3, %v1061_v28 }
 0x1ed   : > { %v1326_v32 = vld [vmem:[#allocation2 + $0x33] sm:$0xff]  ;;  %1789 = vmatmul.msk.f32.gmra.mxu3 %vm401_vm3, %v1232_v31 }
 0x1ee   : > { %1809 = vmatmul.msk.f32.gmra.mxu0 %vm401_vm3, %v1326_v32  ;;  %v1420_v63 = vld [vmem:[#allocation2 + $0x34] sm:$0xff] }
 0x1f2   : > { %v1037_v33 = vpop.permute.xlu0 %1036 }
 0x1f3   : > { %1055 = vst.msk [vmem:[#allocation2 + $0x52] sm:$0xff] %vm302_vm0, %v1037_v33  ;;  %1762 = vmatmul.msk.f32.gmra.mxu1 %vm401_vm3, %v1082_v6  ;;  %v2683_v6 = vld [vmem:[%s2750_s5] ss:$0 sm:$0xff] }
 0x1f4   : > { %1770 = vmatmul.msk.f32.gmra.mxu2 %vm401_vm3, %v1062_v7 }
 0x1f5   : > { %1790 = vmatmul.msk.f32.gmra.mxu3 %vm401_vm3, %v1233_v34 }
 0x1f6   : > { %1810 = vmatmul.msk.f32.gmra.mxu0 %vm401_vm3, %v1327_v38 }
 0x1fa   : > { %v1039_v12 = vpop.permute.xlu1 %1038  ;;  %v1083_v41 = vld [vmem:[#allocation2 + $0x51] sm:$0xff] }
 0x1fb   : > { %v1063_v42 = vld [vmem:[#allocation2 + $0x50] sm:$0xff]  ;;  %1056 = vst.msk [vmem:[#allocation2 + $0x62] sm:$0xff] %vm302_vm0, %v1039_v12  ;;  %1763 = vmatmul.msk.f32.gmra.mxu1 %vm401_vm3, %v1083_v41 }
 0x1fc   : > { %v1234_v45 = vld [vmem:[#allocation2 + $0x52] sm:$0xff]  ;;  %1771 = vmatmul.msk.f32.gmra.mxu2 %vm401_vm3, %v1063_v42 }
 0x1fd   : > { %v1328_v46 = vld [vmem:[#allocation2 + $0x53] sm:$0xff]  ;;  %1791 = vmatmul.msk.f32.gmra.mxu3 %vm401_vm3, %v1234_v45 }
 0x1fe   : > { %1811 = vmatmul.msk.f32.gmra.mxu0 %vm401_vm3, %v1328_v46  ;;  %v1422_v2 = vld [vmem:[#allocation2 + $0x54] sm:$0xff]  ;;  %v1531_v46 = vsub.f32 1.0, %v2347_v37 }
 0x202   : > { %v1084_v49 = vld [vmem:[#allocation2 + $0x61] sm:$0xff] }
 0x203   : > { %v1064_v50 = vld [vmem:[#allocation2 + $0x60] sm:$0xff]  ;;  %1764 = vmatmul.msk.f32.gmra.mxu1 %vm401_vm3, %v1084_v49 }
 0x204   : > { %v1235_v51 = vld [vmem:[#allocation2 + $0x62] sm:$0xff]  ;;  %1772 = vmatmul.msk.f32.gmra.mxu2 %vm401_vm3, %v1064_v50 }
 0x205   : > { %v1329_v52 = vld [vmem:[#allocation2 + $0x63] sm:$0xff]  ;;  %1792 = vmatmul.msk.f32.gmra.mxu3 %vm401_vm3, %v1235_v51 }
 0x206   : > { %1812 = vmatmul.msk.f32.gmra.mxu0 %vm401_vm3, %v1329_v52  ;;  %v1423_v3 = vld [vmem:[#allocation2 + $0x64] sm:$0xff] }
 0x217   : > { %v1041_v54 = vpop.permute.xlu2 %1040 }
 0x218   : > { %1057 = vst.msk [vmem:[#allocation2 + $0x72] sm:$0xff] %vm302_vm0, %v1041_v54  ;;  %v1539_v54 = vmul.f32 %v1531_v46, %v2057_v25 }
 0x21f   : > { %v1085_v57 = vld [vmem:[#allocation2 + $0x71] sm:$0xff] }
 0x220   : > { %v1065_v18 = vld [vmem:[#allocation2 + $0x70] sm:$0xff]  ;;  %1765 = vmatmul.msk.f32.gmra.mxu1 %vm401_vm3, %v1085_v57 }
 0x221   : > { %v1236_v59 = vld [vmem:[#allocation2 + $0x72] sm:$0xff]  ;;  %1773 = vmatmul.msk.f32.gmra.mxu2 %vm401_vm3, %v1065_v18 }
 0x222   : > { %v1330_v9 = vld [vmem:[#allocation2 + $0x73] sm:$0xff]  ;;  %1793 = vmatmul.msk.f32.gmra.mxu3 %vm401_vm3, %v1236_v59 }
 0x223   : > { %1813 = vmatmul.msk.f32.gmra.mxu0 %vm401_vm3, %v1330_v9  ;;  %v1424_v5 = vld [vmem:[#allocation2 + $0x74] sm:$0xff] }
 0x228   : > { %1826 = vmatmul.msk.f32.vlgmr.msra.gmra.mxu1 %vm401_vm3, %v1417_v10 }
 0x230   : > { %1827 = vmatmul.msk.f32.gmra.mxu1 %vm401_vm3, %v1418_v60 }
 0x238   : > { %1828 = vmatmul.msk.f32.gmra.mxu1 %vm401_vm3, %v1419_v61  ;;  %v1140_v4 = vpop.f32.mrf.mxu1  ;;  %v1532_v61 = vsub.f32 1.0, %v2358_v62 }
 0x23b   : > { %v1385_v23 = vpop.f32.mrf.mxu0 }
 0x23f   : > { %v1205_v19 = vpop.f32.mrf.mxu2 }
 0x240   : > { %1829 = vmatmul.msk.f32.gmra.mxu1 %vm401_vm3, %v1420_v63  ;;  %v1291_v20 = vpop.f32.mrf.mxu3  ;;  %v1206_v22 = vadd.f32 %v1205_v19, %v1140_v4  ;;  %v1540_v4 = vmul.f32 %v1532_v61, %v2105_v36  ;;  %v1536_v61 = vsub.f32 1.0, %v2529_v0 }
 0x242   : > { %v1315_v30 = vadd.f32 %v1291_v20, %v1206_v22  ;;  %v1533_v20 = vsub.f32 1.0, %v2377_v29 }
 0x244   : > { %v1409_v33 = vadd.f32 %v1385_v23, %v1315_v30 }
 0x248   : > { %1830 = vmatmul.msk.f32.gmra.mxu1 %vm401_vm3, %v1421_v1 }
 0x250   : > { %1831 = vmatmul.msk.f32.gmra.mxu1 %vm401_vm3, %v1422_v2 }
 0x258   : > { %1832 = vmatmul.msk.f32.gmra.mxu1 %vm401_vm3, %v1423_v3  ;;  %v1143_v11 = vpop.f32.mrf.mxu1 }
 0x25b   : > { %v1388_v28 = vpop.f32.mrf.mxu0 }
 0x25f   : > { %v1208_v21 = vpop.f32.mrf.mxu2 }
 0x260   : > { %1833 = vmatmul.msk.f32.gmra.mxu1 %vm401_vm3, %v1424_v5  ;;  %v1146_v58 = vpop.f32.mrf.mxu1  ;;  %v1294_v26 = vpop.f32.mrf.mxu3  ;;  %v1209_v32 = vadd.f32 %v1208_v21, %v1143_v11 }
 0x262   : > { %v1316_v39 = vadd.f32 %v1294_v26, %v1209_v32 }
 0x263   : > { %v1391_v12 = vpop.f32.mrf.mxu0 }
 0x264   : > { %v1410_v45 = vadd.f32 %v1388_v28, %v1316_v39 }
 0x267   : > { %v1211_v31 = vpop.f32.mrf.mxu2 }
 0x268   : > { %v1149_v15 = vpop.f32.mrf.mxu1  ;;  %v1297_v38 = vpop.f32.mrf.mxu3  ;;  %v1212_v42 = vadd.f32 %v1211_v31, %v1146_v58 }
 0x26a   : > { %v1317_v51 = vadd.f32 %v1297_v38, %v1212_v42 }
 0x26b   : > { %v1394_v9 = vpop.f32.mrf.mxu0 }
 0x26c   : > { %v1411_v60 = vadd.f32 %v1391_v12, %v1317_v51 }
 0x26f   : > { %v1214_v41 = vpop.f32.mrf.mxu2 }
 0x270   : > { %v1152_v16 = vpop.f32.mrf.mxu1  ;;  %v1300_v57 = vpop.f32.mrf.mxu3  ;;  %v1215_v10 = vadd.f32 %v1214_v41, %v1149_v15 }
 0x272   : > { %v1318_v2 = vadd.f32 %v1300_v57, %v1215_v10 }
 0x273   : > { %v1397_v22 = vpop.f32.mrf.mxu0 }
 0x274   : > { %v1412_v19 = vadd.f32 %v1394_v9, %v1318_v2 }
 0x277   : > { %v1217_v63 = vpop.f32.mrf.mxu2 }
 0x278   : > { %v2674_v14 = vpop.f32.mrf.mxu1  ;;  %v1303_v11 = vpop.f32.mrf.mxu3  ;;  %v1218_v15 = vadd.f32 %v1217_v63, %v1152_v16 }
 0x27a   : > { %v1319_v28 = vadd.f32 %v1303_v11, %v1218_v15  ;;  %v1537_v11 = vsub.f32 1.0, %v2533_v17 }
 0x27f   : > { %v1220_v26 = vpop.f32.mrf.mxu2 }
 0x280   : > { %v2676_v13 = vpop.f32.mrf.mxu1  ;;  %v1221_v32 = vadd.f32 %v1220_v26, %v2674_v14 }
 0x287   : > { %v1223_v42 = vpop.f32.mrf.mxu2 }
 0x288   : > { %v1224_v46 = vadd.f32 %v1223_v42, %v2676_v13 }
 0x29d   : > { %v2678_v27 = vpop.f32.mrf.mxu1 }
 0x2a5   : > { %v1479_v7 = vpop.f32.mrf.mxu1 }
 0x2a6   : > { %v1503_v34 = vadd.f32 %v1479_v7, %v1409_v33  ;;  %v1413_v33 = vadd.f32 %v1397_v22, %v1319_v28  ;;  %v1534_v7 = vsub.f32 1.0, %v2451_v8 }
 0x2a8   : > { %v1515_v40 = vadd.f32 %v2683_v6, %v1503_v34  ;;  %v1306_v34 = vpop.f32.mrf.mxu3 }
 0x2a9   : > { %v1320_v12 = vadd.f32 %v1306_v34, %v1221_v32 }
 0x2aa   : > { %1905 = vtanh.f32 %v1515_v40 }
 0x2ad   : > { %v1482_v47 = vpop.f32.mrf.mxu1 }
 0x2ae   : > { %v1504_v49 = vadd.f32 %v1482_v47, %v1410_v45 }
 0x2b0   : > { %v1906_v50 = vpop.eup %1905  ;;  %v1516_v52 = vadd.f32 %v2683_v6, %v1504_v49  ;;  %v1535_v49 = vsub.f32 1.0, %v2513_v48 }
 0x2b1   : > { %v1547_v18 = vmul.f32 %v1906_v50, %v2347_v37 }
 0x2b2   : > { %1907 = vtanh.f32 %v1516_v52  ;;  %v1309_v52 = vpop.f32.mrf.mxu3 }
 0x2b3   : > { %v1555_v59 = vadd.f32 %v1547_v18, %v1539_v54  ;;  %v1321_v57 = vadd.f32 %v1309_v52, %v1224_v46  ;;  %v1543_v18 = vmul.f32 %v1535_v49, %v2054_v24 }
 0x2b5   : > { %1563 = vst.msk [vmem:[%s2694_s27] sm:$0xff] %vm302_vm0, %v1555_v59  ;;  %v1485_v25 = vpop.f32.mrf.mxu1 }
 0x2b6   : > { %v1505_v1 = vadd.f32 %v1485_v25, %v1411_v60 }
 0x2b8   : > { %v1908_v37 = vpop.eup %1907  ;;  %v1517_v3 = vadd.f32 %v2683_v6, %v1505_v1 }
 0x2b9   : > { %v1548_v5 = vmul.f32 %v1908_v37, %v2358_v62  ;;  %v1541_v62 = vmul.f32 %v1533_v20, %v2142_v43  ;;  %v1542_v43 = vmul.f32 %v1534_v7, %v2194_v56 }
 0x2ba   : > { %1909 = vtanh.f32 %v1517_v3  ;;  %v1312_v1 = vpop.f32.mrf.mxu3 }
 0x2bb   : > { %v1556_v58 = vadd.f32 %v1548_v5, %v1540_v4 }
 0x2bd   : > { %1564 = vst.msk [vmem:[%s2694_s27 + $0x8] sm:$0xff] %vm302_vm0, %v1556_v58  ;;  %v1488_v21 = vpop.f32.mrf.mxu1 }
 0x2be   : > { %v1506_v23 = vadd.f32 %v1488_v21, %v1412_v19  ;;  %v1545_v21 = vmul.f32 %v1537_v11, %v2151_v44 }
 0x2c0   : > { %v1910_v30 = vpop.eup %1909  ;;  %v1518_v36 = vadd.f32 %v2683_v6, %v1506_v23  ;;  %v1538_v23 = vsub.f32 1.0, %v2587_v53 }
 0x2c1   : > { %v1549_v31 = vmul.f32 %v1910_v30, %v2377_v29  ;;  %v1400_v29 = vpop.f32.mrf.mxu0 }
 0x2c2   : > { %1911 = vtanh.f32 %v1518_v36  ;;  %v1414_v47 = vadd.f32 %v1400_v29, %v1320_v12  ;;  %v1546_v26 = vmul.f32 %v1538_v23, %v2189_v55 }
 0x2c3   : > { %v1557_v16 = vadd.f32 %v1549_v31, %v1541_v62 }
 0x2c5   : > { %1565 = vst.msk [vmem:[%s2694_s27 + $0x10] sm:$0xff] %vm302_vm0, %v1557_v16  ;;  %v1491_v38 = vpop.f32.mrf.mxu1 }
 0x2c6   : > { %v1507_v39 = vadd.f32 %v1491_v38, %v1413_v33 }
 0x2c8   : > { %v1912_v40 = vpop.eup %1911  ;;  %v1519_v41 = vadd.f32 %v2683_v6, %v1507_v39 }
 0x2c9   : > { %v1550_v45 = vmul.f32 %v1912_v40, %v2451_v8  ;;  %v1226_v8 = vpop.f32.mrf.mxu2  ;;  %v1403_v13 = vpop.f32.mrf.mxu0 }
 0x2ca   : > { %1913 = vtanh.f32 %v1519_v41  ;;  %v1227_v10 = vadd.f32 %v1226_v8, %v2678_v27  ;;  %v1415_v60 = vadd.f32 %v1403_v13, %v1321_v57 }
 0x2cb   : > { %v1558_v14 = vadd.f32 %v1550_v45, %v1542_v43 }
 0x2cc   : > { %v1322_v2 = vadd.f32 %v1312_v1, %v1227_v10 }
 0x2cd   : > { %1566 = vst.msk [vmem:[%s2694_s27 + $0x18] sm:$0xff] %vm302_vm0, %v1558_v14  ;;  %v1494_v50 = vpop.f32.mrf.mxu1 }
 0x2ce   : > { %v1508_v51 = vadd.f32 %v1494_v50, %v1414_v47 }
 0x2d0   : > { %v1914_v54 = vpop.eup %1913  ;;  %v1520_v56 = vadd.f32 %v2683_v6, %v1508_v51 }
 0x2d1   : > { %v1551_v59 = vmul.f32 %v1914_v54, %v2513_v48  ;;  %v1544_v48 = vmul.f32 %v1536_v61, %v2102_v35  ;;  %v1406_v27 = vpop.f32.mrf.mxu0 }
 0x2d2   : > { %1915 = vtanh.f32 %v1520_v56  ;;  %v1416_v5 = vadd.f32 %v1406_v27, %v1322_v2 }
 0x2d3   : > { %v1559_v9 = vadd.f32 %v1551_v59, %v1543_v18 }
 0x2d5   : > { %1567 = vst.msk [vmem:[%s2694_s27 + $0x20] sm:$0xff] %vm302_vm0, %v1559_v9  ;;  %v1497_v63 = vpop.f32.mrf.mxu1 }
 0x2d6   : > { %v1509_v25 = vadd.f32 %v1497_v63, %v1415_v60 }
 0x2d8   : > { %v1916_v37 = vpop.eup %1915  ;;  %v1521_v24 = vadd.f32 %v2683_v6, %v1509_v25 }
 0x2d9   : > { %v1552_v3 = vmul.f32 %v1916_v37, %v2529_v0 }
 0x2da   : > { %1917 = vtanh.f32 %v1521_v24 }
 0x2db   : > { %v1560_v4 = vadd.f32 %v1552_v3, %v1544_v48 }
 0x2dd   : > { %1568 = vst.msk [vmem:[%s2694_s27 + $0x28] sm:$0xff] %vm302_vm0, %v1560_v4  ;;  %v1500_v58 = vpop.f32.mrf.mxu1 }
 0x2de   : > { %v1510_v15 = vadd.f32 %v1500_v58, %v1416_v5 }
 0x2e0   : > { %v1918_v19 = vpop.eup %1917  ;;  %v1522_v20 = vadd.f32 %v2683_v6, %v1510_v15 }
 0x2e1   : > { %v1553_v35 = vmul.f32 %v1918_v19, %v2533_v17 }
 0x2e2   : > { %1919 = vtanh.f32 %v1522_v20 }
 0x2e3   : > { %v1561_v0 = vadd.f32 %v1553_v35, %v1545_v21 }
 0x2e5   : > { %1569 = vst.msk [vmem:[%s2694_s27 + $0x30] sm:$0xff] %vm302_vm0, %v1561_v0 }
 0x2e8   : > { %v1920_v22 = vpop.eup %1919 }
 0x2e9   : > { %v1554_v30 = vmul.f32 %v1920_v22, %v2587_v53 }
 0x2eb   : > { %v1562_v28 = vadd.f32 %v1554_v30, %v1546_v26 }
 0x2ed   : > { %1570 = vst.msk [vmem:[%s2694_s27 + $0x38] sm:$0xff] %vm302_vm0, %v1562_v28 }
 0x2ee PF: > { %s16_s21 = sadd.s32 1, %s1927_s21  }
 0x2ef   : > { %p13_p4 = scmp.ge.s32.totalorder %s16_s21, 4  }
 0x2f1   :  { %15 = sbr.rel (!%p13_p4) target bundleno = 1 (0x1), region = 85 }

</bundles_post_ra>
